<compile_context>
chip_gen: v7x
topology: tpu7x:2x2x1
jax: 0.10.0
libtpu: 0.0.40
codegen_flags: <defaults>
</compile_context>

<pallas_src>
import functools

import jax
import jax.numpy as jnp
from jax.experimental import pallas as pl
from jax.experimental.pallas import tpu as pltpu

_BN_EPS = 1e-5
_PARITIES = ((0, 0), (0, 1), (1, 0), (1, 1))   # (row parity, col parity)


# ---------------- Pallas kernels ----------------

def _linear_kernel(z_ref, w_ref, b_ref, o_ref):
    # z: (B, zdim) f32, w: (zdim, TN) f32, b: (1, TN) f32 -> o: (B, TN) bf16
    acc = jnp.dot(z_ref[...], w_ref[...], preferred_element_type=jnp.float32)
    o_ref[...] = (acc + b_ref[...]).astype(o_ref.dtype)


def _deconv1_kernel(xp_ref, w_ref, b_ref, y_ref, sum_ref, sq_ref):
    # One (batch, out_row) grid step of ConvTranspose2d(128->64, k=4, s=2, p=1) via
    # the 4-parity / 2x2-tap decomposition, fused with accumulation of the
    # full-batch per-channel sum / sum-of-squares for BatchNorm.
    #   xp : (1, 9, 9, 128) bf16   zero-padded input (pad=1 each side)
    #   w  : (4, 4, 128, 64) bf16  [parity, tap, cin, cout]
    #   b  : (1, 64) f32
    #   y  : (1, 1, 28, 64) f32    rows = parity*7 + out_col
    #   sum/sq : (1, 64) f32       accumulated over the whole grid
    b_i = pl.program_id(0)
    m = pl.program_id(1)

    @pl.when(jnp.logical_and(b_i == 0, m == 0))
    def _init():
        sum_ref[...] = jnp.zeros_like(sum_ref)
        sq_ref[...] = jnp.zeros_like(sq_ref)

    for p, (py, px) in enumerate(_PARITIES):
        acc = None
        for dr in range(2):
            for dc in range(2):
                lhs = xp_ref[0, m + py + dr, px + dc:px + dc + 7, :]      # (7, 128)
                d = jnp.dot(lhs, w_ref[p, dr * 2 + dc],
                            preferred_element_type=jnp.float32)           # (7, 64)
                acc = d if acc is None else acc + d
        out = acc + b_ref[...]
        y_ref[0, 0, p * 7:(p + 1) * 7, :] = out
        sum_ref[...] += jnp.sum(out, axis=0, keepdims=True)
        sq_ref[...] += jnp.sum(out * out, axis=0, keepdims=True)


def _bn_relu_kernel(y_ref, scale_ref, shift_ref, o_ref):
    # y: (1, 7, 28, 64) f32, scale/shift: (1, 64) f32 -> o: (1, 7, 28, 64) bf16
    scale = scale_ref[...].reshape(1, 1, 1, -1)
    shift = shift_ref[...].reshape(1, 1, 1, -1)
    o_ref[...] = jnp.maximum(y_ref[...] * scale + shift, 0.0).astype(o_ref.dtype)


def _deconv2_sigmoid_kernel(xp_ref, w_ref, b_ref, o_ref):
    # One (batch, out_row) grid step of ConvTranspose2d(64->C, k=4, s=2, p=1) with the
    # same parity decomposition, fused sigmoid. Cout is zero-padded to 128 so the
    # output store is lane-dense.
    #   xp: (1, 16, 16, 64) bf16, w: (4, 4, 64, 128) bf16, b: (1, 128) f32
    #   o : (1, 1, 56, 128) f32   rows = parity*14 + out_col
    m = pl.program_id(1)
    for p, (py, px) in enumerate(_PARITIES):
        acc = None
        for dr in range(2):
            for dc in range(2):
                lhs = xp_ref[0, m + py + dr, px + dc:px + dc + 14, :]     # (14, 64)
                d = jnp.dot(lhs, w_ref[p, dr * 2 + dc],
                            preferred_element_type=jnp.float32)           # (14, 128)
                acc = d if acc is None else acc + d
        logits = acc + b_ref[...]
        # exact sigmoid via tanh (EUP), stays within [0, 1]
        o_ref[0, 0, p * 14:(p + 1) * 14, :] = 0.5 * (jnp.tanh(0.5 * logits) + 1.0)


# ---------------- pallas_call wrappers ----------------

def _expand_linear(z, w_lin, b_lin):
    bsz, zdim = z.shape
    n_out = w_lin.shape[1]
    tn = 7 * 128                       # one output image row (w*c) per grid step
    return pl.pallas_call(
        _linear_kernel,
        out_shape=jax.ShapeDtypeStruct((bsz, n_out), jnp.bfloat16),
        grid=(n_out // tn,),
        in_specs=[
            pl.BlockSpec((bsz, zdim), lambda j: (0, 0)),
            pl.BlockSpec((zdim, tn), lambda j: (0, j)),
            pl.BlockSpec((1, tn), lambda j: (0, j)),
        ],
        out_specs=pl.BlockSpec((bsz, tn), lambda j: (0, j)),
        compiler_params=pltpu.CompilerParams(dimension_semantics=("parallel",)),
    )(z, w_lin, b_lin)


def _deconv1(xp, w1, b1):
    bsz = xp.shape[0]
    return pl.pallas_call(
        _deconv1_kernel,
        out_shape=(
            jax.ShapeDtypeStruct((bsz, 7, 28, 64), jnp.float32),
            jax.ShapeDtypeStruct((1, 64), jnp.float32),
            jax.ShapeDtypeStruct((1, 64), jnp.float32),
        ),
        grid=(bsz, 7),
        in_specs=[
            pl.BlockSpec((1, 9, 9, 128), lambda b, m: (b, 0, 0, 0)),
            pl.BlockSpec((4, 4, 128, 64), lambda b, m: (0, 0, 0, 0)),
            pl.BlockSpec((1, 64), lambda b, m: (0, 0)),
        ],
        out_specs=(
            pl.BlockSpec((1, 1, 28, 64), lambda b, m: (b, m, 0, 0)),
            pl.BlockSpec((1, 64), lambda b, m: (0, 0)),
            pl.BlockSpec((1, 64), lambda b, m: (0, 0)),
        ),
        compiler_params=pltpu.CompilerParams(
            dimension_semantics=("arbitrary", "arbitrary")),
    )(xp, w1, b1)


def _bn_relu(y, scale, shift):
    bsz = y.shape[0]
    return pl.pallas_call(
        _bn_relu_kernel,
        out_shape=jax.ShapeDtypeStruct(y.shape, jnp.bfloat16),
        grid=(bsz,),
        in_specs=[
            pl.BlockSpec((1, 7, 28, 64), lambda b: (b, 0, 0, 0)),
            pl.BlockSpec((1, 64), lambda b: (0, 0)),
            pl.BlockSpec((1, 64), lambda b: (0, 0)),
        ],
        out_specs=pl.BlockSpec((1, 7, 28, 64), lambda b: (b, 0, 0, 0)),
        compiler_params=pltpu.CompilerParams(dimension_semantics=("parallel",)),
    )(y, scale, shift)


def _deconv2_sigmoid(xp, w2, b2):
    bsz = xp.shape[0]
    return pl.pallas_call(
        _deconv2_sigmoid_kernel,
        out_shape=jax.ShapeDtypeStruct((bsz, 14, 56, 128), jnp.float32),
        grid=(bsz, 14),
        in_specs=[
            pl.BlockSpec((1, 16, 16, 64), lambda b, m: (b, 0, 0, 0)),
            pl.BlockSpec((4, 4, 64, 128), lambda b, m: (0, 0, 0, 0)),
            pl.BlockSpec((1, 128), lambda b, m: (0, 0)),
        ],
        out_specs=pl.BlockSpec((1, 1, 56, 128), lambda b, m: (b, m, 0, 0)),
        compiler_params=pltpu.CompilerParams(
            dimension_semantics=("parallel", "parallel")),
    )(xp, w2, b2)


# ---------------- Decoder forward (jitted) ----------------

@functools.partial(jax.jit, static_argnames=("channels",))
def decoder_forward(prep, z, *, channels):
    bsz = z.shape[0]

    # expand: Linear(zdim -> 128*7*7), columns pre-permuted to (h, w, c) order
    out = _expand_linear(z, prep["w_lin"], prep["b_lin"])               # (B, 6272) bf16
    x = out.reshape(bsz, 7, 7, 128)                                     # NHWC directly
    xp = jnp.pad(x, ((0, 0), (1, 1), (1, 1), (0, 0)))                   # (B, 9, 9, 128)

    # deconv1 (parity decomposition) + in-kernel BN stat accumulation
    y_pre, s, sq = _deconv1(xp, prep["w1"], prep["b1"])                 # (B,7,28,64), (1,64)x2
    count = jnp.float32(bsz * 14 * 14)
    mean = s / count
    var = sq / count - mean * mean                                      # biased batch variance
    scale = prep["gamma"] * jax.lax.rsqrt(var + _BN_EPS)
    shift = prep["beta"] - mean * scale
    y1 = _bn_relu(y_pre, scale, shift)                                  # (B, 7, 28, 64) bf16

    # interleave parities -> (B, 14, 14, 64), then pad for deconv2
    y1 = y1.reshape(bsz, 7, 2, 2, 7, 64).transpose(0, 1, 2, 4, 3, 5)
    y1 = y1.reshape(bsz, 14, 14, 64)
    y1p = jnp.pad(y1, ((0, 0), (1, 1), (1, 1), (0, 0)))                 # (B, 16, 16, 64)

    # deconv2 (parity decomposition) + sigmoid, Cout padded to 128 lanes
    o = _deconv2_sigmoid(y1p, prep["w2"], prep["b2"])                   # (B, 14, 56, 128)
    o = o[..., :channels].reshape(bsz, 14, 2, 2, 14, channels)
    o = o.transpose(0, 1, 2, 4, 3, 5).reshape(bsz, 28, 28, channels)
    return o.transpose(0, 3, 1, 2)                                      # NCHW like PyTorch


# ---------------- One-time parameter preparation ----------------

def _parity_tap_weights(w):
    # PyTorch ConvTranspose2d weight (Cin, Cout, 4, 4) -> (4 parities, 4 taps, Cin, Cout)
    # Output position (2m+py, 2n+px) = sum over taps (dr, dc) of
    #   xp[m+py+dr, n+px+dc] @ w[:, :, (3-py)-2*dr, (3-px)-2*dc]
    # where xp is the input zero-padded by 1 on every side.
    mats = []
    for py in range(2):
        for px in range(2):
            taps = []
            for dr in range(2):
                for dc in range(2):
                    kh = (3 - py) - 2 * dr
                    kw = (3 - px) - 2 * dc
                    taps.append(w[:, :, kh, kw])          # (Cin, Cout)
            mats.append(jnp.stack(taps, axis=0))          # (4, Cin, Cout)
    return jnp.stack(mats, axis=0)                        # (4, 4, Cin, Cout)


def prepare_params(params):
    """One-time transformation of PyTorch-layout params into kernel layouts."""
    # Linear: permute output columns from (c, h, w) to (h, w, c) so the kernel emits
    # NHWC directly (no activation transpose after the matmul).
    hh, ww, cc = jnp.meshgrid(jnp.arange(7), jnp.arange(7), jnp.arange(128),
                              indexing="ij")
    perm = (cc * 49 + hh * 7 + ww).reshape(-1)                          # new -> old
    w_lin = params["expand_w"][perm, :].T                               # (zdim, 6272)
    b_lin = params["expand_b"][perm][None, :]                           # (1, 6272)

    w1 = _parity_tap_weights(params["deconv1_w"]).astype(jnp.bfloat16)  # (4, 4, 128, 64)
    b1 = params["deconv1_b"][None, :]                                   # (1, 64)

    channels = params["deconv2_b"].shape[0]
    assert channels <= 128
    w2 = _parity_tap_weights(params["deconv2_w"])                       # (4, 4, 64, C)
    w2 = jnp.pad(w2, ((0, 0), (0, 0), (0, 0), (0, 128 - channels)))
    w2 = w2.astype(jnp.bfloat16)                                        # (4, 4, 64, 128)
    b2 = jnp.pad(params["deconv2_b"], (0, 128 - channels))[None, :]     # (1, 128)

    return {
        "w_lin": w_lin, "b_lin": b_lin,
        "w1": w1, "b1": b1,
        "gamma": params["bn1_gamma"][None, :], "beta": params["bn1_beta"][None, :],
        "w2": w2, "b2": b2,
    }


# ---------------- Parameter init (deterministic, PyTorch shapes) ----------------

def init_params(key, zdim, channels):
    ks = jax.random.split(key, 6)
    s = 0.05
    return {
        "expand_w": s * jax.random.normal(ks[0], (128 * 7 * 7, zdim), jnp.float32),
        "expand_b": s * jax.random.normal(ks[1], (128 * 7 * 7,), jnp.float32),
        "deconv1_w": s * jax.random.normal(ks[2], (128, 64, 4, 4), jnp.float32),
        "deconv1_b": s * jax.random.normal(ks[3], (64,), jnp.float32),
        "bn1_gamma": jnp.ones((64,), jnp.float32),
        "bn1_beta": jnp.zeros((64,), jnp.float32),
        "deconv2_w": s * jax.random.normal(ks[4], (64, channels, 4, 4), jnp.float32),
        "deconv2_b": s * jax.random.normal(ks[5], (channels,), jnp.float32),
    }


# ---------------- Pure-JAX reference (for correctness check) ----------------

def _conv_transpose_ref(x_nchw, w, b, stride=2, pad=1):
    k = w.shape[-1]
    wf = jnp.flip(w, (2, 3)).transpose(1, 0, 2, 3)                      # (Cout, Cin, K, K)
    y = jax.lax.conv_general_dilated(
        x_nchw, wf, window_strides=(1, 1),
        padding=((k - 1 - pad,) * 2, (k - 1 - pad,) * 2),
        lhs_dilation=(stride, stride),
        dimension_numbers=("NCHW", "OIHW", "NCHW"))
    return y + b[None, :, None, None]


def decoder_reference(params, z):
    out = z @ params["expand_w"].T + params["expand_b"]
    x = out.reshape(z.shape[0], 128, 7, 7)
    y = _conv_transpose_ref(x, params["deconv1_w"], params["deconv1_b"])
    mean = jnp.mean(y, axis=(0, 2, 3), keepdims=True)
    var = jnp.var(y, axis=(0, 2, 3), keepdims=True)
    y = (y - mean) * jax.lax.rsqrt(var + _BN_EPS)
    y = y * params["bn1_gamma"][None, :, None, None] + params["bn1_beta"][None, :, None, None]
    y = jnp.maximum(y, 0.0)
    y = _conv_transpose_ref(y, params["deconv2_w"], params["deconv2_b"])
    return jax.nn.sigmoid(y)


# TODO(synk): BatchNorm running_mean/running_var buffer updates (a training-time
# side effect, not part of the returned forward value) are not tracked.

if __name__ == "__main__":
    zdim, channels, batch = 32, 3, 2
    key = jax.random.PRNGKey(0)
    pkey, zkey = jax.random.split(key)
    params = init_params(pkey, zdim, channels)
    prep = prepare_params(params)
    z = jax.random.normal(zkey, (batch, zdim), jnp.float32)

    out = decoder_forward(prep, z, channels=channels)
    out = jax.block_until_ready(out)

    assert out.shape == (batch, channels, 28, 28), out.shape
    assert out.dtype == jnp.float32
    assert bool(jnp.all(jnp.isfinite(out)))
    assert bool(jnp.all((out >= 0.0) & (out <= 1.0)))       # sigmoid range

    ref = decoder_reference(params, z)
    max_err = float(jnp.max(jnp.abs(out - ref)))
    assert max_err < 5e-2, f"mismatch vs reference: {max_err}"

    print("KERNEL_OK")
</pallas_src>

<mosaic_0001>
module attributes {stable_mosaic.version = 11 : i64} {
  func.func @_linear_kernel(%arg0: i32, %arg1: memref<2x32xf32, #tpu.memory_space<vmem>>, %arg2: memref<32x896xf32, #tpu.memory_space<vmem>>, %arg3: memref<1x896xf32, #tpu.memory_space<vmem>>, %arg4: memref<2x896xbf16, #tpu.memory_space<vmem>>) attributes {dimension_semantics = [#tpu.dimension_semantics<parallel>], iteration_bounds = array<i64: 7>, scalar_prefetch = 0 : i64, scratch_operands = 0 : i64, tpu.core_type = #tpu.core_type<tc>, window_params = [{pipeline_mode = #tpu.pipeline_mode<synchronous>, transform_indices = @transform_0, window_bounds = array<i64: 2, 32>}, {transform_indices = @transform_1, window_bounds = array<i64: 32, 896>}, {transform_indices = @transform_2, window_bounds = array<i64: 1, 896>}, {transform_indices = @transform_3, window_bounds = array<i64: 2, 896>}]} {
    %c0 = arith.constant 0 : index
    %c0_0 = arith.constant 0 : index
    %0 = vector.load %arg1[%c0, %c0_0] : memref<2x32xf32, #tpu.memory_space<vmem>>, vector<2x32xf32>
    %c0_1 = arith.constant 0 : index
    %c0_2 = arith.constant 0 : index
    %1 = vector.load %arg2[%c0_1, %c0_2] : memref<32x896xf32, #tpu.memory_space<vmem>>, vector<32x896xf32>
    %cst = arith.constant dense<0.000000e+00> : vector<2x896xf32>
    %2 = tpu.matmul %0, %1, %cst {dimension_numbers = #tpu.dot_dimension_numbers<[1], [0], [0], [1], [0, 0, 1, 1], [], []>} : vector<2x32xf32>, vector<32x896xf32>, vector<2x896xf32> -> vector<2x896xf32>
    %c0_3 = arith.constant 0 : index
    %c0_4 = arith.constant 0 : index
    %3 = vector.load %arg3[%c0_3, %c0_4] : memref<1x896xf32, #tpu.memory_space<vmem>>, vector<1x896xf32>
    %4 = vector.broadcast %3 : vector<1x896xf32> to vector<2x896xf32>
    %5 = arith.addf %2, %4 : vector<2x896xf32>
    %6 = arith.truncf %5 : vector<2x896xf32> to vector<2x896xbf16>
    %c0_5 = arith.constant 0 : index
    %c0_6 = arith.constant 0 : index
    %7 = vector.load %arg4[%c0_5, %c0_6] : memref<2x896xbf16, #tpu.memory_space<vmem>>, vector<2x896xbf16>
    tpu.vector_store %arg4[%c0_5, %c0_6], %6 {strides = array<i32>} : memref<2x896xbf16, #tpu.memory_space<vmem>>, vector<2x896xbf16>,
    return
  }
  func.func @transform_0(%arg0: i32) -> (i32, i32) {
    %c0_i32 = arith.constant 0 : i32
    %c0_i32_0 = arith.constant 0 : i32
    %c0_i32_1 = arith.constant 0 : i32
    return %c0_i32, %c0_i32_0 : i32, i32
  }
  func.func @transform_1(%arg0: i32) -> (i32, i32) {
    %c0_i32 = arith.constant 0 : i32
    %c0_i32_0 = arith.constant 0 : i32
    return %c0_i32, %arg0 : i32, i32
  }
  func.func @transform_2(%arg0: i32) -> (i32, i32) {
    %c0_i32 = arith.constant 0 : i32
    %c0_i32_0 = arith.constant 0 : i32
    return %c0_i32, %arg0 : i32, i32
  }
  func.func @transform_3(%arg0: i32) -> (i32, i32) {
    %c0_i32 = arith.constant 0 : i32
    %c0_i32_0 = arith.constant 0 : i32
    return %c0_i32, %arg0 : i32, i32
  }
}

module attributes {stable_mosaic.version = 11 : i64} {
  func.func @_bn_relu_kernel(%arg0: i32, %arg1: memref<1x7x28x64xf32, #tpu.memory_space<vmem>>, %arg2: memref<1x64xf32, #tpu.memory_space<vmem>>, %arg3: memref<1x64xf32, #tpu.memory_space<vmem>>, %arg4: memref<1x7x28x64xbf16, #tpu.memory_space<vmem>>) attributes {dimension_semantics = [#tpu.dimension_semantics<parallel>], iteration_bounds = array<i64: 2>, scalar_prefetch = 0 : i64, scratch_operands = 0 : i64, tpu.core_type = #tpu.core_type<tc>, window_params = [{transform_indices = @transform_0, window_bounds = array<i64: 1, 7, 28, 64>}, {pipeline_mode = #tpu.pipeline_mode<synchronous>, transform_indices = @transform_1, window_bounds = array<i64: 1, 64>}, {pipeline_mode = #tpu.pipeline_mode<synchronous>, transform_indices = @transform_2, window_bounds = array<i64: 1, 64>}, {transform_indices = @transform_3, window_bounds = array<i64: 1, 7, 28, 64>}]} {
    %c0 = arith.constant 0 : index
    %c0_0 = arith.constant 0 : index
    %0 = vector.load %arg2[%c0, %c0_0] : memref<1x64xf32, #tpu.memory_space<vmem>>, vector<1x64xf32>
    %1 = vector.shape_cast %0 : vector<1x64xf32> to vector<1x1x1x64xf32>
    %c0_1 = arith.constant 0 : index
    %c0_2 = arith.constant 0 : index
    %2 = vector.load %arg3[%c0_1, %c0_2] : memref<1x64xf32, #tpu.memory_space<vmem>>, vector<1x64xf32>
    %3 = vector.shape_cast %2 : vector<1x64xf32> to vector<1x1x1x64xf32>
    %c0_3 = arith.constant 0 : index
    %c0_4 = arith.constant 0 : index
    %c0_5 = arith.constant 0 : index
    %c0_6 = arith.constant 0 : index
    %4 = vector.load %arg1[%c0_3, %c0_4, %c0_5, %c0_6] : memref<1x7x28x64xf32, #tpu.memory_space<vmem>>, vector<1x7x28x64xf32>
    %5 = vector.broadcast %1 : vector<1x1x1x64xf32> to vector<1x7x28x64xf32>
    %6 = arith.mulf %4, %5 : vector<1x7x28x64xf32>
    %7 = vector.broadcast %3 : vector<1x1x1x64xf32> to vector<1x7x28x64xf32>
    %8 = arith.addf %6, %7 : vector<1x7x28x64xf32>
    %cst = arith.constant 0.000000e+00 : f32
    %9 = vector.broadcast %cst : f32 to vector<1x7x28x64xf32>
    %10 = arith.maximumf %8, %9 : vector<1x7x28x64xf32>
    %11 = arith.truncf %10 : vector<1x7x28x64xf32> to vector<1x7x28x64xbf16>
    %c0_7 = arith.constant 0 : index
    %c0_8 = arith.constant 0 : index
    %c0_9 = arith.constant 0 : index
    %c0_10 = arith.constant 0 : index
    %12 = vector.load %arg4[%c0_7, %c0_8, %c0_9, %c0_10] : memref<1x7x28x64xbf16, #tpu.memory_space<vmem>>, vector<1x7x28x64xbf16>
    tpu.vector_store %arg4[%c0_7, %c0_8, %c0_9, %c0_10], %11 {strides = array<i32>} : memref<1x7x28x64xbf16, #tpu.memory_space<vmem>>, vector<1x7x28x64xbf16>,
    return
  }
  func.func @transform_0(%arg0: i32) -> (i32, i32, i32, i32) {
    %c0_i32 = arith.constant 0 : i32
    %c0_i32_0 = arith.constant 0 : i32
    %c0_i32_1 = arith.constant 0 : i32
    %c0_i32_2 = arith.constant 0 : i32
    return %arg0, %c0_i32, %c0_i32_0, %c0_i32_1 : i32, i32, i32, i32
  }
  func.func @transform_1(%arg0: i32) -> (i32, i32) {
    %c0_i32 = arith.constant 0 : i32
    %c0_i32_0 = arith.constant 0 : i32
    %c0_i32_1 = arith.constant 0 : i32
    return %c0_i32, %c0_i32_0 : i32, i32
  }
  func.func @transform_2(%arg0: i32) -> (i32, i32) {
    %c0_i32 = arith.constant 0 : i32
    %c0_i32_0 = arith.constant 0 : i32
    %c0_i32_1 = arith.constant 0 : i32
    return %c0_i32, %c0_i32_0 : i32, i32
  }
  func.func @transform_3(%arg0: i32) -> (i32, i32, i32, i32) {
    %c0_i32 = arith.constant 0 : i32
    %c0_i32_0 = arith.constant 0 : i32
    %c0_i32_1 = arith.constant 0 : i32
    %c0_i32_2 = arith.constant 0 : i32
    return %arg0, %c0_i32, %c0_i32_0, %c0_i32_1 : i32, i32, i32, i32
  }
}

module attributes {stable_mosaic.version = 11 : i64} {
  func.func @_deconv1_kernel(%arg0: i32, %arg1: i32, %arg2: memref<1x9x9x128xbf16, #tpu.memory_space<vmem>>, %arg3: memref<4x4x128x64xbf16, #tpu.memory_space<vmem>>, %arg4: memref<1x64xf32, #tpu.memory_space<vmem>>, %arg5: memref<1x1x28x64xf32, #tpu.memory_space<vmem>>, %arg6: memref<1x64xf32, #tpu.memory_space<vmem>>, %arg7: memref<1x64xf32, #tpu.memory_space<vmem>>) attributes {dimension_semantics = [#tpu.dimension_semantics<arbitrary>, #tpu.dimension_semantics<arbitrary>], iteration_bounds = array<i64: 2, 7>, scalar_prefetch = 0 : i64, scratch_operands = 0 : i64, tpu.core_type = #tpu.core_type<tc>, window_params = [{transform_indices = @transform_0, window_bounds = array<i64: 1, 9, 9, 128>}, {pipeline_mode = #tpu.pipeline_mode<synchronous>, transform_indices = @transform_1, window_bounds = array<i64: 4, 4, 128, 64>}, {pipeline_mode = #tpu.pipeline_mode<synchronous>, transform_indices = @transform_2, window_bounds = array<i64: 1, 64>}, {transform_indices = @transform_3, window_bounds = array<i64: 1, 1, 28, 64>}, {pipeline_mode = #tpu.pipeline_mode<synchronous>, transform_indices = @transform_4, window_bounds = array<i64: 1, 64>}, {pipeline_mode = #tpu.pipeline_mode<synchronous>, transform_indices = @transform_5, window_bounds = array<i64: 1, 64>}]} {
    %c0_i32 = arith.constant 0 : i32
    %0 = arith.cmpi eq, %arg0, %c0_i32 : i32
    %c0_i32_0 = arith.constant 0 : i32
    %1 = arith.cmpi eq, %arg1, %c0_i32_0 : i32
    %2 = arith.andi %0, %1 : i1
    %3 = arith.extui %2 : i1 to i32
    %c0_i32_1 = arith.constant 0 : i32
    %4 = arith.cmpi ne, %3, %c0_i32_1 : i32
    scf.if %4 {
      %cst_217 = arith.constant 0.000000e+00 : f32
      %213 = vector.broadcast %cst_217 : f32 to vector<1x64xf32>
      %c0_218 = arith.constant 0 : index
      %c0_219 = arith.constant 0 : index
      %214 = vector.load %arg6[%c0_218, %c0_219] : memref<1x64xf32, #tpu.memory_space<vmem>>, vector<1x64xf32>
      tpu.vector_store %arg6[%c0_218, %c0_219], %213 {strides = array<i32>} : memref<1x64xf32, #tpu.memory_space<vmem>>, vector<1x64xf32>,
      %cst_220 = arith.constant 0.000000e+00 : f32
      %215 = vector.broadcast %cst_220 : f32 to vector<1x64xf32>
      %c0_221 = arith.constant 0 : index
      %c0_222 = arith.constant 0 : index
      %216 = vector.load %arg7[%c0_221, %c0_222] : memref<1x64xf32, #tpu.memory_space<vmem>>, vector<1x64xf32>
      tpu.vector_store %arg7[%c0_221, %c0_222], %215 {strides = array<i32>} : memref<1x64xf32, #tpu.memory_space<vmem>>, vector<1x64xf32>,
    } else {
    }
    %c0_i32_2 = arith.constant 0 : i32
    %5 = arith.addi %arg1, %c0_i32_2 : i32
    %c0_i32_3 = arith.constant 0 : i32
    %6 = arith.addi %5, %c0_i32_3 : i32
    %c0 = arith.constant 0 : index
    %7 = arith.index_cast %6 : i32 to index
    %c0_4 = arith.constant 0 : index
    %c0_5 = arith.constant 0 : index
    %8 = vector.load %arg2[%c0, %7, %c0_4, %c0_5] : memref<1x9x9x128xbf16, #tpu.memory_space<vmem>>, vector<1x1x7x128xbf16>
    %9 = vector.shape_cast %8 : vector<1x1x7x128xbf16> to vector<7x128xbf16>
    %c0_6 = arith.constant 0 : index
    %c0_7 = arith.constant 0 : index
    %c0_8 = arith.constant 0 : index
    %c0_9 = arith.constant 0 : index
    %10 = vector.load %arg3[%c0_6, %c0_7, %c0_8, %c0_9] : memref<4x4x128x64xbf16, #tpu.memory_space<vmem>>, vector<1x1x128x64xbf16>
    %11 = vector.shape_cast %10 : vector<1x1x128x64xbf16> to vector<128x64xbf16>
    %cst = arith.constant dense<0.000000e+00> : vector<7x64xf32>
    %12 = tpu.matmul %9, %11, %cst {dimension_numbers = #tpu.dot_dimension_numbers<[1], [0], [0], [1], [0, 0, 1, 1], [], []>} : vector<7x128xbf16>, vector<128x64xbf16>, vector<7x64xf32> -> vector<7x64xf32>
    %c0_i32_10 = arith.constant 0 : i32
    %13 = arith.addi %arg1, %c0_i32_10 : i32
    %c0_i32_11 = arith.constant 0 : i32
    %14 = arith.addi %13, %c0_i32_11 : i32
    %c0_12 = arith.constant 0 : index
    %15 = arith.index_cast %14 : i32 to index
    %c1 = arith.constant 1 : index
    %c0_13 = arith.constant 0 : index
    %16 = vector.load %arg2[%c0_12, %15, %c1, %c0_13] : memref<1x9x9x128xbf16, #tpu.memory_space<vmem>>, vector<1x1x7x128xbf16>
    %17 = vector.shape_cast %16 : vector<1x1x7x128xbf16> to vector<7x128xbf16>
    %c0_14 = arith.constant 0 : index
    %c1_15 = arith.constant 1 : index
    %c0_16 = arith.constant 0 : index
    %c0_17 = arith.constant 0 : index
    %18 = vector.load %arg3[%c0_14, %c1_15, %c0_16, %c0_17] : memref<4x4x128x64xbf16, #tpu.memory_space<vmem>>, vector<1x1x128x64xbf16>
    %19 = vector.shape_cast %18 : vector<1x1x128x64xbf16> to vector<128x64xbf16>
    %cst_18 = arith.constant dense<0.000000e+00> : vector<7x64xf32>
    %20 = tpu.matmul %17, %19, %cst_18 {dimension_numbers = #tpu.dot_dimension_numbers<[1], [0], [0], [1], [0, 0, 1, 1], [], []>} : vector<7x128xbf16>, vector<128x64xbf16>, vector<7x64xf32> -> vector<7x64xf32>
    %21 = arith.addf %12, %20 : vector<7x64xf32>
    %c0_i32_19 = arith.constant 0 : i32
    %22 = arith.addi %arg1, %c0_i32_19 : i32
    %c1_i32 = arith.constant 1 : i32
    %23 = arith.addi %22, %c1_i32 : i32
    %c0_20 = arith.constant 0 : index
    %24 = arith.index_cast %23 : i32 to index
    %c0_21 = arith.constant 0 : index
    %c0_22 = arith.constant 0 : index
    %25 = vector.load %arg2[%c0_20, %24, %c0_21, %c0_22] : memref<1x9x9x128xbf16, #tpu.memory_space<vmem>>, vector<1x1x7x128xbf16>
    %26 = vector.shape_cast %25 : vector<1x1x7x128xbf16> to vector<7x128xbf16>
    %c0_23 = arith.constant 0 : index
    %c2 = arith.constant 2 : index
    %c0_24 = arith.constant 0 : index
    %c0_25 = arith.constant 0 : index
    %27 = vector.load %arg3[%c0_23, %c2, %c0_24, %c0_25] : memref<4x4x128x64xbf16, #tpu.memory_space<vmem>>, vector<1x1x128x64xbf16>
    %28 = vector.shape_cast %27 : vector<1x1x128x64xbf16> to vector<128x64xbf16>
    %cst_26 = arith.constant dense<0.000000e+00> : vector<7x64xf32>
    %29 = tpu.matmul %26, %28, %cst_26 {dimension_numbers = #tpu.dot_dimension_numbers<[1], [0], [0], [1], [0, 0, 1, 1], [], []>} : vector<7x128xbf16>, vector<128x64xbf16>, vector<7x64xf32> -> vector<7x64xf32>
    %30 = arith.addf %21, %29 : vector<7x64xf32>
    %c0_i32_27 = arith.constant 0 : i32
    %31 = arith.addi %arg1, %c0_i32_27 : i32
    %c1_i32_28 = arith.constant 1 : i32
    %32 = arith.addi %31, %c1_i32_28 : i32
    %c0_29 = arith.constant 0 : index
    %33 = arith.index_cast %32 : i32 to index
    %c1_30 = arith.constant 1 : index
    %c0_31 = arith.constant 0 : index
    %34 = vector.load %arg2[%c0_29, %33, %c1_30, %c0_31] : memref<1x9x9x128xbf16, #tpu.memory_space<vmem>>, vector<1x1x7x128xbf16>
    %35 = vector.shape_cast %34 : vector<1x1x7x128xbf16> to vector<7x128xbf16>
    %c0_32 = arith.constant 0 : index
    %c3 = arith.constant 3 : index
    %c0_33 = arith.constant 0 : index
    %c0_34 = arith.constant 0 : index
    %36 = vector.load %arg3[%c0_32, %c3, %c0_33, %c0_34] : memref<4x4x128x64xbf16, #tpu.memory_space<vmem>>, vector<1x1x128x64xbf16>
    %37 = vector.shape_cast %36 : vector<1x1x128x64xbf16> to vector<128x64xbf16>
    %cst_35 = arith.constant dense<0.000000e+00> : vector<7x64xf32>
    %38 = tpu.matmul %35, %37, %cst_35 {dimension_numbers = #tpu.dot_dimension_numbers<[1], [0], [0], [1], [0, 0, 1, 1], [], []>} : vector<7x128xbf16>, vector<128x64xbf16>, vector<7x64xf32> -> vector<7x64xf32>
    %39 = arith.addf %30, %38 : vector<7x64xf32>
    %c0_36 = arith.constant 0 : index
    %c0_37 = arith.constant 0 : index
    %40 = vector.load %arg4[%c0_36, %c0_37] : memref<1x64xf32, #tpu.memory_space<vmem>>, vector<1x64xf32>
    %41 = vector.broadcast %40 : vector<1x64xf32> to vector<7x64xf32>
    %42 = arith.addf %39, %41 : vector<7x64xf32>
    %c0_38 = arith.constant 0 : index
    %c0_39 = arith.constant 0 : index
    %c0_40 = arith.constant 0 : index
    %c0_41 = arith.constant 0 : index
    %43 = vector.load %arg5[%c0_38, %c0_39, %c0_40, %c0_41] : memref<1x1x28x64xf32, #tpu.memory_space<vmem>>, vector<1x1x7x64xf32>
    %44 = vector.shape_cast %43 : vector<1x1x7x64xf32> to vector<7x64xf32>
    %45 = vector.shape_cast %42 : vector<7x64xf32> to vector<1x1x7x64xf32>
    tpu.vector_store %arg5[%c0_38, %c0_39, %c0_40, %c0_41], %45 {strides = array<i32>} : memref<1x1x28x64xf32, #tpu.memory_space<vmem>>, vector<1x1x7x64xf32>,
    %c0_42 = arith.constant 0 : index
    %c0_43 = arith.constant 0 : index
    %46 = vector.load %arg6[%c0_42, %c0_43] : memref<1x64xf32, #tpu.memory_space<vmem>>, vector<1x64xf32>
    %cst_44 = arith.constant dense<0.000000e+00> : vector<64xf32>
    %47 = vector.multi_reduction <add>, %42, %cst_44 [0] : vector<7x64xf32> to vector<64xf32>
    %48 = vector.shape_cast %47 : vector<64xf32> to vector<1x64xf32>
    %49 = arith.addf %46, %48 : vector<1x64xf32>
    %c0_45 = arith.constant 0 : index
    %c0_46 = arith.constant 0 : index
    %50 = vector.load %arg6[%c0_45, %c0_46] : memref<1x64xf32, #tpu.memory_space<vmem>>, vector<1x64xf32>
    tpu.vector_store %arg6[%c0_45, %c0_46], %49 {strides = array<i32>} : memref<1x64xf32, #tpu.memory_space<vmem>>, vector<1x64xf32>,
    %c0_47 = arith.constant 0 : index
    %c0_48 = arith.constant 0 : index
    %51 = vector.load %arg7[%c0_47, %c0_48] : memref<1x64xf32, #tpu.memory_space<vmem>>, vector<1x64xf32>
    %52 = arith.mulf %42, %42 : vector<7x64xf32>
    %cst_49 = arith.constant dense<0.000000e+00> : vector<64xf32>
    %53 = vector.multi_reduction <add>, %52, %cst_49 [0] : vector<7x64xf32> to vector<64xf32>
    %54 = vector.shape_cast %53 : vector<64xf32> to vector<1x64xf32>
    %55 = arith.addf %51, %54 : vector<1x64xf32>
    %c0_50 = arith.constant 0 : index
    %c0_51 = arith.constant 0 : index
    %56 = vector.load %arg7[%c0_50, %c0_51] : memref<1x64xf32, #tpu.memory_space<vmem>>, vector<1x64xf32>
    tpu.vector_store %arg7[%c0_50, %c0_51], %55 {strides = array<i32>} : memref<1x64xf32, #tpu.memory_space<vmem>>, vector<1x64xf32>,
    %c0_i32_52 = arith.constant 0 : i32
    %57 = arith.addi %arg1, %c0_i32_52 : i32
    %c0_i32_53 = arith.constant 0 : i32
    %58 = arith.addi %57, %c0_i32_53 : i32
    %c0_54 = arith.constant 0 : index
    %59 = arith.index_cast %58 : i32 to index
    %c1_55 = arith.constant 1 : index
    %c0_56 = arith.constant 0 : index
    %60 = vector.load %arg2[%c0_54, %59, %c1_55, %c0_56] : memref<1x9x9x128xbf16, #tpu.memory_space<vmem>>, vector<1x1x7x128xbf16>
    %61 = vector.shape_cast %60 : vector<1x1x7x128xbf16> to vector<7x128xbf16>
    %c1_57 = arith.constant 1 : index
    %c0_58 = arith.constant 0 : index
    %c0_59 = arith.constant 0 : index
    %c0_60 = arith.constant 0 : index
    %62 = vector.load %arg3[%c1_57, %c0_58, %c0_59, %c0_60] : memref<4x4x128x64xbf16, #tpu.memory_space<vmem>>, vector<1x1x128x64xbf16>
    %63 = vector.shape_cast %62 : vector<1x1x128x64xbf16> to vector<128x64xbf16>
    %cst_61 = arith.constant dense<0.000000e+00> : vector<7x64xf32>
    %64 = tpu.matmul %61, %63, %cst_61 {dimension_numbers = #tpu.dot_dimension_numbers<[1], [0], [0], [1], [0, 0, 1, 1], [], []>} : vector<7x128xbf16>, vector<128x64xbf16>, vector<7x64xf32> -> vector<7x64xf32>
    %c0_i32_62 = arith.constant 0 : i32
    %65 = arith.addi %arg1, %c0_i32_62 : i32
    %c0_i32_63 = arith.constant 0 : i32
    %66 = arith.addi %65, %c0_i32_63 : i32
    %c0_64 = arith.constant 0 : index
    %67 = arith.index_cast %66 : i32 to index
    %c2_65 = arith.constant 2 : index
    %c0_66 = arith.constant 0 : index
    %68 = vector.load %arg2[%c0_64, %67, %c2_65, %c0_66] : memref<1x9x9x128xbf16, #tpu.memory_space<vmem>>, vector<1x1x7x128xbf16>
    %69 = vector.shape_cast %68 : vector<1x1x7x128xbf16> to vector<7x128xbf16>
    %c1_67 = arith.constant 1 : index
    %c1_68 = arith.constant 1 : index
    %c0_69 = arith.constant 0 : index
    %c0_70 = arith.constant 0 : index
    %70 = vector.load %arg3[%c1_67, %c1_68, %c0_69, %c0_70] : memref<4x4x128x64xbf16, #tpu.memory_space<vmem>>, vector<1x1x128x64xbf16>
    %71 = vector.shape_cast %70 : vector<1x1x128x64xbf16> to vector<128x64xbf16>
    %cst_71 = arith.constant dense<0.000000e+00> : vector<7x64xf32>
    %72 = tpu.matmul %69, %71, %cst_71 {dimension_numbers = #tpu.dot_dimension_numbers<[1], [0], [0], [1], [0, 0, 1, 1], [], []>} : vector<7x128xbf16>, vector<128x64xbf16>, vector<7x64xf32> -> vector<7x64xf32>
    %73 = arith.addf %64, %72 : vector<7x64xf32>
    %c0_i32_72 = arith.constant 0 : i32
    %74 = arith.addi %arg1, %c0_i32_72 : i32
    %c1_i32_73 = arith.constant 1 : i32
    %75 = arith.addi %74, %c1_i32_73 : i32
    %c0_74 = arith.constant 0 : index
    %76 = arith.index_cast %75 : i32 to index
    %c1_75 = arith.constant 1 : index
    %c0_76 = arith.constant 0 : index
    %77 = vector.load %arg2[%c0_74, %76, %c1_75, %c0_76] : memref<1x9x9x128xbf16, #tpu.memory_space<vmem>>, vector<1x1x7x128xbf16>
    %78 = vector.shape_cast %77 : vector<1x1x7x128xbf16> to vector<7x128xbf16>
    %c1_77 = arith.constant 1 : index
    %c2_78 = arith.constant 2 : index
    %c0_79 = arith.constant 0 : index
    %c0_80 = arith.constant 0 : index
    %79 = vector.load %arg3[%c1_77, %c2_78, %c0_79, %c0_80] : memref<4x4x128x64xbf16, #tpu.memory_space<vmem>>, vector<1x1x128x64xbf16>
    %80 = vector.shape_cast %79 : vector<1x1x128x64xbf16> to vector<128x64xbf16>
    %cst_81 = arith.constant dense<0.000000e+00> : vector<7x64xf32>
    %81 = tpu.matmul %78, %80, %cst_81 {dimension_numbers = #tpu.dot_dimension_numbers<[1], [0], [0], [1], [0, 0, 1, 1], [], []>} : vector<7x128xbf16>, vector<128x64xbf16>, vector<7x64xf32> -> vector<7x64xf32>
    %82 = arith.addf %73, %81 : vector<7x64xf32>
    %c0_i32_82 = arith.constant 0 : i32
    %83 = arith.addi %arg1, %c0_i32_82 : i32
    %c1_i32_83 = arith.constant 1 : i32
    %84 = arith.addi %83, %c1_i32_83 : i32
    %c0_84 = arith.constant 0 : index
    %85 = arith.index_cast %84 : i32 to index
    %c2_85 = arith.constant 2 : index
    %c0_86 = arith.constant 0 : index
    %86 = vector.load %arg2[%c0_84, %85, %c2_85, %c0_86] : memref<1x9x9x128xbf16, #tpu.memory_space<vmem>>, vector<1x1x7x128xbf16>
    %87 = vector.shape_cast %86 : vector<1x1x7x128xbf16> to vector<7x128xbf16>
    %c1_87 = arith.constant 1 : index
    %c3_88 = arith.constant 3 : index
    %c0_89 = arith.constant 0 : index
    %c0_90 = arith.constant 0 : index
    %88 = vector.load %arg3[%c1_87, %c3_88, %c0_89, %c0_90] : memref<4x4x128x64xbf16, #tpu.memory_space<vmem>>, vector<1x1x128x64xbf16>
    %89 = vector.shape_cast %88 : vector<1x1x128x64xbf16> to vector<128x64xbf16>
    %cst_91 = arith.constant dense<0.000000e+00> : vector<7x64xf32>
    %90 = tpu.matmul %87, %89, %cst_91 {dimension_numbers = #tpu.dot_dimension_numbers<[1], [0], [0], [1], [0, 0, 1, 1], [], []>} : vector<7x128xbf16>, vector<128x64xbf16>, vector<7x64xf32> -> vector<7x64xf32>
    %91 = arith.addf %82, %90 : vector<7x64xf32>
    %c0_92 = arith.constant 0 : index
    %c0_93 = arith.constant 0 : index
    %92 = vector.load %arg4[%c0_92, %c0_93] : memref<1x64xf32, #tpu.memory_space<vmem>>, vector<1x64xf32>
    %93 = vector.broadcast %92 : vector<1x64xf32> to vector<7x64xf32>
    %94 = arith.addf %91, %93 : vector<7x64xf32>
    %c0_94 = arith.constant 0 : index
    %c0_95 = arith.constant 0 : index
    %c7 = arith.constant 7 : index
    %c0_96 = arith.constant 0 : index
    %95 = vector.load %arg5[%c0_94, %c0_95, %c7, %c0_96] : memref<1x1x28x64xf32, #tpu.memory_space<vmem>>, vector<1x1x7x64xf32>
    %96 = vector.shape_cast %95 : vector<1x1x7x64xf32> to vector<7x64xf32>
    %97 = vector.shape_cast %94 : vector<7x64xf32> to vector<1x1x7x64xf32>
    tpu.vector_store %arg5[%c0_94, %c0_95, %c7, %c0_96], %97 {strides = array<i32>} : memref<1x1x28x64xf32, #tpu.memory_space<vmem>>, vector<1x1x7x64xf32>,
    %c0_97 = arith.constant 0 : index
    %c0_98 = arith.constant 0 : index
    %98 = vector.load %arg6[%c0_97, %c0_98] : memref<1x64xf32, #tpu.memory_space<vmem>>, vector<1x64xf32>
    %cst_99 = arith.constant dense<0.000000e+00> : vector<64xf32>
    %99 = vector.multi_reduction <add>, %94, %cst_99 [0] : vector<7x64xf32> to vector<64xf32>
    %100 = vector.shape_cast %99 : vector<64xf32> to vector<1x64xf32>
    %101 = arith.addf %98, %100 : vector<1x64xf32>
    %c0_100 = arith.constant 0 : index
    %c0_101 = arith.constant 0 : index
    %102 = vector.load %arg6[%c0_100, %c0_101] : memref<1x64xf32, #tpu.memory_space<vmem>>, vector<1x64xf32>
    tpu.vector_store %arg6[%c0_100, %c0_101], %101 {strides = array<i32>} : memref<1x64xf32, #tpu.memory_space<vmem>>, vector<1x64xf32>,
    %c0_102 = arith.constant 0 : index
    %c0_103 = arith.constant 0 : index
    %103 = vector.load %arg7[%c0_102, %c0_103] : memref<1x64xf32, #tpu.memory_space<vmem>>, vector<1x64xf32>
    %104 = arith.mulf %94, %94 : vector<7x64xf32>
    %cst_104 = arith.constant dense<0.000000e+00> : vector<64xf32>
    %105 = vector.multi_reduction <add>, %104, %cst_104 [0] : vector<7x64xf32> to vector<64xf32>
    %106 = vector.shape_cast %105 : vector<64xf32> to vector<1x64xf32>
    %107 = arith.addf %103, %106 : vector<1x64xf32>
    %c0_105 = arith.constant 0 : index
    %c0_106 = arith.constant 0 : index
    %108 = vector.load %arg7[%c0_105, %c0_106] : memref<1x64xf32, #tpu.memory_space<vmem>>, vector<1x64xf32>
    tpu.vector_store %arg7[%c0_105, %c0_106], %107 {strides = array<i32>} : memref<1x64xf32, #tpu.memory_space<vmem>>, vector<1x64xf32>,
    %c1_i32_107 = arith.constant 1 : i32
    %109 = arith.addi %arg1, %c1_i32_107 : i32
    %c0_i32_108 = arith.constant 0 : i32
    %110 = arith.addi %109, %c0_i32_108 : i32
    %c0_109 = arith.constant 0 : index
    %111 = arith.index_cast %110 : i32 to index
    %c0_110 = arith.constant 0 : index
    %c0_111 = arith.constant 0 : index
    %112 = vector.load %arg2[%c0_109, %111, %c0_110, %c0_111] : memref<1x9x9x128xbf16, #tpu.memory_space<vmem>>, vector<1x1x7x128xbf16>
    %113 = vector.shape_cast %112 : vector<1x1x7x128xbf16> to vector<7x128xbf16>
    %c2_112 = arith.constant 2 : index
    %c0_113 = arith.constant 0 : index
    %c0_114 = arith.constant 0 : index
    %c0_115 = arith.constant 0 : index
    %114 = vector.load %arg3[%c2_112, %c0_113, %c0_114, %c0_115] : memref<4x4x128x64xbf16, #tpu.memory_space<vmem>>, vector<1x1x128x64xbf16>
    %115 = vector.shape_cast %114 : vector<1x1x128x64xbf16> to vector<128x64xbf16>
    %cst_116 = arith.constant dense<0.000000e+00> : vector<7x64xf32>
    %116 = tpu.matmul %113, %115, %cst_116 {dimension_numbers = #tpu.dot_dimension_numbers<[1], [0], [0], [1], [0, 0, 1, 1], [], []>} : vector<7x128xbf16>, vector<128x64xbf16>, vector<7x64xf32> -> vector<7x64xf32>
    %c1_i32_117 = arith.constant 1 : i32
    %117 = arith.addi %arg1, %c1_i32_117 : i32
    %c0_i32_118 = arith.constant 0 : i32
    %118 = arith.addi %117, %c0_i32_118 : i32
    %c0_119 = arith.constant 0 : index
    %119 = arith.index_cast %118 : i32 to index
    %c1_120 = arith.constant 1 : index
    %c0_121 = arith.constant 0 : index
    %120 = vector.load %arg2[%c0_119, %119, %c1_120, %c0_121] : memref<1x9x9x128xbf16, #tpu.memory_space<vmem>>, vector<1x1x7x128xbf16>
    %121 = vector.shape_cast %120 : vector<1x1x7x128xbf16> to vector<7x128xbf16>
    %c2_122 = arith.constant 2 : index
    %c1_123 = arith.constant 1 : index
    %c0_124 = arith.constant 0 : index
    %c0_125 = arith.constant 0 : index
    %122 = vector.load %arg3[%c2_122, %c1_123, %c0_124, %c0_125] : memref<4x4x128x64xbf16, #tpu.memory_space<vmem>>, vector<1x1x128x64xbf16>
    %123 = vector.shape_cast %122 : vector<1x1x128x64xbf16> to vector<128x64xbf16>
    %cst_126 = arith.constant dense<0.000000e+00> : vector<7x64xf32>
    %124 = tpu.matmul %121, %123, %cst_126 {dimension_numbers = #tpu.dot_dimension_numbers<[1], [0], [0], [1], [0, 0, 1, 1], [], []>} : vector<7x128xbf16>, vector<128x64xbf16>, vector<7x64xf32> -> vector<7x64xf32>
    %125 = arith.addf %116, %124 : vector<7x64xf32>
    %c1_i32_127 = arith.constant 1 : i32
    %126 = arith.addi %arg1, %c1_i32_127 : i32
    %c1_i32_128 = arith.constant 1 : i32
    %127 = arith.addi %126, %c1_i32_128 : i32
    %c0_129 = arith.constant 0 : index
    %128 = arith.index_cast %127 : i32 to index
    %c0_130 = arith.constant 0 : index
    %c0_131 = arith.constant 0 : index
    %129 = vector.load %arg2[%c0_129, %128, %c0_130, %c0_131] : memref<1x9x9x128xbf16, #tpu.memory_space<vmem>>, vector<1x1x7x128xbf16>
    %130 = vector.shape_cast %129 : vector<1x1x7x128xbf16> to vector<7x128xbf16>
    %c2_132 = arith.constant 2 : index
    %c2_133 = arith.constant 2 : index
    %c0_134 = arith.constant 0 : index
    %c0_135 = arith.constant 0 : index
    %131 = vector.load %arg3[%c2_132, %c2_133, %c0_134, %c0_135] : memref<4x4x128x64xbf16, #tpu.memory_space<vmem>>, vector<1x1x128x64xbf16>
    %132 = vector.shape_cast %131 : vector<1x1x128x64xbf16> to vector<128x64xbf16>
    %cst_136 = arith.constant dense<0.000000e+00> : vector<7x64xf32>
    %133 = tpu.matmul %130, %132, %cst_136 {dimension_numbers = #tpu.dot_dimension_numbers<[1], [0], [0], [1], [0, 0, 1, 1], [], []>} : vector<7x128xbf16>, vector<128x64xbf16>, vector<7x64xf32> -> vector<7x64xf32>
    %134 = arith.addf %125, %133 : vector<7x64xf32>
    %c1_i32_137 = arith.constant 1 : i32
    %135 = arith.addi %arg1, %c1_i32_137 : i32
    %c1_i32_138 = arith.constant 1 : i32
    %136 = arith.addi %135, %c1_i32_138 : i32
    %c0_139 = arith.constant 0 : index
    %137 = arith.index_cast %136 : i32 to index
    %c1_140 = arith.constant 1 : index
    %c0_141 = arith.constant 0 : index
    %138 = vector.load %arg2[%c0_139, %137, %c1_140, %c0_141] : memref<1x9x9x128xbf16, #tpu.memory_space<vmem>>, vector<1x1x7x128xbf16>
    %139 = vector.shape_cast %138 : vector<1x1x7x128xbf16> to vector<7x128xbf16>
    %c2_142 = arith.constant 2 : index
    %c3_143 = arith.constant 3 : index
    %c0_144 = arith.constant 0 : index
    %c0_145 = arith.constant 0 : index
    %140 = vector.load %arg3[%c2_142, %c3_143, %c0_144, %c0_145] : memref<4x4x128x64xbf16, #tpu.memory_space<vmem>>, vector<1x1x128x64xbf16>
    %141 = vector.shape_cast %140 : vector<1x1x128x64xbf16> to vector<128x64xbf16>
    %cst_146 = arith.constant dense<0.000000e+00> : vector<7x64xf32>
    %142 = tpu.matmul %139, %141, %cst_146 {dimension_numbers = #tpu.dot_dimension_numbers<[1], [0], [0], [1], [0, 0, 1, 1], [], []>} : vector<7x128xbf16>, vector<128x64xbf16>, vector<7x64xf32> -> vector<7x64xf32>
    %143 = arith.addf %134, %142 : vector<7x64xf32>
    %c0_147 = arith.constant 0 : index
    %c0_148 = arith.constant 0 : index
    %144 = vector.load %arg4[%c0_147, %c0_148] : memref<1x64xf32, #tpu.memory_space<vmem>>, vector<1x64xf32>
    %145 = vector.broadcast %144 : vector<1x64xf32> to vector<7x64xf32>
    %146 = arith.addf %143, %145 : vector<7x64xf32>
    %c0_149 = arith.constant 0 : index
    %c0_150 = arith.constant 0 : index
    %c14 = arith.constant 14 : index
    %c0_151 = arith.constant 0 : index
    %147 = vector.load %arg5[%c0_149, %c0_150, %c14, %c0_151] : memref<1x1x28x64xf32, #tpu.memory_space<vmem>>, vector<1x1x7x64xf32>
    %148 = vector.shape_cast %147 : vector<1x1x7x64xf32> to vector<7x64xf32>
    %149 = vector.shape_cast %146 : vector<7x64xf32> to vector<1x1x7x64xf32>
    tpu.vector_store %arg5[%c0_149, %c0_150, %c14, %c0_151], %149 {strides = array<i32>} : memref<1x1x28x64xf32, #tpu.memory_space<vmem>>, vector<1x1x7x64xf32>,
    %c0_152 = arith.constant 0 : index
    %c0_153 = arith.constant 0 : index
    %150 = vector.load %arg6[%c0_152, %c0_153] : memref<1x64xf32, #tpu.memory_space<vmem>>, vector<1x64xf32>
    %cst_154 = arith.constant dense<0.000000e+00> : vector<64xf32>
    %151 = vector.multi_reduction <add>, %146, %cst_154 [0] : vector<7x64xf32> to vector<64xf32>
    %152 = vector.shape_cast %151 : vector<64xf32> to vector<1x64xf32>
    %153 = arith.addf %150, %152 : vector<1x64xf32>
    %c0_155 = arith.constant 0 : index
    %c0_156 = arith.constant 0 : index
    %154 = vector.load %arg6[%c0_155, %c0_156] : memref<1x64xf32, #tpu.memory_space<vmem>>, vector<1x64xf32>
    tpu.vector_store %arg6[%c0_155, %c0_156], %153 {strides = array<i32>} : memref<1x64xf32, #tpu.memory_space<vmem>>, vector<1x64xf32>,
    %c0_157 = arith.constant 0 : index
    %c0_158 = arith.constant 0 : index
    %155 = vector.load %arg7[%c0_157, %c0_158] : memref<1x64xf32, #tpu.memory_space<vmem>>, vector<1x64xf32>
    %156 = arith.mulf %146, %146 : vector<7x64xf32>
    %cst_159 = arith.constant dense<0.000000e+00> : vector<64xf32>
    %157 = vector.multi_reduction <add>, %156, %cst_159 [0] : vector<7x64xf32> to vector<64xf32>
    %158 = vector.shape_cast %157 : vector<64xf32> to vector<1x64xf32>
    %159 = arith.addf %155, %158 : vector<1x64xf32>
    %c0_160 = arith.constant 0 : index
    %c0_161 = arith.constant 0 : index
    %160 = vector.load %arg7[%c0_160, %c0_161] : memref<1x64xf32, #tpu.memory_space<vmem>>, vector<1x64xf32>
    tpu.vector_store %arg7[%c0_160, %c0_161], %159 {strides = array<i32>} : memref<1x64xf32, #tpu.memory_space<vmem>>, vector<1x64xf32>,
    %c1_i32_162 = arith.constant 1 : i32
    %161 = arith.addi %arg1, %c1_i32_162 : i32
    %c0_i32_163 = arith.constant 0 : i32
    %162 = arith.addi %161, %c0_i32_163 : i32
    %c0_164 = arith.constant 0 : index
    %163 = arith.index_cast %162 : i32 to index
    %c1_165 = arith.constant 1 : index
    %c0_166 = arith.constant 0 : index
    %164 = vector.load %arg2[%c0_164, %163, %c1_165, %c0_166] : memref<1x9x9x128xbf16, #tpu.memory_space<vmem>>, vector<1x1x7x128xbf16>
    %165 = vector.shape_cast %164 : vector<1x1x7x128xbf16> to vector<7x128xbf16>
    %c3_167 = arith.constant 3 : index
    %c0_168 = arith.constant 0 : index
    %c0_169 = arith.constant 0 : index
    %c0_170 = arith.constant 0 : index
    %166 = vector.load %arg3[%c3_167, %c0_168, %c0_169, %c0_170] : memref<4x4x128x64xbf16, #tpu.memory_space<vmem>>, vector<1x1x128x64xbf16>
    %167 = vector.shape_cast %166 : vector<1x1x128x64xbf16> to vector<128x64xbf16>
    %cst_171 = arith.constant dense<0.000000e+00> : vector<7x64xf32>
    %168 = tpu.matmul %165, %167, %cst_171 {dimension_numbers = #tpu.dot_dimension_numbers<[1], [0], [0], [1], [0, 0, 1, 1], [], []>} : vector<7x128xbf16>, vector<128x64xbf16>, vector<7x64xf32> -> vector<7x64xf32>
    %c1_i32_172 = arith.constant 1 : i32
    %169 = arith.addi %arg1, %c1_i32_172 : i32
    %c0_i32_173 = arith.constant 0 : i32
    %170 = arith.addi %169, %c0_i32_173 : i32
    %c0_174 = arith.constant 0 : index
    %171 = arith.index_cast %170 : i32 to index
    %c2_175 = arith.constant 2 : index
    %c0_176 = arith.constant 0 : index
    %172 = vector.load %arg2[%c0_174, %171, %c2_175, %c0_176] : memref<1x9x9x128xbf16, #tpu.memory_space<vmem>>, vector<1x1x7x128xbf16>
    %173 = vector.shape_cast %172 : vector<1x1x7x128xbf16> to vector<7x128xbf16>
    %c3_177 = arith.constant 3 : index
    %c1_178 = arith.constant 1 : index
    %c0_179 = arith.constant 0 : index
    %c0_180 = arith.constant 0 : index
    %174 = vector.load %arg3[%c3_177, %c1_178, %c0_179, %c0_180] : memref<4x4x128x64xbf16, #tpu.memory_space<vmem>>, vector<1x1x128x64xbf16>
    %175 = vector.shape_cast %174 : vector<1x1x128x64xbf16> to vector<128x64xbf16>
    %cst_181 = arith.constant dense<0.000000e+00> : vector<7x64xf32>
    %176 = tpu.matmul %173, %175, %cst_181 {dimension_numbers = #tpu.dot_dimension_numbers<[1], [0], [0], [1], [0, 0, 1, 1], [], []>} : vector<7x128xbf16>, vector<128x64xbf16>, vector<7x64xf32> -> vector<7x64xf32>
    %177 = arith.addf %168, %176 : vector<7x64xf32>
    %c1_i32_182 = arith.constant 1 : i32
    %178 = arith.addi %arg1, %c1_i32_182 : i32
    %c1_i32_183 = arith.constant 1 : i32
    %179 = arith.addi %178, %c1_i32_183 : i32
    %c0_184 = arith.constant 0 : index
    %180 = arith.index_cast %179 : i32 to index
    %c1_185 = arith.constant 1 : index
    %c0_186 = arith.constant 0 : index
    %181 = vector.load %arg2[%c0_184, %180, %c1_185, %c0_186] : memref<1x9x9x128xbf16, #tpu.memory_space<vmem>>, vector<1x1x7x128xbf16>
    %182 = vector.shape_cast %181 : vector<1x1x7x128xbf16> to vector<7x128xbf16>
    %c3_187 = arith.constant 3 : index
    %c2_188 = arith.constant 2 : index
    %c0_189 = arith.constant 0 : index
    %c0_190 = arith.constant 0 : index
    %183 = vector.load %arg3[%c3_187, %c2_188, %c0_189, %c0_190] : memref<4x4x128x64xbf16, #tpu.memory_space<vmem>>, vector<1x1x128x64xbf16>
    %184 = vector.shape_cast %183 : vector<1x1x128x64xbf16> to vector<128x64xbf16>
    %cst_191 = arith.constant dense<0.000000e+00> : vector<7x64xf32>
    %185 = tpu.matmul %182, %184, %cst_191 {dimension_numbers = #tpu.dot_dimension_numbers<[1], [0], [0], [1], [0, 0, 1, 1], [], []>} : vector<7x128xbf16>, vector<128x64xbf16>, vector<7x64xf32> -> vector<7x64xf32>
    %186 = arith.addf %177, %185 : vector<7x64xf32>
    %c1_i32_192 = arith.constant 1 : i32
    %187 = arith.addi %arg1, %c1_i32_192 : i32
    %c1_i32_193 = arith.constant 1 : i32
    %188 = arith.addi %187, %c1_i32_193 : i32
    %c0_194 = arith.constant 0 : index
    %189 = arith.index_cast %188 : i32 to index
    %c2_195 = arith.constant 2 : index
    %c0_196 = arith.constant 0 : index
    %190 = vector.load %arg2[%c0_194, %189, %c2_195, %c0_196] : memref<1x9x9x128xbf16, #tpu.memory_space<vmem>>, vector<1x1x7x128xbf16>
    %191 = vector.shape_cast %190 : vector<1x1x7x128xbf16> to vector<7x128xbf16>
    %c3_197 = arith.constant 3 : index
    %c3_198 = arith.constant 3 : index
    %c0_199 = arith.constant 0 : index
    %c0_200 = arith.constant 0 : index
    %192 = vector.load %arg3[%c3_197, %c3_198, %c0_199, %c0_200] : memref<4x4x128x64xbf16, #tpu.memory_space<vmem>>, vector<1x1x128x64xbf16>
    %193 = vector.shape_cast %192 : vector<1x1x128x64xbf16> to vector<128x64xbf16>
    %cst_201 = arith.constant dense<0.000000e+00> : vector<7x64xf32>
    %194 = tpu.matmul %191, %193, %cst_201 {dimension_numbers = #tpu.dot_dimension_numbers<[1], [0], [0], [1], [0, 0, 1, 1], [], []>} : vector<7x128xbf16>, vector<128x64xbf16>, vector<7x64xf32> -> vector<7x64xf32>
    %195 = arith.addf %186, %194 : vector<7x64xf32>
    %c0_202 = arith.constant 0 : index
    %c0_203 = arith.constant 0 : index
    %196 = vector.load %arg4[%c0_202, %c0_203] : memref<1x64xf32, #tpu.memory_space<vmem>>, vector<1x64xf32>
    %197 = vector.broadcast %196 : vector<1x64xf32> to vector<7x64xf32>
    %198 = arith.addf %195, %197 : vector<7x64xf32>
    %c0_204 = arith.constant 0 : index
    %c0_205 = arith.constant 0 : index
    %c21 = arith.constant 21 : index
    %c0_206 = arith.constant 0 : index
    %199 = vector.load %arg5[%c0_204, %c0_205, %c21, %c0_206] : memref<1x1x28x64xf32, #tpu.memory_space<vmem>>, vector<1x1x7x64xf32>
    %200 = vector.shape_cast %199 : vector<1x1x7x64xf32> to vector<7x64xf32>
    %201 = vector.shape_cast %198 : vector<7x64xf32> to vector<1x1x7x64xf32>
    tpu.vector_store %arg5[%c0_204, %c0_205, %c21, %c0_206], %201 {strides = array<i32>} : memref<1x1x28x64xf32, #tpu.memory_space<vmem>>, vector<1x1x7x64xf32>,
    %c0_207 = arith.constant 0 : index
    %c0_208 = arith.constant 0 : index
    %202 = vector.load %arg6[%c0_207, %c0_208] : memref<1x64xf32, #tpu.memory_space<vmem>>, vector<1x64xf32>
    %cst_209 = arith.constant dense<0.000000e+00> : vector<64xf32>
    %203 = vector.multi_reduction <add>, %198, %cst_209 [0] : vector<7x64xf32> to vector<64xf32>
    %204 = vector.shape_cast %203 : vector<64xf32> to vector<1x64xf32>
    %205 = arith.addf %202, %204 : vector<1x64xf32>
    %c0_210 = arith.constant 0 : index
    %c0_211 = arith.constant 0 : index
    %206 = vector.load %arg6[%c0_210, %c0_211] : memref<1x64xf32, #tpu.memory_space<vmem>>, vector<1x64xf32>
    tpu.vector_store %arg6[%c0_210, %c0_211], %205 {strides = array<i32>} : memref<1x64xf32, #tpu.memory_space<vmem>>, vector<1x64xf32>,
    %c0_212 = arith.constant 0 : index
    %c0_213 = arith.constant 0 : index
    %207 = vector.load %arg7[%c0_212, %c0_213] : memref<1x64xf32, #tpu.memory_space<vmem>>, vector<1x64xf32>
    %208 = arith.mulf %198, %198 : vector<7x64xf32>
    %cst_214 = arith.constant dense<0.000000e+00> : vector<64xf32>
    %209 = vector.multi_reduction <add>, %208, %cst_214 [0] : vector<7x64xf32> to vector<64xf32>
    %210 = vector.shape_cast %209 : vector<64xf32> to vector<1x64xf32>
    %211 = arith.addf %207, %210 : vector<1x64xf32>
    %c0_215 = arith.constant 0 : index
    %c0_216 = arith.constant 0 : index
    %212 = vector.load %arg7[%c0_215, %c0_216] : memref<1x64xf32, #tpu.memory_space<vmem>>, vector<1x64xf32>
    tpu.vector_store %arg7[%c0_215, %c0_216], %211 {strides = array<i32>} : memref<1x64xf32, #tpu.memory_space<vmem>>, vector<1x64xf32>,
    return
  }
  func.func @transform_0(%arg0: i32, %arg1: i32) -> (i32, i32, i32, i32) {
    %c0_i32 = arith.constant 0 : i32
    %c0_i32_0 = arith.constant 0 : i32
    %c0_i32_1 = arith.constant 0 : i32
    %c0_i32_2 = arith.constant 0 : i32
    return %arg0, %c0_i32, %c0_i32_0, %c0_i32_1 : i32, i32, i32, i32
  }
  func.func @transform_1(%arg0: i32, %arg1: i32) -> (i32, i32, i32, i32) {
    %c0_i32 = arith.constant 0 : i32
    %c0_i32_0 = arith.constant 0 : i32
    %c0_i32_1 = arith.constant 0 : i32
    %c0_i32_2 = arith.constant 0 : i32
    %c0_i32_3 = arith.constant 0 : i32
    return %c0_i32, %c0_i32_0, %c0_i32_1, %c0_i32_2 : i32, i32, i32, i32
  }
  func.func @transform_2(%arg0: i32, %arg1: i32) -> (i32, i32) {
    %c0_i32 = arith.constant 0 : i32
    %c0_i32_0 = arith.constant 0 : i32
    %c0_i32_1 = arith.constant 0 : i32
    return %c0_i32, %c0_i32_0 : i32, i32
  }
  func.func @transform_3(%arg0: i32, %arg1: i32) -> (i32, i32, i32, i32) {
    %c0_i32 = arith.constant 0 : i32
    %c0_i32_0 = arith.constant 0 : i32
    %c0_i32_1 = arith.constant 0 : i32
    return %arg0, %arg1, %c0_i32, %c0_i32_0 : i32, i32, i32, i32
  }
  func.func @transform_4(%arg0: i32, %arg1: i32) -> (i32, i32) {
    %c0_i32 = arith.constant 0 : i32
    %c0_i32_0 = arith.constant 0 : i32
    %c0_i32_1 = arith.constant 0 : i32
    return %c0_i32, %c0_i32_0 : i32, i32
  }
  func.func @transform_5(%arg0: i32, %arg1: i32) -> (i32, i32) {
    %c0_i32 = arith.constant 0 : i32
    %c0_i32_0 = arith.constant 0 : i32
    %c0_i32_1 = arith.constant 0 : i32
    return %c0_i32, %c0_i32_0 : i32, i32
  }
}

module attributes {stable_mosaic.version = 11 : i64} {
  func.func @_deconv2_sigmoid_kernel(%arg0: i32, %arg1: i32, %arg2: memref<1x16x16x64xbf16, #tpu.memory_space<vmem>>, %arg3: memref<4x4x64x128xbf16, #tpu.memory_space<vmem>>, %arg4: memref<1x128xf32, #tpu.memory_space<vmem>>, %arg5: memref<1x1x56x128xf32, #tpu.memory_space<vmem>>) attributes {dimension_semantics = [#tpu.dimension_semantics<parallel>, #tpu.dimension_semantics<parallel>], iteration_bounds = array<i64: 2, 14>, scalar_prefetch = 0 : i64, scratch_operands = 0 : i64, tpu.core_type = #tpu.core_type<tc>, window_params = [{transform_indices = @transform_0, window_bounds = array<i64: 1, 16, 16, 64>}, {pipeline_mode = #tpu.pipeline_mode<synchronous>, transform_indices = @transform_1, window_bounds = array<i64: 4, 4, 64, 128>}, {pipeline_mode = #tpu.pipeline_mode<synchronous>, transform_indices = @transform_2, window_bounds = array<i64: 1, 128>}, {transform_indices = @transform_3, window_bounds = array<i64: 1, 1, 56, 128>}]} {
    %c0_i32 = arith.constant 0 : i32
    %0 = arith.addi %arg1, %c0_i32 : i32
    %c0_i32_0 = arith.constant 0 : i32
    %1 = arith.addi %0, %c0_i32_0 : i32
    %c0 = arith.constant 0 : index
    %2 = arith.index_cast %1 : i32 to index
    %c0_1 = arith.constant 0 : index
    %c0_2 = arith.constant 0 : index
    %3 = vector.load %arg2[%c0, %2, %c0_1, %c0_2] : memref<1x16x16x64xbf16, #tpu.memory_space<vmem>>, vector<1x1x14x64xbf16>
    %4 = vector.shape_cast %3 : vector<1x1x14x64xbf16> to vector<14x64xbf16>
    %c0_3 = arith.constant 0 : index
    %c0_4 = arith.constant 0 : index
    %c0_5 = arith.constant 0 : index
    %c0_6 = arith.constant 0 : index
    %5 = vector.load %arg3[%c0_3, %c0_4, %c0_5, %c0_6] : memref<4x4x64x128xbf16, #tpu.memory_space<vmem>>, vector<1x1x64x128xbf16>
    %6 = vector.shape_cast %5 : vector<1x1x64x128xbf16> to vector<64x128xbf16>
    %cst = arith.constant dense<0.000000e+00> : vector<14x128xf32>
    %7 = tpu.matmul %4, %6, %cst {dimension_numbers = #tpu.dot_dimension_numbers<[1], [0], [0], [1], [0, 0, 1, 1], [], []>} : vector<14x64xbf16>, vector<64x128xbf16>, vector<14x128xf32> -> vector<14x128xf32>
    %c0_i32_7 = arith.constant 0 : i32
    %8 = arith.addi %arg1, %c0_i32_7 : i32
    %c0_i32_8 = arith.constant 0 : i32
    %9 = arith.addi %8, %c0_i32_8 : i32
    %c0_9 = arith.constant 0 : index
    %10 = arith.index_cast %9 : i32 to index
    %c1 = arith.constant 1 : index
    %c0_10 = arith.constant 0 : index
    %11 = vector.load %arg2[%c0_9, %10, %c1, %c0_10] : memref<1x16x16x64xbf16, #tpu.memory_space<vmem>>, vector<1x1x14x64xbf16>
    %12 = vector.shape_cast %11 : vector<1x1x14x64xbf16> to vector<14x64xbf16>
    %c0_11 = arith.constant 0 : index
    %c1_12 = arith.constant 1 : index
    %c0_13 = arith.constant 0 : index
    %c0_14 = arith.constant 0 : index
    %13 = vector.load %arg3[%c0_11, %c1_12, %c0_13, %c0_14] : memref<4x4x64x128xbf16, #tpu.memory_space<vmem>>, vector<1x1x64x128xbf16>
    %14 = vector.shape_cast %13 : vector<1x1x64x128xbf16> to vector<64x128xbf16>
    %cst_15 = arith.constant dense<0.000000e+00> : vector<14x128xf32>
    %15 = tpu.matmul %12, %14, %cst_15 {dimension_numbers = #tpu.dot_dimension_numbers<[1], [0], [0], [1], [0, 0, 1, 1], [], []>} : vector<14x64xbf16>, vector<64x128xbf16>, vector<14x128xf32> -> vector<14x128xf32>
    %16 = arith.addf %7, %15 : vector<14x128xf32>
    %c0_i32_16 = arith.constant 0 : i32
    %17 = arith.addi %arg1, %c0_i32_16 : i32
    %c1_i32 = arith.constant 1 : i32
    %18 = arith.addi %17, %c1_i32 : i32
    %c0_17 = arith.constant 0 : index
    %19 = arith.index_cast %18 : i32 to index
    %c0_18 = arith.constant 0 : index
    %c0_19 = arith.constant 0 : index
    %20 = vector.load %arg2[%c0_17, %19, %c0_18, %c0_19] : memref<1x16x16x64xbf16, #tpu.memory_space<vmem>>, vector<1x1x14x64xbf16>
    %21 = vector.shape_cast %20 : vector<1x1x14x64xbf16> to vector<14x64xbf16>
    %c0_20 = arith.constant 0 : index
    %c2 = arith.constant 2 : index
    %c0_21 = arith.constant 0 : index
    %c0_22 = arith.constant 0 : index
    %22 = vector.load %arg3[%c0_20, %c2, %c0_21, %c0_22] : memref<4x4x64x128xbf16, #tpu.memory_space<vmem>>, vector<1x1x64x128xbf16>
    %23 = vector.shape_cast %22 : vector<1x1x64x128xbf16> to vector<64x128xbf16>
    %cst_23 = arith.constant dense<0.000000e+00> : vector<14x128xf32>
    %24 = tpu.matmul %21, %23, %cst_23 {dimension_numbers = #tpu.dot_dimension_numbers<[1], [0], [0], [1], [0, 0, 1, 1], [], []>} : vector<14x64xbf16>, vector<64x128xbf16>, vector<14x128xf32> -> vector<14x128xf32>
    %25 = arith.addf %16, %24 : vector<14x128xf32>
    %c0_i32_24 = arith.constant 0 : i32
    %26 = arith.addi %arg1, %c0_i32_24 : i32
    %c1_i32_25 = arith.constant 1 : i32
    %27 = arith.addi %26, %c1_i32_25 : i32
    %c0_26 = arith.constant 0 : index
    %28 = arith.index_cast %27 : i32 to index
    %c1_27 = arith.constant 1 : index
    %c0_28 = arith.constant 0 : index
    %29 = vector.load %arg2[%c0_26, %28, %c1_27, %c0_28] : memref<1x16x16x64xbf16, #tpu.memory_space<vmem>>, vector<1x1x14x64xbf16>
    %30 = vector.shape_cast %29 : vector<1x1x14x64xbf16> to vector<14x64xbf16>
    %c0_29 = arith.constant 0 : index
    %c3 = arith.constant 3 : index
    %c0_30 = arith.constant 0 : index
    %c0_31 = arith.constant 0 : index
    %31 = vector.load %arg3[%c0_29, %c3, %c0_30, %c0_31] : memref<4x4x64x128xbf16, #tpu.memory_space<vmem>>, vector<1x1x64x128xbf16>
    %32 = vector.shape_cast %31 : vector<1x1x64x128xbf16> to vector<64x128xbf16>
    %cst_32 = arith.constant dense<0.000000e+00> : vector<14x128xf32>
    %33 = tpu.matmul %30, %32, %cst_32 {dimension_numbers = #tpu.dot_dimension_numbers<[1], [0], [0], [1], [0, 0, 1, 1], [], []>} : vector<14x64xbf16>, vector<64x128xbf16>, vector<14x128xf32> -> vector<14x128xf32>
    %34 = arith.addf %25, %33 : vector<14x128xf32>
    %c0_33 = arith.constant 0 : index
    %c0_34 = arith.constant 0 : index
    %35 = vector.load %arg4[%c0_33, %c0_34] : memref<1x128xf32, #tpu.memory_space<vmem>>, vector<1x128xf32>
    %36 = vector.broadcast %35 : vector<1x128xf32> to vector<14x128xf32>
    %37 = arith.addf %34, %36 : vector<14x128xf32>
    %cst_35 = arith.constant 5.000000e-01 : f32
    %38 = vector.broadcast %cst_35 : f32 to vector<14x128xf32>
    %39 = arith.mulf %38, %37 : vector<14x128xf32>
    %40 = math.tanh %39 : vector<14x128xf32>
    %cst_36 = arith.constant 1.000000e+00 : f32
    %41 = vector.broadcast %cst_36 : f32 to vector<14x128xf32>
    %42 = arith.addf %40, %41 : vector<14x128xf32>
    %cst_37 = arith.constant 5.000000e-01 : f32
    %43 = vector.broadcast %cst_37 : f32 to vector<14x128xf32>
    %44 = arith.mulf %43, %42 : vector<14x128xf32>
    %c0_38 = arith.constant 0 : index
    %c0_39 = arith.constant 0 : index
    %c0_40 = arith.constant 0 : index
    %c0_41 = arith.constant 0 : index
    %45 = vector.load %arg5[%c0_38, %c0_39, %c0_40, %c0_41] : memref<1x1x56x128xf32, #tpu.memory_space<vmem>>, vector<1x1x14x128xf32>
    %46 = vector.shape_cast %45 : vector<1x1x14x128xf32> to vector<14x128xf32>
    %47 = vector.shape_cast %44 : vector<14x128xf32> to vector<1x1x14x128xf32>
    tpu.vector_store %arg5[%c0_38, %c0_39, %c0_40, %c0_41], %47 {strides = array<i32>} : memref<1x1x56x128xf32, #tpu.memory_space<vmem>>, vector<1x1x14x128xf32>,
    %c0_i32_42 = arith.constant 0 : i32
    %48 = arith.addi %arg1, %c0_i32_42 : i32
    %c0_i32_43 = arith.constant 0 : i32
    %49 = arith.addi %48, %c0_i32_43 : i32
    %c0_44 = arith.constant 0 : index
    %50 = arith.index_cast %49 : i32 to index
    %c1_45 = arith.constant 1 : index
    %c0_46 = arith.constant 0 : index
    %51 = vector.load %arg2[%c0_44, %50, %c1_45, %c0_46] : memref<1x16x16x64xbf16, #tpu.memory_space<vmem>>, vector<1x1x14x64xbf16>
    %52 = vector.shape_cast %51 : vector<1x1x14x64xbf16> to vector<14x64xbf16>
    %c1_47 = arith.constant 1 : index
    %c0_48 = arith.constant 0 : index
    %c0_49 = arith.constant 0 : index
    %c0_50 = arith.constant 0 : index
    %53 = vector.load %arg3[%c1_47, %c0_48, %c0_49, %c0_50] : memref<4x4x64x128xbf16, #tpu.memory_space<vmem>>, vector<1x1x64x128xbf16>
    %54 = vector.shape_cast %53 : vector<1x1x64x128xbf16> to vector<64x128xbf16>
    %cst_51 = arith.constant dense<0.000000e+00> : vector<14x128xf32>
    %55 = tpu.matmul %52, %54, %cst_51 {dimension_numbers = #tpu.dot_dimension_numbers<[1], [0], [0], [1], [0, 0, 1, 1], [], []>} : vector<14x64xbf16>, vector<64x128xbf16>, vector<14x128xf32> -> vector<14x128xf32>
    %c0_i32_52 = arith.constant 0 : i32
    %56 = arith.addi %arg1, %c0_i32_52 : i32
    %c0_i32_53 = arith.constant 0 : i32
    %57 = arith.addi %56, %c0_i32_53 : i32
    %c0_54 = arith.constant 0 : index
    %58 = arith.index_cast %57 : i32 to index
    %c2_55 = arith.constant 2 : index
    %c0_56 = arith.constant 0 : index
    %59 = vector.load %arg2[%c0_54, %58, %c2_55, %c0_56] : memref<1x16x16x64xbf16, #tpu.memory_space<vmem>>, vector<1x1x14x64xbf16>
    %60 = vector.shape_cast %59 : vector<1x1x14x64xbf16> to vector<14x64xbf16>
    %c1_57 = arith.constant 1 : index
    %c1_58 = arith.constant 1 : index
    %c0_59 = arith.constant 0 : index
    %c0_60 = arith.constant 0 : index
    %61 = vector.load %arg3[%c1_57, %c1_58, %c0_59, %c0_60] : memref<4x4x64x128xbf16, #tpu.memory_space<vmem>>, vector<1x1x64x128xbf16>
    %62 = vector.shape_cast %61 : vector<1x1x64x128xbf16> to vector<64x128xbf16>
    %cst_61 = arith.constant dense<0.000000e+00> : vector<14x128xf32>
    %63 = tpu.matmul %60, %62, %cst_61 {dimension_numbers = #tpu.dot_dimension_numbers<[1], [0], [0], [1], [0, 0, 1, 1], [], []>} : vector<14x64xbf16>, vector<64x128xbf16>, vector<14x128xf32> -> vector<14x128xf32>
    %64 = arith.addf %55, %63 : vector<14x128xf32>
    %c0_i32_62 = arith.constant 0 : i32
    %65 = arith.addi %arg1, %c0_i32_62 : i32
    %c1_i32_63 = arith.constant 1 : i32
    %66 = arith.addi %65, %c1_i32_63 : i32
    %c0_64 = arith.constant 0 : index
    %67 = arith.index_cast %66 : i32 to index
    %c1_65 = arith.constant 1 : index
    %c0_66 = arith.constant 0 : index
    %68 = vector.load %arg2[%c0_64, %67, %c1_65, %c0_66] : memref<1x16x16x64xbf16, #tpu.memory_space<vmem>>, vector<1x1x14x64xbf16>
    %69 = vector.shape_cast %68 : vector<1x1x14x64xbf16> to vector<14x64xbf16>
    %c1_67 = arith.constant 1 : index
    %c2_68 = arith.constant 2 : index
    %c0_69 = arith.constant 0 : index
    %c0_70 = arith.constant 0 : index
    %70 = vector.load %arg3[%c1_67, %c2_68, %c0_69, %c0_70] : memref<4x4x64x128xbf16, #tpu.memory_space<vmem>>, vector<1x1x64x128xbf16>
    %71 = vector.shape_cast %70 : vector<1x1x64x128xbf16> to vector<64x128xbf16>
    %cst_71 = arith.constant dense<0.000000e+00> : vector<14x128xf32>
    %72 = tpu.matmul %69, %71, %cst_71 {dimension_numbers = #tpu.dot_dimension_numbers<[1], [0], [0], [1], [0, 0, 1, 1], [], []>} : vector<14x64xbf16>, vector<64x128xbf16>, vector<14x128xf32> -> vector<14x128xf32>
    %73 = arith.addf %64, %72 : vector<14x128xf32>
    %c0_i32_72 = arith.constant 0 : i32
    %74 = arith.addi %arg1, %c0_i32_72 : i32
    %c1_i32_73 = arith.constant 1 : i32
    %75 = arith.addi %74, %c1_i32_73 : i32
    %c0_74 = arith.constant 0 : index
    %76 = arith.index_cast %75 : i32 to index
    %c2_75 = arith.constant 2 : index
    %c0_76 = arith.constant 0 : index
    %77 = vector.load %arg2[%c0_74, %76, %c2_75, %c0_76] : memref<1x16x16x64xbf16, #tpu.memory_space<vmem>>, vector<1x1x14x64xbf16>
    %78 = vector.shape_cast %77 : vector<1x1x14x64xbf16> to vector<14x64xbf16>
    %c1_77 = arith.constant 1 : index
    %c3_78 = arith.constant 3 : index
    %c0_79 = arith.constant 0 : index
    %c0_80 = arith.constant 0 : index
    %79 = vector.load %arg3[%c1_77, %c3_78, %c0_79, %c0_80] : memref<4x4x64x128xbf16, #tpu.memory_space<vmem>>, vector<1x1x64x128xbf16>
    %80 = vector.shape_cast %79 : vector<1x1x64x128xbf16> to vector<64x128xbf16>
    %cst_81 = arith.constant dense<0.000000e+00> : vector<14x128xf32>
    %81 = tpu.matmul %78, %80, %cst_81 {dimension_numbers = #tpu.dot_dimension_numbers<[1], [0], [0], [1], [0, 0, 1, 1], [], []>} : vector<14x64xbf16>, vector<64x128xbf16>, vector<14x128xf32> -> vector<14x128xf32>
    %82 = arith.addf %73, %81 : vector<14x128xf32>
    %c0_82 = arith.constant 0 : index
    %c0_83 = arith.constant 0 : index
    %83 = vector.load %arg4[%c0_82, %c0_83] : memref<1x128xf32, #tpu.memory_space<vmem>>, vector<1x128xf32>
    %84 = vector.broadcast %83 : vector<1x128xf32> to vector<14x128xf32>
    %85 = arith.addf %82, %84 : vector<14x128xf32>
    %cst_84 = arith.constant 5.000000e-01 : f32
    %86 = vector.broadcast %cst_84 : f32 to vector<14x128xf32>
    %87 = arith.mulf %86, %85 : vector<14x128xf32>
    %88 = math.tanh %87 : vector<14x128xf32>
    %cst_85 = arith.constant 1.000000e+00 : f32
    %89 = vector.broadcast %cst_85 : f32 to vector<14x128xf32>
    %90 = arith.addf %88, %89 : vector<14x128xf32>
    %cst_86 = arith.constant 5.000000e-01 : f32
    %91 = vector.broadcast %cst_86 : f32 to vector<14x128xf32>
    %92 = arith.mulf %91, %90 : vector<14x128xf32>
    %c0_87 = arith.constant 0 : index
    %c0_88 = arith.constant 0 : index
    %c14 = arith.constant 14 : index
    %c0_89 = arith.constant 0 : index
    %93 = vector.load %arg5[%c0_87, %c0_88, %c14, %c0_89] : memref<1x1x56x128xf32, #tpu.memory_space<vmem>>, vector<1x1x14x128xf32>
    %94 = vector.shape_cast %93 : vector<1x1x14x128xf32> to vector<14x128xf32>
    %95 = vector.shape_cast %92 : vector<14x128xf32> to vector<1x1x14x128xf32>
    tpu.vector_store %arg5[%c0_87, %c0_88, %c14, %c0_89], %95 {strides = array<i32>} : memref<1x1x56x128xf32, #tpu.memory_space<vmem>>, vector<1x1x14x128xf32>,
    %c1_i32_90 = arith.constant 1 : i32
    %96 = arith.addi %arg1, %c1_i32_90 : i32
    %c0_i32_91 = arith.constant 0 : i32
    %97 = arith.addi %96, %c0_i32_91 : i32
    %c0_92 = arith.constant 0 : index
    %98 = arith.index_cast %97 : i32 to index
    %c0_93 = arith.constant 0 : index
    %c0_94 = arith.constant 0 : index
    %99 = vector.load %arg2[%c0_92, %98, %c0_93, %c0_94] : memref<1x16x16x64xbf16, #tpu.memory_space<vmem>>, vector<1x1x14x64xbf16>
    %100 = vector.shape_cast %99 : vector<1x1x14x64xbf16> to vector<14x64xbf16>
    %c2_95 = arith.constant 2 : index
    %c0_96 = arith.constant 0 : index
    %c0_97 = arith.constant 0 : index
    %c0_98 = arith.constant 0 : index
    %101 = vector.load %arg3[%c2_95, %c0_96, %c0_97, %c0_98] : memref<4x4x64x128xbf16, #tpu.memory_space<vmem>>, vector<1x1x64x128xbf16>
    %102 = vector.shape_cast %101 : vector<1x1x64x128xbf16> to vector<64x128xbf16>
    %cst_99 = arith.constant dense<0.000000e+00> : vector<14x128xf32>
    %103 = tpu.matmul %100, %102, %cst_99 {dimension_numbers = #tpu.dot_dimension_numbers<[1], [0], [0], [1], [0, 0, 1, 1], [], []>} : vector<14x64xbf16>, vector<64x128xbf16>, vector<14x128xf32> -> vector<14x128xf32>
    %c1_i32_100 = arith.constant 1 : i32
    %104 = arith.addi %arg1, %c1_i32_100 : i32
    %c0_i32_101 = arith.constant 0 : i32
    %105 = arith.addi %104, %c0_i32_101 : i32
    %c0_102 = arith.constant 0 : index
    %106 = arith.index_cast %105 : i32 to index
    %c1_103 = arith.constant 1 : index
    %c0_104 = arith.constant 0 : index
    %107 = vector.load %arg2[%c0_102, %106, %c1_103, %c0_104] : memref<1x16x16x64xbf16, #tpu.memory_space<vmem>>, vector<1x1x14x64xbf16>
    %108 = vector.shape_cast %107 : vector<1x1x14x64xbf16> to vector<14x64xbf16>
    %c2_105 = arith.constant 2 : index
    %c1_106 = arith.constant 1 : index
    %c0_107 = arith.constant 0 : index
    %c0_108 = arith.constant 0 : index
    %109 = vector.load %arg3[%c2_105, %c1_106, %c0_107, %c0_108] : memref<4x4x64x128xbf16, #tpu.memory_space<vmem>>, vector<1x1x64x128xbf16>
    %110 = vector.shape_cast %109 : vector<1x1x64x128xbf16> to vector<64x128xbf16>
    %cst_109 = arith.constant dense<0.000000e+00> : vector<14x128xf32>
    %111 = tpu.matmul %108, %110, %cst_109 {dimension_numbers = #tpu.dot_dimension_numbers<[1], [0], [0], [1], [0, 0, 1, 1], [], []>} : vector<14x64xbf16>, vector<64x128xbf16>, vector<14x128xf32> -> vector<14x128xf32>
    %112 = arith.addf %103, %111 : vector<14x128xf32>
    %c1_i32_110 = arith.constant 1 : i32
    %113 = arith.addi %arg1, %c1_i32_110 : i32
    %c1_i32_111 = arith.constant 1 : i32
    %114 = arith.addi %113, %c1_i32_111 : i32
    %c0_112 = arith.constant 0 : index
    %115 = arith.index_cast %114 : i32 to index
    %c0_113 = arith.constant 0 : index
    %c0_114 = arith.constant 0 : index
    %116 = vector.load %arg2[%c0_112, %115, %c0_113, %c0_114] : memref<1x16x16x64xbf16, #tpu.memory_space<vmem>>, vector<1x1x14x64xbf16>
    %117 = vector.shape_cast %116 : vector<1x1x14x64xbf16> to vector<14x64xbf16>
    %c2_115 = arith.constant 2 : index
    %c2_116 = arith.constant 2 : index
    %c0_117 = arith.constant 0 : index
    %c0_118 = arith.constant 0 : index
    %118 = vector.load %arg3[%c2_115, %c2_116, %c0_117, %c0_118] : memref<4x4x64x128xbf16, #tpu.memory_space<vmem>>, vector<1x1x64x128xbf16>
    %119 = vector.shape_cast %118 : vector<1x1x64x128xbf16> to vector<64x128xbf16>
    %cst_119 = arith.constant dense<0.000000e+00> : vector<14x128xf32>
    %120 = tpu.matmul %117, %119, %cst_119 {dimension_numbers = #tpu.dot_dimension_numbers<[1], [0], [0], [1], [0, 0, 1, 1], [], []>} : vector<14x64xbf16>, vector<64x128xbf16>, vector<14x128xf32> -> vector<14x128xf32>
    %121 = arith.addf %112, %120 : vector<14x128xf32>
    %c1_i32_120 = arith.constant 1 : i32
    %122 = arith.addi %arg1, %c1_i32_120 : i32
    %c1_i32_121 = arith.constant 1 : i32
    %123 = arith.addi %122, %c1_i32_121 : i32
    %c0_122 = arith.constant 0 : index
    %124 = arith.index_cast %123 : i32 to index
    %c1_123 = arith.constant 1 : index
    %c0_124 = arith.constant 0 : index
    %125 = vector.load %arg2[%c0_122, %124, %c1_123, %c0_124] : memref<1x16x16x64xbf16, #tpu.memory_space<vmem>>, vector<1x1x14x64xbf16>
    %126 = vector.shape_cast %125 : vector<1x1x14x64xbf16> to vector<14x64xbf16>
    %c2_125 = arith.constant 2 : index
    %c3_126 = arith.constant 3 : index
    %c0_127 = arith.constant 0 : index
    %c0_128 = arith.constant 0 : index
    %127 = vector.load %arg3[%c2_125, %c3_126, %c0_127, %c0_128] : memref<4x4x64x128xbf16, #tpu.memory_space<vmem>>, vector<1x1x64x128xbf16>
    %128 = vector.shape_cast %127 : vector<1x1x64x128xbf16> to vector<64x128xbf16>
    %cst_129 = arith.constant dense<0.000000e+00> : vector<14x128xf32>
    %129 = tpu.matmul %126, %128, %cst_129 {dimension_numbers = #tpu.dot_dimension_numbers<[1], [0], [0], [1], [0, 0, 1, 1], [], []>} : vector<14x64xbf16>, vector<64x128xbf16>, vector<14x128xf32> -> vector<14x128xf32>
    %130 = arith.addf %121, %129 : vector<14x128xf32>
    %c0_130 = arith.constant 0 : index
    %c0_131 = arith.constant 0 : index
    %131 = vector.load %arg4[%c0_130, %c0_131] : memref<1x128xf32, #tpu.memory_space<vmem>>, vector<1x128xf32>
    %132 = vector.broadcast %131 : vector<1x128xf32> to vector<14x128xf32>
    %133 = arith.addf %130, %132 : vector<14x128xf32>
    %cst_132 = arith.constant 5.000000e-01 : f32
    %134 = vector.broadcast %cst_132 : f32 to vector<14x128xf32>
    %135 = arith.mulf %134, %133 : vector<14x128xf32>
    %136 = math.tanh %135 : vector<14x128xf32>
    %cst_133 = arith.constant 1.000000e+00 : f32
    %137 = vector.broadcast %cst_133 : f32 to vector<14x128xf32>
    %138 = arith.addf %136, %137 : vector<14x128xf32>
    %cst_134 = arith.constant 5.000000e-01 : f32
    %139 = vector.broadcast %cst_134 : f32 to vector<14x128xf32>
    %140 = arith.mulf %139, %138 : vector<14x128xf32>
    %c0_135 = arith.constant 0 : index
    %c0_136 = arith.constant 0 : index
    %c28 = arith.constant 28 : index
    %c0_137 = arith.constant 0 : index
    %141 = vector.load %arg5[%c0_135, %c0_136, %c28, %c0_137] : memref<1x1x56x128xf32, #tpu.memory_space<vmem>>, vector<1x1x14x128xf32>
    %142 = vector.shape_cast %141 : vector<1x1x14x128xf32> to vector<14x128xf32>
    %143 = vector.shape_cast %140 : vector<14x128xf32> to vector<1x1x14x128xf32>
    tpu.vector_store %arg5[%c0_135, %c0_136, %c28, %c0_137], %143 {strides = array<i32>} : memref<1x1x56x128xf32, #tpu.memory_space<vmem>>, vector<1x1x14x128xf32>,
    %c1_i32_138 = arith.constant 1 : i32
    %144 = arith.addi %arg1, %c1_i32_138 : i32
    %c0_i32_139 = arith.constant 0 : i32
    %145 = arith.addi %144, %c0_i32_139 : i32
    %c0_140 = arith.constant 0 : index
    %146 = arith.index_cast %145 : i32 to index
    %c1_141 = arith.constant 1 : index
    %c0_142 = arith.constant 0 : index
    %147 = vector.load %arg2[%c0_140, %146, %c1_141, %c0_142] : memref<1x16x16x64xbf16, #tpu.memory_space<vmem>>, vector<1x1x14x64xbf16>
    %148 = vector.shape_cast %147 : vector<1x1x14x64xbf16> to vector<14x64xbf16>
    %c3_143 = arith.constant 3 : index
    %c0_144 = arith.constant 0 : index
    %c0_145 = arith.constant 0 : index
    %c0_146 = arith.constant 0 : index
    %149 = vector.load %arg3[%c3_143, %c0_144, %c0_145, %c0_146] : memref<4x4x64x128xbf16, #tpu.memory_space<vmem>>, vector<1x1x64x128xbf16>
    %150 = vector.shape_cast %149 : vector<1x1x64x128xbf16> to vector<64x128xbf16>
    %cst_147 = arith.constant dense<0.000000e+00> : vector<14x128xf32>
    %151 = tpu.matmul %148, %150, %cst_147 {dimension_numbers = #tpu.dot_dimension_numbers<[1], [0], [0], [1], [0, 0, 1, 1], [], []>} : vector<14x64xbf16>, vector<64x128xbf16>, vector<14x128xf32> -> vector<14x128xf32>
    %c1_i32_148 = arith.constant 1 : i32
    %152 = arith.addi %arg1, %c1_i32_148 : i32
    %c0_i32_149 = arith.constant 0 : i32
    %153 = arith.addi %152, %c0_i32_149 : i32
    %c0_150 = arith.constant 0 : index
    %154 = arith.index_cast %153 : i32 to index
    %c2_151 = arith.constant 2 : index
    %c0_152 = arith.constant 0 : index
    %155 = vector.load %arg2[%c0_150, %154, %c2_151, %c0_152] : memref<1x16x16x64xbf16, #tpu.memory_space<vmem>>, vector<1x1x14x64xbf16>
    %156 = vector.shape_cast %155 : vector<1x1x14x64xbf16> to vector<14x64xbf16>
    %c3_153 = arith.constant 3 : index
    %c1_154 = arith.constant 1 : index
    %c0_155 = arith.constant 0 : index
    %c0_156 = arith.constant 0 : index
    %157 = vector.load %arg3[%c3_153, %c1_154, %c0_155, %c0_156] : memref<4x4x64x128xbf16, #tpu.memory_space<vmem>>, vector<1x1x64x128xbf16>
    %158 = vector.shape_cast %157 : vector<1x1x64x128xbf16> to vector<64x128xbf16>
    %cst_157 = arith.constant dense<0.000000e+00> : vector<14x128xf32>
    %159 = tpu.matmul %156, %158, %cst_157 {dimension_numbers = #tpu.dot_dimension_numbers<[1], [0], [0], [1], [0, 0, 1, 1], [], []>} : vector<14x64xbf16>, vector<64x128xbf16>, vector<14x128xf32> -> vector<14x128xf32>
    %160 = arith.addf %151, %159 : vector<14x128xf32>
    %c1_i32_158 = arith.constant 1 : i32
    %161 = arith.addi %arg1, %c1_i32_158 : i32
    %c1_i32_159 = arith.constant 1 : i32
    %162 = arith.addi %161, %c1_i32_159 : i32
    %c0_160 = arith.constant 0 : index
    %163 = arith.index_cast %162 : i32 to index
    %c1_161 = arith.constant 1 : index
    %c0_162 = arith.constant 0 : index
    %164 = vector.load %arg2[%c0_160, %163, %c1_161, %c0_162] : memref<1x16x16x64xbf16, #tpu.memory_space<vmem>>, vector<1x1x14x64xbf16>
    %165 = vector.shape_cast %164 : vector<1x1x14x64xbf16> to vector<14x64xbf16>
    %c3_163 = arith.constant 3 : index
    %c2_164 = arith.constant 2 : index
    %c0_165 = arith.constant 0 : index
    %c0_166 = arith.constant 0 : index
    %166 = vector.load %arg3[%c3_163, %c2_164, %c0_165, %c0_166] : memref<4x4x64x128xbf16, #tpu.memory_space<vmem>>, vector<1x1x64x128xbf16>
    %167 = vector.shape_cast %166 : vector<1x1x64x128xbf16> to vector<64x128xbf16>
    %cst_167 = arith.constant dense<0.000000e+00> : vector<14x128xf32>
    %168 = tpu.matmul %165, %167, %cst_167 {dimension_numbers = #tpu.dot_dimension_numbers<[1], [0], [0], [1], [0, 0, 1, 1], [], []>} : vector<14x64xbf16>, vector<64x128xbf16>, vector<14x128xf32> -> vector<14x128xf32>
    %169 = arith.addf %160, %168 : vector<14x128xf32>
    %c1_i32_168 = arith.constant 1 : i32
    %170 = arith.addi %arg1, %c1_i32_168 : i32
    %c1_i32_169 = arith.constant 1 : i32
    %171 = arith.addi %170, %c1_i32_169 : i32
    %c0_170 = arith.constant 0 : index
    %172 = arith.index_cast %171 : i32 to index
    %c2_171 = arith.constant 2 : index
    %c0_172 = arith.constant 0 : index
    %173 = vector.load %arg2[%c0_170, %172, %c2_171, %c0_172] : memref<1x16x16x64xbf16, #tpu.memory_space<vmem>>, vector<1x1x14x64xbf16>
    %174 = vector.shape_cast %173 : vector<1x1x14x64xbf16> to vector<14x64xbf16>
    %c3_173 = arith.constant 3 : index
    %c3_174 = arith.constant 3 : index
    %c0_175 = arith.constant 0 : index
    %c0_176 = arith.constant 0 : index
    %175 = vector.load %arg3[%c3_173, %c3_174, %c0_175, %c0_176] : memref<4x4x64x128xbf16, #tpu.memory_space<vmem>>, vector<1x1x64x128xbf16>
    %176 = vector.shape_cast %175 : vector<1x1x64x128xbf16> to vector<64x128xbf16>
    %cst_177 = arith.constant dense<0.000000e+00> : vector<14x128xf32>
    %177 = tpu.matmul %174, %176, %cst_177 {dimension_numbers = #tpu.dot_dimension_numbers<[1], [0], [0], [1], [0, 0, 1, 1], [], []>} : vector<14x64xbf16>, vector<64x128xbf16>, vector<14x128xf32> -> vector<14x128xf32>
    %178 = arith.addf %169, %177 : vector<14x128xf32>
    %c0_178 = arith.constant 0 : index
    %c0_179 = arith.constant 0 : index
    %179 = vector.load %arg4[%c0_178, %c0_179] : memref<1x128xf32, #tpu.memory_space<vmem>>, vector<1x128xf32>
    %180 = vector.broadcast %179 : vector<1x128xf32> to vector<14x128xf32>
    %181 = arith.addf %178, %180 : vector<14x128xf32>
    %cst_180 = arith.constant 5.000000e-01 : f32
    %182 = vector.broadcast %cst_180 : f32 to vector<14x128xf32>
    %183 = arith.mulf %182, %181 : vector<14x128xf32>
    %184 = math.tanh %183 : vector<14x128xf32>
    %cst_181 = arith.constant 1.000000e+00 : f32
    %185 = vector.broadcast %cst_181 : f32 to vector<14x128xf32>
    %186 = arith.addf %184, %185 : vector<14x128xf32>
    %cst_182 = arith.constant 5.000000e-01 : f32
    %187 = vector.broadcast %cst_182 : f32 to vector<14x128xf32>
    %188 = arith.mulf %187, %186 : vector<14x128xf32>
    %c0_183 = arith.constant 0 : index
    %c0_184 = arith.constant 0 : index
    %c42 = arith.constant 42 : index
    %c0_185 = arith.constant 0 : index
    %189 = vector.load %arg5[%c0_183, %c0_184, %c42, %c0_185] : memref<1x1x56x128xf32, #tpu.memory_space<vmem>>, vector<1x1x14x128xf32>
    %190 = vector.shape_cast %189 : vector<1x1x14x128xf32> to vector<14x128xf32>
    %191 = vector.shape_cast %188 : vector<14x128xf32> to vector<1x1x14x128xf32>
    tpu.vector_store %arg5[%c0_183, %c0_184, %c42, %c0_185], %191 {strides = array<i32>} : memref<1x1x56x128xf32, #tpu.memory_space<vmem>>, vector<1x1x14x128xf32>,
    return
  }
  func.func @transform_0(%arg0: i32, %arg1: i32) -> (i32, i32, i32, i32) {
    %c0_i32 = arith.constant 0 : i32
    %c0_i32_0 = arith.constant 0 : i32
    %c0_i32_1 = arith.constant 0 : i32
    %c0_i32_2 = arith.constant 0 : i32
    return %arg0, %c0_i32, %c0_i32_0, %c0_i32_1 : i32, i32, i32, i32
  }
  func.func @transform_1(%arg0: i32, %arg1: i32) -> (i32, i32, i32, i32) {
    %c0_i32 = arith.constant 0 : i32
    %c0_i32_0 = arith.constant 0 : i32
    %c0_i32_1 = arith.constant 0 : i32
    %c0_i32_2 = arith.constant 0 : i32
    %c0_i32_3 = arith.constant 0 : i32
    return %c0_i32, %c0_i32_0, %c0_i32_1, %c0_i32_2 : i32, i32, i32, i32
  }
  func.func @transform_2(%arg0: i32, %arg1: i32) -> (i32, i32) {
    %c0_i32 = arith.constant 0 : i32
    %c0_i32_0 = arith.constant 0 : i32
    %c0_i32_1 = arith.constant 0 : i32
    return %c0_i32, %c0_i32_0 : i32, i32
  }
  func.func @transform_3(%arg0: i32, %arg1: i32) -> (i32, i32, i32, i32) {
    %c0_i32 = arith.constant 0 : i32
    %c0_i32_0 = arith.constant 0 : i32
    %c0_i32_1 = arith.constant 0 : i32
    return %arg0, %arg1, %c0_i32, %c0_i32_0 : i32, i32, i32, i32
  }
}

</mosaic_0001>

<bundles_post_ra>
// kernel: decoder_forward.4
= control target key start
LH: loop header
LB: loop body
LE: loop exit
PB: predicated region body
PF: predicated region fallthrough
CT: control target
= control target key end

     0   :  { %8 = vsyncpa [#allocation3], 0  ;;  %s1264_s0 = inlined_call_operand.hbm [shape: f32[2,32], index: 0, kind: input, shape index: {}]   ;;  %s1265_s1 = inlined_call_operand.hbm [shape: f32[32,6272], index: 1, kind: input, shape index: {}]   ;;  %s1266_s2 = inlined_call_operand.hbm [shape: f32[1,6272], index: 2, kind: input, shape index: {}]   ;;  %s1267_s3 = inlined_call_operand.vmem [shape: bf16[2,6272], index: 3, kind: output, shape index: {}]  }
   0x1   :  { %9 = vsyncpa [#allocation5], 0 }
   0x2   :  { %11 = vsyncpa [#allocation5 + $0x1], 0  ;;  %s1040_s12 = smov 0   ;;  %s1042_s13 = smov 0  }
   0x3   :  { %s1044_s14 = smov 0   ;;  %s1046_s15 = smov 0  }
   0x4 LB: > { %s1061_s16 = sadd.s32 1, %s1008_s15   ;;  %s45_s17 = sadd.s32 1, %s1004_s14  ;;  %s1008_s15 = sphi %s1046_s15, %s1288_s15   ;;  %s1004_s14 = sphi %s1044_s14, %s1287_s14   ;;  %s1000_s13 = sphi %s1042_s13, %s1286_s13   ;;  %s996_s12 = sphi %s1040_s12, %s1285_s12  }
   0x5   : > { %s42_s18 = ssub.s32 %s1008_s15, %s1061_s16  ;;  %p52_p0 = scmp.ne.s32.totalorder %s1004_s14, %s1000_s13 }
   0x6   : > { %p43_p1 = scmp.eq.s32.totalorder %s42_s18, 0  ;;  %p53_p2 = scmp.eq.s32.totalorder %s1008_s15, 0 }
   0x7   : > { %p840_p3 = scmp.lt.s32.totalorder %s1008_s15, 7  ;;  %s145_s20 = sand.u32 1, %s1008_s15  }
   0x8   : > { %s1071_s19 = scalar_select %p43_p1, %s1004_s14, %s45_s17  }
   0x9   : > { %p54_p4 = por %p53_p2, %p52_p0  ;;  %s147_s21 = sand.u32 1, %s1004_s14  }
   0xa   : > { %s816_s22 = smul.u32 224, %s147_s21  ;;  %s1089_s30 = scalar_lea.sflag [#allocation5], %s145_s20 }
   0xb   : > { %p1077_p5 = pnand %p840_p3, %p54_p4  ;;  %s768_s24 = smul.u32 896, %s1008_s15 }
   0xc   : > { %s149_s28 = scalar_lea.vmem [#allocation4], %s816_s22  ;;  %s887_s7 = scalar_lea.hbm %s1265_s1, 25088 }
   0xd   : > { %s1274_s23 = scalar_select %p1077_p5, 1, 0 }
   0xe   : > { %s1085_s27 = scalar_lea.hbm %s1265_s1, %s768_s24  ;;  %s156_s29 = sshll.u32 %s149_s28, 4  ;;  %s1087_s29 = int_to_ptr.vmem [resolvable:$true] %s156_s29 }
   0xf   : > { %s882_s4 = scalar_lea.hbm %s1085_s27, 3584  ;;  %p1269_p7 = pneg %p1077_p5 }
  0x10   : > { %p883_p6 = scmp.ne.s32.totalorder %s1085_s27, %s882_s4  ;;  %p888_p10 = scmp.lt.u32.totalorder %s1085_s27, %s1265_s1 }
  0x11   : > { %p889_p11 = scmp.lt.u32.totalorder %s887_s7, %s882_s4  ;;  %p891_p13 = scmp.lt.u32.totalorder %s882_s4, %s1085_s27 }
  0x12   : > { %p885_p8 = pnand %p1269_p7, %p883_p6 }
  0x13   : > { %p890_p12 = por %p889_p11, %p888_p10 }
  0x14   : > { %p886_p9 = pneg %p885_p8 }
  0x15   : > { %p892_p0 = por %p891_p13, %p890_p12 }
  0x17   : > { %p893_p1 = pnand %p892_p0, %p886_p9 }
  0x19   : > { %896 = shalt.err (!%p893_p1)
}
  0x1a   : > { %s897_s10 = scalar_lea.vmem %s1087_s29, 3584  ;;  %s1010_s11 = smov [#allocation4]  }
  0x1b   : > { %p898_p2 = scmp.ne.s32.totalorder %s1087_s29, %s897_s10  ;;  %s902_s17 = sshll.u32 %s1010_s11, 4  ;;  %s903_s17 = int_to_ptr.vmem [resolvable:$false] %s902_s17 }
  0x1c   : > { %s904_s18 = scalar_lea.vmem %s903_s17, 7168  ;;  %p905_p6 = scmp.lt.s32.totalorder %s1087_s29, %s903_s17 }
  0x1d   : > { %p900_p3 = pnand %p898_p2, %p1269_p7  ;;  %p906_p8 = scmp.lt.s32.totalorder %s904_s18, %s897_s10 }
  0x1f   : > { %p901_p4 = pneg %p900_p3  ;;  %p907_p10 = por %p906_p8, %p905_p6 }
  0x21   : > { %p908_p11 = pnand %p907_p10, %p901_p4 }
  0x23   : > { %911 = shalt.err (!%p908_p11)
}
  0x24   : > { %s1011_s20 = smov 6272   ;;  %s1012_s22 = smov 896  }
  0x25   : > { %s1013_s24 = smov 56   ;;  %s1118_s25 = sadd.s32 4294967295, %s1008_s15  }
  0x26   : > { %835 = dma.hbm_to_vmem [thread:$0]  (!%p1077_p5), %s1085_s27, 3584, %s1087_s29, %s1089_s30, %s1011_s20, %s1012_s22, %s1013_s24  }
  0x27   : > { %p58_p9 = scmp.ne.s32.totalorder %s1000_s13, %s996_s12  ;;  %p1268_p12 = scmp.eq.s32.totalorder %s1118_s25, 0 }
  0x28   : > { %p752_p13 = scmp.ge.s32.totalorder %s1008_s15, 1  ;;  %p121_p0 = scmp.lt.s32.totalorder %s1008_s15, 8 }
  0x29   : > { %p1127_p1 = por %p1268_p12, %p58_p9  ;;  %s1014_s27 = smov [#allocation2]  }
  0x2a   : > { %p1131_p2 = pnand %p752_p13, %p121_p0  ;;  %s134_s29 = sshll.u32 %s1014_s27, 4  ;;  %s135_s29 = int_to_ptr.vmem [resolvable:$true] %s134_s29 }
  0x2b   : > { %s1275_s26 = scalar_select %p1127_p1, 1, 0 }
  0x2c   : > { %s1276_s28 = scalar_select %p1131_p2, 1, 0 }
  0x2d   : > { %s817_s4 = smul.u32 7, %s147_s21  ;;  %p828_p3 = pneg %p1131_p2 }
  0x2e   : > { %s769_s12 = smul.u32 112, %s1008_s15  ;;  %s912_s17 = scalar_lea.hbm %s1264_s0, 32 }
  0x2f   : > { %p1142_p4 = pnand %p828_p3, %p1268_p12  ;;  %s170_s6 = scalar_lea.vmem [#allocation6], %s817_s4 }
  0x30   : > { %s178_s7 = sshll.u32 %s170_s6, 4  ;;  %s1149_s10 = scalar_lea.hbm %s1266_s2, %s769_s12  ;;  %s1151_s7 = int_to_ptr.vmem [resolvable:$true] %s178_s7 }
  0x31   : > { %p913_p6 = scmp.ne.s32.totalorder %s1264_s0, %s912_s17  ;;  %p914_p8 = pneg %p1142_p4 }
  0x32   : > { %p919_p9 = scmp.lt.u32.totalorder %s912_s17, %s1264_s0 }
  0x33   : > { %p915_p10 = pnand %p914_p8, %p913_p6 }
  0x35   : > { %p916_p11 = pneg %p915_p10 }
  0x37   : > { %p921_p13 = pnand %p919_p9, %p916_p11 }
  0x39   : > { %924 = shalt.err (!%p921_p13)
}
  0x3a   : > { %s925_s24 = scalar_lea.vmem %s135_s29, 32  ;;  %p933_p7 = scmp.lt.s32.totalorder %s135_s29, %s135_s29 }
  0x3b   : > { %p926_p0 = scmp.ne.s32.totalorder %s135_s29, %s925_s24  ;;  %p934_p1 = scmp.lt.s32.totalorder %s925_s24, %s925_s24 }
  0x3d   : > { %p928_p3 = pnand %p926_p0, %p914_p8  ;;  %p935_p2 = por %p934_p1, %p933_p7 }
  0x3f   : > { %p929_p12 = pneg %p928_p3 }
  0x41   : > { %p936_p5 = pnand %p935_p2, %p929_p12 }
  0x43   : > { %939 = shalt.err (!%p936_p5)
}
  0x44   : > { %831 = dma.hbm_to_vmem [thread:$0]  (!%p1142_p4), %s1264_s0, 32, %s135_s29, [#allocation3]  }
  0x45   : > { %s940_s12 = scalar_lea.hbm %s1149_s10, 112  ;;  %p1278_p8 = scmp.ne.s32.totalorder %s1274_s23, 0 }
  0x46   : > { %p941_p6 = scmp.ne.s32.totalorder %s1149_s10, %s940_s12  ;;  %s945_s9 = scalar_lea.hbm %s1266_s2, 784 }
  0x47   : > { %p1279_p10 = pneg %p1278_p8  ;;  %p946_p5 = scmp.lt.u32.totalorder %s1149_s10, %s1266_s2 }
  0x48   : > { %p947_p7 = scmp.lt.u32.totalorder %s945_s9, %s940_s12  ;;  %p949_p1 = scmp.lt.u32.totalorder %s940_s12, %s1149_s10 }
  0x49   : > { %p943_p11 = pnand %p941_p6, %p1279_p10 }
  0x4a   : > { %p948_p12 = por %p947_p7, %p946_p5 }
  0x4b   : > { %p944_p9 = pneg %p943_p11 }
  0x4c   : > { %p950_p2 = por %p949_p1, %p948_p12 }
  0x4e   : > { %p951_p13 = pnand %p950_p2, %p944_p9 }
  0x50   : > { %954 = shalt.err (!%p951_p13)
}
  0x51   : > { %s955_s29 = scalar_lea.vmem %s1151_s7, 112  ;;  %p1280_p0 = pmov %p1279_p10 }
  0x52   : > { %p956_p4 = scmp.ne.s32.totalorder %s1151_s7, %s955_s29  ;;  %s1015_s11 = smov [#allocation6]  }
  0x53   : > { %s960_s17 = sshll.u32 %s1015_s11, 4  ;;  %s961_s17 = int_to_ptr.vmem [resolvable:$false] %s960_s17 }
  0x54   : > { %p958_p3 = pnand %p956_p4, %p1280_p0  ;;  %s962_s15 = scalar_lea.vmem %s961_s17, 224 }
  0x55   : > { %p963_p10 = scmp.lt.s32.totalorder %s1151_s7, %s961_s17  ;;  %p964_p11 = scmp.lt.s32.totalorder %s962_s15, %s955_s29 }
  0x56   : > { %p959_p6 = pneg %p958_p3 }
  0x57   : > { %p965_p5 = por %p964_p11, %p963_p10 }
  0x59   : > { %p966_p7 = pnand %p965_p5, %p959_p6 }
  0x5b   : > { %969 = shalt.err (!%p966_p7)
}
  0x5c   : > { %838 = dma.hbm_to_vmem [thread:$0]  (!%p1278_p8), %s1149_s10, 112, %s1151_s7, %s1089_s30  }
  0x5d   : > { %p1281_p9 = scmp.ne.s32.totalorder %s1276_s28, 0 }
  0x5e   : > { %p1282_p12 = scmp.eq.s32.totalorder (!%p1281_p9), %s1118_s25, 0 }
  0x5f   : > { %187 = sbr.rel (%p1281_p9) target bundleno = 354 (0x162), region = 32 }
  0x66   : > { %987 = dma.done.wait (%p1282_p12), [#allocation3], 32   ;;  %p1283_p1 = pmov %p1282_p12 }
  0x67   : > { %s193_s18 = sand.u32 1, %s1118_s25   ;;  %s195_s20 = sand.u32 1, %s1000_s13  }
  0x68   : > { %989 = vsyncadd (%p1283_p1), [#allocation3], 4294967264  ;;  %s818_s23 = smul.u32 224, %s195_s20  ;;  %s194_s22 = scalar_lea.sflag [#allocation5], %s193_s18 }
  0x69   : > { %p1284_p8 = scmp.ne.s32.totalorder %s1275_s26, 0 }
  0x6a   : > { %s1203_s24 = scalar_lea.vmem [#allocation4], %s818_s23 }
  0x6b   : > { %991 = dma.done.wait (%p1284_p8), %s194_s22, 3696  }
  0x6c   : > { %993 = vsyncadd (%p1284_p8), %s194_s22, 4294963600  ;;  %v1016_v0 = vmov 0.0   ;;  %v242_v1 = vld [vmem:[%s1203_s24 + $0x8] sm:$0xff]  ;;  %v249_v2 = vld [vmem:[%s1203_s24 + $0x40] sm:$0xff]  ;;  %vm306_vm0 = vcmask 261120   ;;  %v1017_v40 = vmov 0.0|0.0   ;;  %v271_v45 = vlaneseq }
  0x6d   : > { %374 = vmatprep.mubr.f32.mxu0 %v1016_v0  ;;  %445 = vmatprep.mubr.f32.mxu1 %v1016_v0  ;;  %v244_v3 = vld [vmem:[%s1203_s24 + $0x18] sm:$0xff]  ;;  %v786_v4 = vpack.c.bf16 %v249_v2, %v242_v1  ;;  %v251_v5 = vld [vmem:[%s1203_s24 + $0x50] sm:$0xff]  ;;  %v241_v6 = vld [vmem:[%s1203_s24] sm:$0xff]  ;;  %vm1018_vm1 = vmmov 0   ;;  %s819_s30 = smul.u32 7, %s195_s20 }
  0x6e   : > { %v248_v7 = vld [vmem:[%s1203_s24 + $0x38] sm:$0xff]  ;;  %v794_v8 = vpack.c.bf16 %v251_v5, %v244_v3  ;;  %v243_v10 = vld [vmem:[%s1203_s24 + $0x10] sm:$0xff]  ;;  %v250_v11 = vld [vmem:[%s1203_s24 + $0x48] sm:$0xff]  ;;  %v272_v46 = vshrl.u32 %v271_v45, 7  ;;  %v1019_v48 = vmov 1966171168  }
  0x6f   : > { %v788_v9 = vpack.c.bf16 %v248_v7, %v241_v6  ;;  %v256_v12 = vld [vmem:[%s1203_s24 + $0x78] sm:$0xff]  ;;  %787 = vmatprep.subr.bf16.mxu0 %v786_v4  ;;  %v796_v13 = vpack.c.bf16 %v250_v11, %v243_v10  ;;  %v263_v14 = vld [vmem:[%s1203_s24 + $0xb0] sm:$0xff]  ;;  %v258_v15 = vld [vmem:[%s1203_s24 + $0x88] sm:$0xff]  ;;  %v611_v49 = vunpack.c.l.s4 %v1019_v48  ;;  %s206_s26 = scalar_lea.vmem [#allocation6], %s819_s30  ;;  %s235_s28 = smul.u32 7, %s1118_s25 }
  0x70   : > { %v265_v16 = vld [vmem:[%s1203_s24 + $0xc0] sm:$0xff]  ;;  %795 = vmatprep.subr.bf16.mxu1 %v794_v8  ;;  %v790_v17 = vpack.c.bf16 %v263_v14, %v256_v12  ;;  %v255_v19 = vld [vmem:[%s1203_s24 + $0x70] sm:$0xff]  ;;  %v262_v20 = vld [vmem:[%s1203_s24 + $0xa8] sm:$0xff]  ;;  %v273_v47 = vsub.s32 0, %v272_v46  ;;  %v281_v51 = vsub.s32 2, %v272_v46  ;;  %v277_v52 = vsub.s32 1, %v272_v46 }
  0x71   : > { %789 = vmatpush1.bf16.msra.mxu0 %v788_v9  ;;  %v798_v18 = vpack.c.bf16 %v265_v16, %v258_v15  ;;  %v257_v21 = vld [vmem:[%s1203_s24 + $0x80] sm:$0xff]  ;;  %797 = vmatpush1.bf16.msra.mxu1 %v796_v13  ;;  %v792_v22 = vpack.c.bf16 %v262_v20, %v255_v19  ;;  %v264_v23 = vld [vmem:[%s1203_s24 + $0xb8] sm:$0xff]  ;;  %v246_v24 = vld [vmem:[%s1203_s24 + $0x28] sm:$0xff]  ;;  %v285_v53 = vsub.s32 3, %v272_v46  ;;  %v612_v55 = vunpack.c.0.s8 %v611_v49  ;;  %p236_p2 = scmp.lt.s32.totalorder %s235_s28, 48 }
  0x72   : > { %791 = vmatprep.subr.bf16.mxu0 %v790_v17  ;;  %v800_v25 = vpack.c.bf16 %v264_v23, %v257_v21  ;;  %v253_v26 = vld [vmem:[%s1203_s24 + $0x60] sm:$0xff]  ;;  %v252_v28 = vld [vmem:[%s1203_s24 + $0x58] sm:$0xff]  ;;  %v247_v30 = vld [vmem:[%s1203_s24 + $0x30] sm:$0xff]  ;;  %v297_v4 = vsub.s32 6, %v272_v46  ;;  %v293_v5 = vsub.s32 5, %v272_v46 }
  0x73   : > { %799 = vmatprep.subr.bf16.mxu1 %v798_v18  ;;  %v245_v27 = vld [vmem:[%s1203_s24 + $0x20] sm:$0xff]  ;;  %v802_v29 = vpack.c.bf16 %v253_v26, %v246_v24  ;;  %v254_v31 = vld [vmem:[%s1203_s24 + $0x68] sm:$0xff]  ;;  %v260_v32 = vld [vmem:[%s1203_s24 + $0x98] sm:$0xff]  ;;  %v615_v63 = vsub.s32 %v612_v55, %v272_v46  ;;  %s1290_s28 = smov (!%p236_p2, %s235_s28), 48 }
  0x74   : > { %v240_v33 = vld [vmem:[#allocation2] sm:$0x3]  ;;  %v804_v34 = vpack.c.bf16 %v252_v28, %v245_v27  ;;  %v267_v35 = vld [vmem:[%s1203_s24 + $0xd0] sm:$0xff]  ;;  %v811_v36 = vpack.c.bf16 %v254_v31, %v247_v30  ;;  %v266_v39 = vld [vmem:[%s1203_s24 + $0xc8] sm:$0xff]  ;;  %s238_s25 = scalar_lea.vmem %s1267_s3, %s1290_s28 }
  0x75   : > { %793 = vmatpush1.bf16.msra.mxu0 %v792_v22  ;;  %801 = vmatpush1.bf16.msra.mxu1 %v800_v25  ;;  %v806_v37 = vpack.c.bf16 %v267_v35, %v260_v32  ;;  %v259_v38 = vld [vmem:[%s1203_s24 + $0x90] sm:$0xff]  ;;  %v261_v41 = vld [vmem:[%s1203_s24 + $0xa0] sm:$0xff]  ;;  %v268_v42 = vld [vmem:[%s1203_s24 + $0xd8] sm:$0xff] }
  0x76   : > { %803 = vmatprep.subr.bf16.mxu0 %v802_v29  ;;  %810 = vmatprep.subr.bf16.mxu1 %v1017_v40  ;;  %v808_v43 = vpack.c.bf16 %v266_v39, %v259_v38  ;;  %v814_v44 = vpack.c.bf16 %v268_v42, %v261_v41  ;;  %v269_v50 = vld [vmem:[%s206_s26] sm:$0xff] }
  0x77   : > { %v274_v54 = vrot.slane %v269_v50, %v273_v47  ;;  %v282_v56 = vrot.slane %v269_v50, %v281_v51  ;;  %v278_v57 = vrot.slane %v269_v50, %v277_v52  ;;  %v286_v58 = vrot.slane %v269_v50, %v285_v53 }
  0x78   : > { %759 = vmatmul.mubr.msk.f32.vlgmr.msra.gmra.mrb[0].mxu0 %vm306_vm0, %v240_v33  ;;  %760 = vmatmul.mubr.msk.f32.vlgmr.msra.gmra.mrb[0].mxu1 %vm306_vm0, %v240_v33  ;;  %v298_v11 = vrot.slane %v269_v50, %v297_v4  ;;  %v294_v12 = vrot.slane %v269_v50, %v293_v5 }
  0x79   : > { %805 = vmatpush1.bf16.msra.mxu0 %v804_v34  ;;  %812 = vmatpush3.bf16.msra.mxu1 %v811_v36 }
  0x7a   : > { %807 = vmatprep.subr.bf16.mxu0 %v806_v37  ;;  %813 = vmatprep.subr.bf16.mxu1 %v1017_v40 }
  0x7b   : > { %516 = vmatprep.mubr.f32.mxu0 %v1016_v0  ;;  %783 = vmatprep.mubr.msk.f32.mxu1 %vm1018_vm1, %v1016_v0  ;;  %v289_v0 = vsub.s32 4, %v272_v46 }
  0x7d   : > { %809 = vmatpush1.bf16.msra.mxu0 %v808_v43  ;;  %815 = vmatpush3.bf16.msra.mxu1 %v814_v44  ;;  %v290_v9 = vrot.slane %v269_v50, %v289_v0 }
  0x80   : > { %761 = vmatmul.mubr.msk.f32.vlgmr.msra.gmra.mrb[2].mxu0 %vm306_vm0, %v240_v33  ;;  %784 = vmatmul.mubr.msk.f32.vlgmr.msra.gmra.mrb[2].mxu1 %vm306_vm0, %v240_v33 }
 0x14b   : > { %v376_v59 = vpop.f32.mrb[0].mxu0  ;;  %v447_v61 = vpop.f32.mrb[0].mxu1 }
 0x14c   : > { %v377_v60 = vadd.f32 %v376_v59, %v274_v54  ;;  %v378_v62 = vpop.f32.mrb[1].mxu0  ;;  %v448_v1 = vadd.f32 %v447_v61, %v282_v56  ;;  %v449_v3 = vpop.f32.mrb[1].mxu1 }
 0x14d   : > { %v379_v2 = vadd.f32 %v378_v62, %v278_v57  ;;  %v450_v6 = vadd.f32 %v449_v3, %v286_v58 }
 0x14f   : > { %v763_v7 = vpack.c.bf16 %v379_v2, %v377_v60  ;;  %v764_v8 = vpack.c.bf16 %v450_v6, %v448_v1 }
 0x151   : > { %v616_v10 = vrot.slane %v763_v7, %v615_v63  ;;  %v623_v13 = vrot.slane %v764_v8, %v615_v63 }
 0x153   : > { %v518_v14 = vpop.f32.mrb[2].mxu0  ;;  %v638_v15 = vcombine.low %v616_v10, %v623_v13  ;;  %v589_v17 = vpop.f32.mrb[2].mxu1 }
 0x154   : > { %v519_v16 = vadd.f32 %v518_v14, %v290_v9  ;;  %v520_v18 = vpop.f32.mrb[3].mxu0  ;;  %v590_v19 = vadd.f32 %v589_v17, %v298_v11  ;;  %v785_v21 = vpop.f32.mrb[3].mxu1 }
 0x155   : > { %v521_v20 = vadd.f32 %v520_v18, %v294_v12  ;;  %v646_v27 = vrot.slane %v638_v15, %v615_v63 }
 0x156   : > { %v599_v22 = vpack.c.bf16 %v590_v19, %v590_v19 }
 0x157   : > { %v765_v23 = vpack.c.bf16 %v521_v20, %v519_v16 }
 0x158   : > { %v637_v24 = vrot.slane %v599_v22, %v615_v63 }
 0x159   : > { %v630_v25 = vrot.slane %v765_v23, %v615_v63 }
 0x15b   : > { %v639_v26 = vcombine.low %v630_v25, %v637_v24 }
 0x15d   : > { %v653_v28 = vrot.slane %v639_v26, %v615_v63 }
 0x15f   : > { %v654_v29 = vcombine.low %v646_v27, %v653_v28 }
 0x161   : > { %656 = vst [vmem:[%s238_s25] sm:$0x7f] %v654_v29 }
 0x162 PF: > { %p14_p13 = scmp.ge.s32.totalorder %s1061_s16, 9   ;;  %s1285_s12 = smov %s1000_s13 }
 0x163   : > { %s1286_s13 = smov %s1004_s14  ;;  %s1287_s14 = smov %s1071_s19 }
 0x164   : > { %s1288_s15 = smov %s1061_s16  ;;  %16 = sbr.rel (!%p14_p13) target bundleno = 4 (0x4), region = 88 }
 0x16b   :  { %677 = vsyncpa [#allocation3], 1 }
 0x16c   :  { %679 = vsyncpa [#allocation3 + $0x1], 1 }
 0x16d   :  { %680 = vsyncpa [#allocation5], 1 }
 0x16e   :  { %682 = vsyncpa [#allocation5 + $0x1], 1 }

// kernel: decoder_forward.6
= control target key start
LH: loop header
LB: loop body
LE: loop exit
PB: predicated region body
PF: predicated region fallthrough
CT: control target
= control target key end

     0   :  { %s599_s12 = smov 0   ;;  %s774_s0 = inlined_call_operand.vmem [shape: f32[2,7,28,64], index: 0, kind: input, shape index: {}]   ;;  %s775_s1 = inlined_call_operand.vmem [shape: f32[1,64], index: 1, kind: input, shape index: {}]   ;;  %s776_s2 = inlined_call_operand.vmem [shape: f32[1,64], index: 2, kind: input, shape index: {}]   ;;  %s777_s3 = inlined_call_operand.vmem [shape: bf16[2,7,28,64], index: 3, kind: output, shape index: {}]  }
   0x1 LB: > { %s494_s13 = sadd.s32 4294967295, %s577_s12   ;;  %p498_p0 = scmp.ge.s32.totalorder %s577_s12, 1  ;;  %s577_s12 = sphi %s599_s12, %s13_s12  }
   0x2   : > { %p137_p1 = scmp.lt.s32.totalorder %s577_s12, 3 }
   0x4   : > { %p138_p2 = pnand %p498_p0, %p137_p1 }
   0x5   : > { %p161_p3 = scmp.lt.s32.totalorder (!%p138_p2), %s494_s13, 1  ;;  %v613_v0 = vld [vmem:[%s775_s1] ss:$0 sm:$0xff] (!%p138_p2)  ;;  %vm409_vm0 = vcmask (!%p138_p2), 519168   ;;  %vm413_vm1 = vcmask (!%p138_p2), 517120  }
   0x6   : > { %141 = sbr.rel (%p138_p2) target bundleno = 54 (0x36), region = 32  ;;  %v623_v1 = vld [vmem:[%s776_s2] ss:$0 sm:$0xff] (!%p138_p2) }
   0xd   : > { %s779_s13 = smov (!%p161_p3, %s494_s13), 1 }
   0xe   : > { %s561_s14 = smul.u32 224, %s779_s13 }
   0xf   : > { %s562_s22 = smul.u32 112, %s779_s13 }
  0x10   : > { %s618_s19 = scalar_lea.vmem %s774_s0, %s561_s14 }
  0x11   : > { %v173_v2 = vld [vmem:[%s618_s19] sm:$0xff]  ;;  %v174_v3 = vld [vmem:[%s618_s19 + $0x8] sm:$0xff]  ;;  %v175_v4 = vld [vmem:[%s618_s19 + $0x10] sm:$0xff]  ;;  %s652_s25 = scalar_lea.vmem %s777_s3, %s562_s22 }
  0x12   : > { %v207_v5 = vmul.f32 %v613_v0, %v173_v2  ;;  %v208_v6 = vmul.f32 %v613_v0, %v174_v3  ;;  %v209_v7 = vmul.f32 %v613_v0, %v175_v4  ;;  %v176_v8 = vld [vmem:[%s618_s19 + $0x18] sm:$0xf]  ;;  %v177_v9 = vld [vmem:[%s618_s19 + $0x20] sm:$0xff]  ;;  %v178_v10 = vld [vmem:[%s618_s19 + $0x28] sm:$0xff] }
  0x13   : > { %v210_v11 = vmul.f32 %v613_v0, %v176_v8  ;;  %v211_v12 = vmul.f32 %v613_v0, %v177_v9  ;;  %v212_v13 = vmul.f32 %v613_v0, %v178_v10  ;;  %v179_v14 = vld [vmem:[%s618_s19 + $0x30] sm:$0xff]  ;;  %v180_v15 = vld [vmem:[%s618_s19 + $0x38] sm:$0xf]  ;;  %v181_v32 = vld [vmem:[%s618_s19 + $0x40] sm:$0xff] }
  0x14   : > { %v241_v16 = vadd.f32 %v623_v1, %v207_v5  ;;  %v242_v17 = vadd.f32 %v623_v1, %v208_v6  ;;  %v243_v18 = vadd.f32 %v623_v1, %v209_v7  ;;  %v213_v19 = vmul.f32 %v613_v0, %v179_v14  ;;  %v182_v33 = vld [vmem:[%s618_s19 + $0x48] sm:$0xff]  ;;  %v183_v34 = vld [vmem:[%s618_s19 + $0x50] sm:$0xff]  ;;  %v184_v39 = vld [vmem:[%s618_s19 + $0x58] sm:$0xf] }
  0x15   : > { %v244_v20 = vadd.f32 %v623_v1, %v210_v11  ;;  %v245_v21 = vadd.f32 %v623_v1, %v211_v12  ;;  %v246_v22 = vadd.f32 %v623_v1, %v212_v13  ;;  %v214_v23 = vmul.f32 %v613_v0, %v180_v15  ;;  %v185_v40 = vld [vmem:[%s618_s19 + $0x60] sm:$0xff]  ;;  %v186_v41 = vld [vmem:[%s618_s19 + $0x68] sm:$0xff]  ;;  %v187_v46 = vld [vmem:[%s618_s19 + $0x70] sm:$0xff] }
  0x16   : > { %v269_v24 = vmax.f32 %v241_v16, 0.0  ;;  %v270_v25 = vmax.f32 %v242_v17, 0.0  ;;  %v271_v26 = vmax.f32 %v243_v18, 0.0  ;;  %v247_v27 = vadd.f32 %v623_v1, %v213_v19  ;;  %v188_v51 = vld [vmem:[%s618_s19 + $0x78] sm:$0xf]  ;;  %v189_v10 = vld [vmem:[%s618_s19 + $0x80] sm:$0xff] }
  0x17   : > { %v272_v28 = vmax.f32 %v244_v20, 0.0  ;;  %v273_v29 = vmax.f32 %v245_v21, 0.0  ;;  %v274_v30 = vmax.f32 %v246_v22, 0.0  ;;  %v248_v31 = vadd.f32 %v623_v1, %v214_v23  ;;  %v190_v11 = vld [vmem:[%s618_s19 + $0x88] sm:$0xff]  ;;  %v191_v12 = vld [vmem:[%s618_s19 + $0x90] sm:$0xff]  ;;  %v193_v18 = vld [vmem:[%s618_s19 + $0xa0] sm:$0xff] }
  0x18   : > { %v533_v35 = vpack.c.bf16 %v269_v24, %v269_v24  ;;  %v534_v36 = vpack.c.bf16 %v270_v25, %v270_v25  ;;  %v535_v37 = vpack.c.bf16 %v271_v26, %v271_v26  ;;  %v275_v38 = vmax.f32 %v247_v27, 0.0  ;;  %v192_v17 = vld [vmem:[%s618_s19 + $0x98] sm:$0xf]  ;;  %v194_v19 = vld [vmem:[%s618_s19 + $0xa8] sm:$0xff]  ;;  %v195_v24 = vld [vmem:[%s618_s19 + $0xb0] sm:$0xff] }
  0x19   : > { %v536_v42 = vpack.c.bf16 %v272_v28, %v272_v28  ;;  %v537_v43 = vpack.c.bf16 %v273_v29, %v273_v29  ;;  %v538_v44 = vpack.c.bf16 %v274_v30, %v274_v30  ;;  %v276_v45 = vmax.f32 %v248_v31, 0.0  ;;  %v196_v29 = vld [vmem:[%s618_s19 + $0xb8] sm:$0xf] }
  0x1a   : > { %410 = vst.msk [vmem:[%s652_s25] sm:$0xf] %vm409_vm0, %v533_v35  ;;  %411 = vst.msk [vmem:[%s652_s25 + $0x4] sm:$0xf] %vm409_vm0, %v534_v36  ;;  %v539_v47 = vpack.c.bf16 %v275_v38, %v275_v38  ;;  %v215_v48 = vmul.f32 %v613_v0, %v181_v32  ;;  %v216_v49 = vmul.f32 %v613_v0, %v182_v33 }
  0x1b   : > { %412 = vst.msk [vmem:[%s652_s25 + $0x8] sm:$0xf] %vm409_vm0, %v535_v37  ;;  %v217_v50 = vmul.f32 %v613_v0, %v183_v34  ;;  %415 = vst.msk [vmem:[%s652_s25 + $0x10] sm:$0xf] %vm409_vm0, %v537_v43  ;;  %v540_v52 = vpack.c.bf16 %v276_v45, %v276_v45  ;;  %v218_v53 = vmul.f32 %v613_v0, %v184_v39 }
  0x1c   : > { %414 = vst.msk [vmem:[%s652_s25 + $0xc] sm:$0x3] %vm413_vm1, %v536_v42  ;;  %v219_v54 = vmul.f32 %v613_v0, %v185_v40  ;;  %v220_v55 = vmul.f32 %v613_v0, %v186_v41  ;;  %v249_v56 = vadd.f32 %v623_v1, %v215_v48  ;;  %v250_v57 = vadd.f32 %v623_v1, %v216_v49 }
  0x1d   : > { %416 = vst.msk [vmem:[%s652_s25 + $0x14] sm:$0xf] %vm409_vm0, %v538_v44  ;;  %417 = vst.msk [vmem:[%s652_s25 + $0x18] sm:$0xf] %vm409_vm0, %v539_v47  ;;  %v251_v58 = vadd.f32 %v623_v1, %v217_v50  ;;  %v221_v59 = vmul.f32 %v613_v0, %v187_v46  ;;  %v252_v60 = vadd.f32 %v623_v1, %v218_v53  ;;  %v197_v50 = vld [vmem:[%s618_s19 + $0xc0] sm:$0xff] }
  0x1e   : > { %418 = vst.msk [vmem:[%s652_s25 + $0x1c] sm:$0x3] %vm413_vm1, %v540_v52  ;;  %v253_v61 = vadd.f32 %v623_v1, %v219_v54  ;;  %v254_v62 = vadd.f32 %v623_v1, %v220_v55  ;;  %v222_v63 = vmul.f32 %v613_v0, %v188_v51  ;;  %v277_v2 = vmax.f32 %v249_v56, 0.0  ;;  %v198_v51 = vld [vmem:[%s618_s19 + $0xc8] sm:$0xff]  ;;  %v199_v52 = vld [vmem:[%s618_s19 + $0xd0] sm:$0xff] }
  0x1f   : > { %v278_v3 = vmax.f32 %v250_v57, 0.0  ;;  %v279_v4 = vmax.f32 %v251_v58, 0.0  ;;  %v255_v5 = vadd.f32 %v623_v1, %v221_v59  ;;  %v280_v6 = vmax.f32 %v252_v60, 0.0  ;;  %v200_v57 = vld [vmem:[%s618_s19 + $0xd8] sm:$0xf] }
  0x20   : > { %v281_v7 = vmax.f32 %v253_v61, 0.0  ;;  %v282_v8 = vmax.f32 %v254_v62, 0.0  ;;  %v256_v9 = vadd.f32 %v623_v1, %v222_v63  ;;  %v541_v13 = vpack.c.bf16 %v277_v2, %v277_v2 }
  0x21   : > { %v542_v14 = vpack.c.bf16 %v278_v3, %v278_v3  ;;  %v543_v15 = vpack.c.bf16 %v279_v4, %v279_v4  ;;  %v283_v16 = vmax.f32 %v255_v5, 0.0  ;;  %v544_v20 = vpack.c.bf16 %v280_v6, %v280_v6 }
  0x22   : > { %v545_v21 = vpack.c.bf16 %v281_v7, %v281_v7  ;;  %v546_v22 = vpack.c.bf16 %v282_v8, %v282_v8  ;;  %v284_v23 = vmax.f32 %v256_v9, 0.0  ;;  %419 = vst.msk [vmem:[%s652_s25 + $0x20] sm:$0xf] %vm409_vm0, %v541_v13  ;;  %v223_v26 = vmul.f32 %v613_v0, %v189_v10 }
  0x23   : > { %420 = vst.msk [vmem:[%s652_s25 + $0x24] sm:$0xf] %vm409_vm0, %v542_v14  ;;  %421 = vst.msk [vmem:[%s652_s25 + $0x28] sm:$0xf] %vm409_vm0, %v543_v15  ;;  %v547_v25 = vpack.c.bf16 %v283_v16, %v283_v16  ;;  %v224_v27 = vmul.f32 %v613_v0, %v190_v11  ;;  %v225_v28 = vmul.f32 %v613_v0, %v191_v12 }
  0x24   : > { %422 = vst.msk [vmem:[%s652_s25 + $0x2c] sm:$0x3] %vm413_vm1, %v544_v20  ;;  %v548_v30 = vpack.c.bf16 %v284_v23, %v284_v23  ;;  %v226_v31 = vmul.f32 %v613_v0, %v192_v17  ;;  %v227_v32 = vmul.f32 %v613_v0, %v193_v18  ;;  %v228_v33 = vmul.f32 %v613_v0, %v194_v19 }
  0x25   : > { %423 = vst.msk [vmem:[%s652_s25 + $0x30] sm:$0xf] %vm409_vm0, %v545_v21  ;;  %424 = vst.msk [vmem:[%s652_s25 + $0x34] sm:$0xf] %vm409_vm0, %v546_v22  ;;  %v257_v34 = vadd.f32 %v623_v1, %v223_v26  ;;  %v258_v35 = vadd.f32 %v623_v1, %v224_v27  ;;  %v259_v36 = vadd.f32 %v623_v1, %v225_v28 }
  0x26   : > { %425 = vst.msk [vmem:[%s652_s25 + $0x38] sm:$0xf] %vm409_vm0, %v547_v25  ;;  %v229_v37 = vmul.f32 %v613_v0, %v195_v24  ;;  %v260_v38 = vadd.f32 %v623_v1, %v226_v31  ;;  %v261_v39 = vadd.f32 %v623_v1, %v227_v32  ;;  %v262_v40 = vadd.f32 %v623_v1, %v228_v33 }
  0x27   : > { %426 = vst.msk [vmem:[%s652_s25 + $0x3c] sm:$0x3] %vm413_vm1, %v548_v30  ;;  %v230_v41 = vmul.f32 %v613_v0, %v196_v29  ;;  %v285_v42 = vmax.f32 %v257_v34, 0.0  ;;  %v286_v43 = vmax.f32 %v258_v35, 0.0  ;;  %v287_v44 = vmax.f32 %v259_v36, 0.0 }
  0x28   : > { %v263_v45 = vadd.f32 %v623_v1, %v229_v37  ;;  %v288_v46 = vmax.f32 %v260_v38, 0.0  ;;  %v289_v47 = vmax.f32 %v261_v39, 0.0  ;;  %v290_v48 = vmax.f32 %v262_v40, 0.0 }
  0x29   : > { %v264_v49 = vadd.f32 %v623_v1, %v230_v41  ;;  %v549_v53 = vpack.c.bf16 %v285_v42, %v285_v42  ;;  %v550_v54 = vpack.c.bf16 %v286_v43, %v286_v43  ;;  %v551_v55 = vpack.c.bf16 %v287_v44, %v287_v44 }
  0x2a   : > { %v291_v56 = vmax.f32 %v263_v45, 0.0  ;;  %v552_v58 = vpack.c.bf16 %v288_v46, %v288_v46  ;;  %v553_v59 = vpack.c.bf16 %v289_v47, %v289_v47  ;;  %v554_v60 = vpack.c.bf16 %v290_v48, %v290_v48 }
  0x2b   : > { %v292_v61 = vmax.f32 %v264_v49, 0.0  ;;  %427 = vst.msk [vmem:[%s652_s25 + $0x40] sm:$0xf] %vm409_vm0, %v549_v53  ;;  %428 = vst.msk [vmem:[%s652_s25 + $0x44] sm:$0xf] %vm409_vm0, %v550_v54  ;;  %v231_v63 = vmul.f32 %v613_v0, %v197_v50  ;;  %v232_v2 = vmul.f32 %v613_v0, %v198_v51  ;;  %v233_v3 = vmul.f32 %v613_v0, %v199_v52 }
  0x2c   : > { %429 = vst.msk [vmem:[%s652_s25 + $0x48] sm:$0xf] %vm409_vm0, %v551_v55  ;;  %v555_v62 = vpack.c.bf16 %v291_v56, %v291_v56  ;;  %431 = vst.msk [vmem:[%s652_s25 + $0x50] sm:$0xf] %vm409_vm0, %v553_v59  ;;  %v234_v5 = vmul.f32 %v613_v0, %v200_v57 }
  0x2d   : > { %430 = vst.msk [vmem:[%s652_s25 + $0x4c] sm:$0x3] %vm413_vm1, %v552_v58  ;;  %v556_v4 = vpack.c.bf16 %v292_v61, %v292_v61  ;;  %v265_v6 = vadd.f32 %v623_v1, %v231_v63  ;;  %v266_v7 = vadd.f32 %v623_v1, %v232_v2  ;;  %v267_v8 = vadd.f32 %v623_v1, %v233_v3 }
  0x2e   : > { %432 = vst.msk [vmem:[%s652_s25 + $0x54] sm:$0xf] %vm409_vm0, %v554_v60  ;;  %433 = vst.msk [vmem:[%s652_s25 + $0x58] sm:$0xf] %vm409_vm0, %v555_v62  ;;  %v268_v9 = vadd.f32 %v623_v1, %v234_v5 }
  0x2f   : > { %434 = vst.msk [vmem:[%s652_s25 + $0x5c] sm:$0x3] %vm413_vm1, %v556_v4  ;;  %v293_v10 = vmax.f32 %v265_v6, 0.0  ;;  %v294_v11 = vmax.f32 %v266_v7, 0.0  ;;  %v295_v12 = vmax.f32 %v267_v8, 0.0 }
  0x30   : > { %v296_v13 = vmax.f32 %v268_v9, 0.0 }
  0x31   : > { %v557_v0 = vpack.c.bf16 %v293_v10, %v293_v10  ;;  %v558_v14 = vpack.c.bf16 %v294_v11, %v294_v11  ;;  %v559_v15 = vpack.c.bf16 %v295_v12, %v295_v12 }
  0x32   : > { %v560_v16 = vpack.c.bf16 %v296_v13, %v296_v13 }
  0x33   : > { %435 = vst.msk [vmem:[%s652_s25 + $0x60] sm:$0xf] %vm409_vm0, %v557_v0  ;;  %436 = vst.msk [vmem:[%s652_s25 + $0x64] sm:$0xf] %vm409_vm0, %v558_v14 }
  0x34   : > { %437 = vst.msk [vmem:[%s652_s25 + $0x68] sm:$0xf] %vm409_vm0, %v559_v15 }
  0x35   : > { %438 = vst.msk [vmem:[%s652_s25 + $0x6c] sm:$0x3] %vm413_vm1, %v560_v16 }
  0x36 PF: > { %s13_s12 = sadd.s32 1, %s577_s12  }
  0x37   : > { %p10_p4 = scmp.ge.s32.totalorder %s13_s12, 4  }
  0x39   :  { %12 = sbr.rel (!%p10_p4) target bundleno = 1 (0x1), region = 62 }

// kernel: decoder_forward.5
= control target key start
LH: loop header
LB: loop body
LE: loop exit
PB: predicated region body
PF: predicated region fallthrough
CT: control target
= control target key end

     0   :  { %s3443_s18 = smov 0   ;;  %s3445_s19 = smov 0   ;;  %s4150_s0 = inlined_call_operand.vmem [shape: bf16[2,9,9,128], index: 0, kind: input, shape index: {}]   ;;  %s4151_s1 = inlined_call_operand.vmem [shape: bf16[4,4,128,64], index: 1, kind: input, shape index: {}]   ;;  %s4152_s2 = inlined_call_operand.vmem [shape: f32[1,64], index: 2, kind: input, shape index: {}]   ;;  %s4153_s3 = inlined_call_operand.vmem [shape: f32[2,7,28,64], index: 3, kind: output, shape index: {0}]   ;;  %s4154_s4 = inlined_call_operand.vmem [shape: f32[1,64], index: 4, kind: output, shape index: {1}]   ;;  %s4155_s5 = inlined_call_operand.vmem [shape: f32[1,64], index: 5, kind: output, shape index: {2}]  }
   0x1   :  { %s3447_s20 = smov 0   ;;  %s3449_s21 = smov 0  }
   0x2   :  { %s3451_s22 = smov 0  }
   0x3 LB: > { %s25_s23 = sadd.s32 1, %s3400_s20  ;;  %s28_s24 = sadd.s32 1, %s3404_s21  ;;  %s3408_s22 = sphi %s3451_s22, %s16_s22   ;;  %s3404_s21 = sphi %s3449_s21, %s4159_s21   ;;  %s3400_s20 = sphi %s3447_s20, %s4158_s20   ;;  %s3396_s19 = sphi %s3445_s19, %s4157_s19   ;;  %s3392_s18 = sphi %s3443_s18, %s4156_s18  }
   0x4   : > { %p26_p0 = scmp.ge.s32.totalorder %s25_s23, 7  ;;  %p2314_p1 = scmp.ge.s32.totalorder %s3408_s22, 1 }
   0x5   : > { %p196_p2 = scmp.lt.s32.totalorder %s3408_s22, 15 }
   0x6   : > { %s4161_s23 = smov (%p26_p0, %s25_s23), 0  ;;  %s4163_s24 = smov (!%p26_p0, %s28_s24), %s3404_s21 }
   0x7   : > { %p197_p3 = pnand %p2314_p1, %p196_p2  ;;  %p30_p4 = scmp.ge.s32.totalorder %s4163_s24, 2 }
   0x8   : > { %p228_p5 = scmp.lt.s32.totalorder (!%p197_p3), %s3396_s19, 1  ;;  %p235_p6 = scmp.lt.s32.totalorder (!%p197_p3), %s3392_s18, 6 }
   0x9   : > { %s4165_s24 = smov (%p30_p4, %s4163_s24), 0  ;;  %200 = sbr.rel (%p197_p3) target bundleno = 520 (0x208), region = 32 }
   0xa   : > { %p243_p7 = scmp.eq.s32.totalorder (!%p197_p3), %s3396_s19, 0  ;;  %p244_p8 = scmp.eq.s32.totalorder (!%p197_p3), %s3392_s18, 0 }
   0xc   : > { %p245_p9 = pnand (!%p197_p3), %p244_p8, %p243_p7 }
  0x10   : > { %s4167_s19 = smov (!%p228_p5, %s3396_s19), 1  ;;  %vm249_vm0 = vcmask (!%p245_p9), 516096   ;;  %v3410_v0 = vmov (!%p245_p9), 0.0  }
  0x11   : > { %s236_s25 = scalar_select %p235_p6, %s3392_s18, 6 }
  0x12   : > { %s3185_s26 = smul.u32 72, %s4167_s19  ;;  %250 = vst.msk [vmem:[%s4154_s4] sm:$0x1] (!%p245_p9), %vm249_vm0, %v3410_v0  ;;  %251 = vst.msk [vmem:[%s4155_s5] sm:$0x1] (!%p245_p9), %vm249_vm0, %v3410_v0 }
  0x13   : > { %s2316_s27 = sshll.u32 %s236_s25, 2  ;;  %s3186_s28 = smul.u32 28, %s4167_s19 }
  0x14   : > { %s3481_s6 = scalar_lea.vmem %s4150_s0, %s3185_s26  ;;  %248 = sbr.rel (%p245_p9) target bundleno = 27 (0x1b), region = 36 }
  0x15   : > { %s239_s7 = sadd.s32 %s3186_s28, %s2316_s27 }
  0x16   : > { %s2317_s8 = sshll.u32 %s239_s7, 3 }
  0x17   : > { %s3486_s11 = scalar_lea.vmem %s4153_s3, %s2317_s8 }
  0x1b PF: > { %v3230_v1 = vld [vmem:[%s4151_s1 + $0x40] sm:$0xff]   ;;  %v3411_v2 = vmov 0.0   ;;  %v3232_v4 = vld [vmem:[%s4151_s1 + $0x48] sm:$0xff]   ;;  %vm3412_vm1 = vmmov 0   ;;  %v3234_v6 = vld [vmem:[%s4151_s1 + $0x50] sm:$0xff]   ;;  %s2720_s13 = sshll.u32 %s3392_s18, 3 }
  0x1c   : > { %2865 = vmatprep.subr.bf16.mxu0 %v3411_v2  ;;  %2885 = vmatprep.subr.bf16.mxu1 %v3411_v2  ;;  %v3231_v3 = vld [vmem:[%s4151_s1] sm:$0xff]   ;;  %v3233_v5 = vld [vmem:[%s4151_s1 + $0x8] sm:$0xff]   ;;  %v3235_v7 = vld [vmem:[%s4151_s1 + $0x10] sm:$0xff]   ;;  %s3532_s16 = scalar_lea.vmem %s3481_s6, %s2720_s13  ;;  %vm712_vm2 = vcmask 522240   ;;  %vm723_vm3 = vcmask 516096  }
  0x1d   : > { %2866 = vmatpush3.bf16.msra.mxu0 %v3230_v1  ;;  %2881 = vmatprep.mubr.msk.bf16.mxu0 %vm3412_vm1, %v3411_v2  ;;  %v3236_v8 = vld [vmem:[%s4151_s1 + $0x58] sm:$0xff]   ;;  %v3238_v10 = vld [vmem:[%s4151_s1 + $0x60] sm:$0xff]   ;;  %v3240_v14 = vld [vmem:[%s4151_s1 + $0x68] sm:$0xff]  }
  0x1e   : > { %2886 = vmatpush3.bf16.msra.mxu1 %v3231_v3  ;;  %2867 = vmatprep.subr.bf16.mxu0 %v3411_v2  ;;  %v3237_v9 = vld [vmem:[%s4151_s1 + $0x18] sm:$0xff]   ;;  %v3239_v11 = vld [vmem:[%s4151_s1 + $0x20] sm:$0xff]   ;;  %v3241_v15 = vld [vmem:[%s4151_s1 + $0x28] sm:$0xff]  }
  0x1f   : > { %2887 = vmatprep.subr.bf16.mxu1 %v3411_v2  ;;  %2901 = vmatprep.mubr.msk.bf16.mxu1 %vm3412_vm1, %v3411_v2  ;;  %v255_v12 = vld [vmem:[%s3532_s16] sm:$0xf]  ;;  %v3242_v17 = vld [vmem:[%s4151_s1 + $0x70] sm:$0xff]   ;;  %v3244_v21 = vld [vmem:[%s4151_s1 + $0x78] sm:$0xff]  }
  0x20   : > { %v2336_v13 = vcombine.low %v255_v12, %v255_v12  ;;  %v3243_v18 = vld [vmem:[%s4151_s1 + $0x30] sm:$0xff]   ;;  %v3245_v22 = vld [vmem:[%s4151_s1 + $0x38] sm:$0xff]   ;;  %v3247_v24 = vld [vmem:[%s4151_s1 + $0x80] sm:$0xff]  }
  0x21   : > { %2868 = vmatpush3.bf16.msra.mxu0 %v3232_v4  ;;  %v3248_v25 = vld [vmem:[%s4151_s1 + $0xc0] sm:$0xff]   ;;  %v3249_v26 = vld [vmem:[%s4151_s1 + $0x88] sm:$0xff]   ;;  %v3251_v28 = vld [vmem:[%s4151_s1 + $0x90] sm:$0xff]  }
  0x22   : > { %2888 = vmatpush3.bf16.msra.mxu1 %v3233_v5  ;;  %2869 = vmatprep.subr.bf16.mxu0 %v3411_v2  ;;  %v295_v16 = vshll.u32 %v2336_v13, 16  ;;  %v293_v19 = vshrl.u32 %v2336_v13, 16  ;;  %v3250_v27 = vld [vmem:[%s4151_s1 + $0xc8] sm:$0xff]   ;;  %v3252_v29 = vld [vmem:[%s4151_s1 + $0xd0] sm:$0xff]   ;;  %v3253_v30 = vld [vmem:[%s4151_s1 + $0x98] sm:$0xff]  }
  0x23   : > { %2889 = vmatprep.subr.bf16.mxu1 %v3411_v2  ;;  %v3254_v31 = vld [vmem:[%s4151_s1 + $0xd8] sm:$0xff]   ;;  %v3255_v32 = vld [vmem:[%s4151_s1 + $0xa0] sm:$0xff]   ;;  %v2354_v34 = vld [vmem:[%s3532_s16 + $0x8] sm:$0xf] }
  0x24   : > { %v297_v20 = vrot.slane %v295_v16, 1  ;;  %v3256_v33 = vld [vmem:[%s4151_s1 + $0xe0] sm:$0xff]   ;;  %v3257_v35 = vld [vmem:[%s4151_s1 + $0xa8] sm:$0xff]   ;;  %v2395_v36 = vcombine.low %v2354_v34, %v2354_v34  ;;  %v3259_v38 = vld [vmem:[%s4151_s1 + $0xb0] sm:$0xff]  }
  0x25   : > { %2870 = vmatpush3.bf16.msra.mxu0 %v3234_v6  ;;  %v3258_v37 = vld [vmem:[%s4151_s1 + $0xe8] sm:$0xff]   ;;  %v3260_v40 = vld [vmem:[%s4151_s1 + $0xf0] sm:$0xff]   ;;  %v3261_v41 = vld [vmem:[%s4151_s1 + $0xb8] sm:$0xff]  }
  0x26   : > { %2890 = vmatpush3.bf16.msra.mxu1 %v3235_v7  ;;  %2871 = vmatprep.subr.bf16.mxu0 %v3411_v2  ;;  %v298_v23 = vor.u32 %v297_v20, %v293_v19  ;;  %v610_v39 = vshll.u32 %v2395_v36, 16  ;;  %v608_v42 = vshrl.u32 %v2395_v36, 16  ;;  %v3262_v44 = vld [vmem:[%s4151_s1 + $0xf8] sm:$0xff]   ;;  %v3264_v46 = vld [vmem:[%s4151_s1 + $0x140] sm:$0xff]   ;;  %v3266_v48 = vld [vmem:[%s4151_s1 + $0x148] sm:$0xff]  }
  0x27   : > { %2891 = vmatprep.subr.bf16.mxu1 %v3411_v2  ;;  %v3265_v47 = vld [vmem:[%s4151_s1 + $0x100] sm:$0xff]   ;;  %v3267_v49 = vld [vmem:[%s4151_s1 + $0x108] sm:$0xff]   ;;  %v3268_v50 = vld [vmem:[%s4151_s1 + $0x150] sm:$0xff]  }
  0x28   : > { %v612_v43 = vrot.slane %v610_v39, 1  ;;  %v3269_v51 = vld [vmem:[%s4151_s1 + $0x110] sm:$0xff]   ;;  %v3270_v52 = vld [vmem:[%s4151_s1 + $0x158] sm:$0xff]   ;;  %v3272_v54 = vld [vmem:[%s4151_s1 + $0x160] sm:$0xff]  }
  0x29   : > { %2872 = vmatpush3.bf16.msra.mxu0 %v3236_v8  ;;  %v3271_v53 = vld [vmem:[%s4151_s1 + $0x118] sm:$0xff]   ;;  %v3273_v55 = vld [vmem:[%s4151_s1 + $0x120] sm:$0xff]   ;;  %v3274_v56 = vld [vmem:[%s4151_s1 + $0x168] sm:$0xff]  }
  0x2a   : > { %2892 = vmatpush3.bf16.msra.mxu1 %v3237_v9  ;;  %2873 = vmatprep.subr.bf16.mxu0 %v3411_v2  ;;  %v613_v45 = vor.u32 %v612_v43, %v608_v42  ;;  %v3281_v57 = vld [vmem:[%s3532_s16] ss:$0 sps:$4 sm:$0xff]   ;;  %v3275_v58 = vld [vmem:[%s4151_s1 + $0x128] sm:$0xff]   ;;  %v3276_v59 = vld [vmem:[%s4151_s1 + $0x170] sm:$0xff]  }
  0x2b   : > { %2893 = vmatprep.subr.bf16.mxu1 %v3411_v2  ;;  %v874_v60 = vshll.u32 %v3281_v57, 16  ;;  %v3277_v61 = vld [vmem:[%s4151_s1 + $0x130] sm:$0xff]   ;;  %v3278_v62 = vld [vmem:[%s4151_s1 + $0x178] sm:$0xff]   ;;  %v3280_v63 = vld [vmem:[%s3532_s16] sm:$0x1e]   ;;  %v872_v0 = vshrl.u32 %v3281_v57, 16 }
  0x2c   : > { %v3279_v3 = vld [vmem:[%s4151_s1 + $0x138] sm:$0xff]   ;;  %v778_v4 = vrot.slane %v3280_v63, 1  ;;  %v3282_v6 = vld [vmem:[%s4151_s1 + $0x180] sm:$0xff]   ;;  %v3284_v8 = vld [vmem:[%s4151_s1 + $0x188] sm:$0xff]  }
  0x2d   : > { %2874 = vmatpush3.bf16.msra.mxu0 %v3238_v10  ;;  %v876_v1 = vrot.slane %v874_v60, 1  ;;  %v3283_v7 = vld [vmem:[%s4151_s1 + $0x1c0] sm:$0xff]   ;;  %v3285_v9 = vld [vmem:[%s4151_s1 + $0x1c8] sm:$0xff]   ;;  %v3286_v10 = vld [vmem:[%s4151_s1 + $0x190] sm:$0xff]  }
  0x2e   : > { %2894 = vmatpush3.bf16.msra.mxu1 %v3239_v11  ;;  %2875 = vmatprep.subr.bf16.mxu0 %v3411_v2  ;;  %v3287_v11 = vld [vmem:[%s4151_s1 + $0x1d0] sm:$0xff]   ;;  %v3289_v13 = vld [vmem:[%s4151_s1 + $0x1d8] sm:$0xff]   ;;  %v3298_v16 = vld [vmem:[%s3532_s16 + $0x8] ss:$0 sps:$4 sm:$0xff]  }
  0x2f   : > { %2895 = vmatprep.subr.bf16.mxu1 %v3411_v2  ;;  %v877_v5 = vor.u32 %v876_v1, %v872_v0  ;;  %v991_v19 = vshll.u32 %v3298_v16, 16  ;;  %v3294_v20 = vld [vmem:[%s4151_s1 + $0x1b0] sm:$0xff]   ;;  %v3307_v36 = vld [vmem:[%s4151_s1 + $0x218] sm:$0xff]   ;;  %v3309_v39 = vld [vmem:[%s4151_s1 + $0x220] sm:$0xff]  }
  0x30   : > { %v3311_v42 = vld [vmem:[%s4151_s1 + $0x228] sm:$0xff]   ;;  %v3323_v57 = vld [vmem:[%s4151_s1 + $0x298] sm:$0xff]   ;;  %v3326_v60 = vld [vmem:[%s4151_s1 + $0x2e0] sm:$0xff]  }
  0x31   : > { %2876 = vmatpush3.bf16.msra.mxu0 %v3240_v14  ;;  %v3290_v14 = vld [vmem:[%s4151_s1 + $0x1a0] sm:$0xff]   ;;  %v3328_v0 = vld [vmem:[%s4151_s1 + $0x2e8] sm:$0xff]   ;;  %v3329_v1 = vld [vmem:[%s4151_s1 + $0x2b0] sm:$0xff]  }
  0x32   : > { %2896 = vmatpush3.bf16.msra.mxu1 %v3241_v15  ;;  %2877 = vmatprep.subr.bf16.mxu0 %v3411_v2  ;;  %v3291_v15 = vld [vmem:[%s4151_s1 + $0x1e0] sm:$0xff]  }
  0x33   : > { %2897 = vmatprep.subr.bf16.mxu1 %v3411_v2 }
  0x35   : > { %2878 = vmatpush3.bf16.msra.mxu0 %v3242_v17  ;;  %v3292_v17 = vld [vmem:[%s4151_s1 + $0x1a8] sm:$0xff]  }
  0x36   : > { %2898 = vmatpush3.bf16.msra.mxu1 %v3243_v18  ;;  %2879 = vmatprep.subr.bf16.mxu0 %v3411_v2  ;;  %v3293_v18 = vld [vmem:[%s4151_s1 + $0x1e8] sm:$0xff]  }
  0x37   : > { %2899 = vmatprep.subr.bf16.mxu1 %v3411_v2 }
  0x39   : > { %2880 = vmatpush3.bf16.msra.mxu0 %v3244_v21  ;;  %v3295_v21 = vld [vmem:[%s4151_s1 + $0x1f0] sm:$0xff]  }
  0x3a   : > { %2900 = vmatpush3.bf16.msra.mxu1 %v3245_v22  ;;  %2905 = vmatprep.subr.bf16.mxu0 %v3411_v2  ;;  %v3296_v22 = vld [vmem:[%s4151_s1 + $0x1b8] sm:$0xff]  }
  0x3b   : > { %2925 = vmatprep.subr.bf16.mxu1 %v3411_v2 }
  0x3c   : > { %2882 = vmatmul.mubr.bf16.vlgmr.msra.gmra.mrb[0].mxu0 %v298_v23  ;;  %v989_v23 = vshrl.u32 %v3298_v16, 16  ;;  %v3340_v16 = vld [vmem:[%s4151_s1 + $0x358] sm:$0xff]  }
  0x3d   : > { %2902 = vmatmul.mubr.bf16.vlgmr.msra.gmra.mrb[0].mxu1 %v255_v12  ;;  %2906 = vmatpush3.bf16.msra.mxu0 %v3247_v24  ;;  %v3288_v12 = vld [vmem:[%s4151_s1 + $0x198] sm:$0xff]   ;;  %v993_v24 = vrot.slane %v991_v19, 1  ;;  %v3343_v19 = vld [vmem:[%s4151_s1 + $0x320] sm:$0xff]  }
  0x3e   : > { %2926 = vmatpush3.bf16.msra.mxu1 %v3248_v25  ;;  %2907 = vmatprep.subr.bf16.mxu0 %v3411_v2  ;;  %v3299_v25 = vld [vmem:[%s3532_s16 + $0x8] sm:$0x1e]  }
  0x3f   : > { %2927 = vmatprep.subr.bf16.mxu1 %v3411_v2  ;;  %2921 = vmatprep.mubr.msk.bf16.mxu0 %vm3412_vm1, %v3411_v2 }
  0x40   : > { %2941 = vmatprep.mubr.msk.bf16.mxu1 %vm3412_vm1, %v3411_v2 }
  0x41   : > { %2908 = vmatpush3.bf16.msra.mxu0 %v3249_v26  ;;  %v3297_v26 = vld [vmem:[%s4151_s1 + $0x1f8] sm:$0xff]  }
  0x42   : > { %2928 = vmatpush3.bf16.msra.mxu1 %v3250_v27  ;;  %2909 = vmatprep.subr.bf16.mxu0 %v3411_v2  ;;  %v994_v27 = vor.u32 %v993_v24, %v989_v23  ;;  %v3346_v23 = vld [vmem:[%s4151_s1 + $0x370] sm:$0xff]  }
  0x43   : > { %2929 = vmatprep.subr.bf16.mxu1 %v3411_v2 }
  0x45   : > { %2910 = vmatpush3.bf16.msra.mxu0 %v3251_v28  ;;  %v1109_v28 = vrot.slane %v3299_v25, 1  ;;  %v3347_v25 = vld [vmem:[%s4151_s1 + $0x330] sm:$0xff]  }
  0x46   : > { %2930 = vmatpush3.bf16.msra.mxu1 %v3252_v29  ;;  %2911 = vmatprep.subr.bf16.mxu0 %v3411_v2  ;;  %v3300_v29 = vld [vmem:[%s4151_s1 + $0x240] sm:$0xff]  }
  0x47   : > { %2931 = vmatprep.subr.bf16.mxu1 %v3411_v2 }
  0x49   : > { %2912 = vmatpush3.bf16.msra.mxu0 %v3253_v30  ;;  %v3301_v30 = vld [vmem:[%s4151_s1 + $0x200] sm:$0xff]  }
  0x4a   : > { %2932 = vmatpush3.bf16.msra.mxu1 %v3254_v31  ;;  %2913 = vmatprep.subr.bf16.mxu0 %v3411_v2  ;;  %v3302_v31 = vld [vmem:[%s4151_s1 + $0x248] sm:$0xff]  }
  0x4b   : > { %2933 = vmatprep.subr.bf16.mxu1 %v3411_v2 }
  0x4d   : > { %2914 = vmatpush3.bf16.msra.mxu0 %v3255_v32  ;;  %v3303_v32 = vld [vmem:[%s4151_s1 + $0x208] sm:$0xff]  }
  0x4e   : > { %2934 = vmatpush3.bf16.msra.mxu1 %v3256_v33  ;;  %2915 = vmatprep.subr.bf16.mxu0 %v3411_v2  ;;  %v3304_v33 = vld [vmem:[%s4151_s1 + $0x250] sm:$0xff]  }
  0x4f   : > { %2935 = vmatprep.subr.bf16.mxu1 %v3411_v2 }
  0x51   : > { %2916 = vmatpush3.bf16.msra.mxu0 %v3257_v35  ;;  %v3306_v35 = vld [vmem:[%s4151_s1 + $0x258] sm:$0xff]  }
  0x52   : > { %2936 = vmatpush3.bf16.msra.mxu1 %v3258_v37  ;;  %2917 = vmatprep.subr.bf16.mxu0 %v3411_v2  ;;  %v3308_v37 = vld [vmem:[%s4151_s1 + $0x260] sm:$0xff]  }
  0x53   : > { %2937 = vmatprep.subr.bf16.mxu1 %v3411_v2 }
  0x55   : > { %2918 = vmatpush3.bf16.msra.mxu0 %v3259_v38  ;;  %v2509_v38 = vld [vmem:[%s3532_s16 + $0x8] sm:$0xf] }
  0x56   : > { %2938 = vmatpush3.bf16.msra.mxu1 %v3260_v40  ;;  %2919 = vmatprep.subr.bf16.mxu0 %v3411_v2  ;;  %v2542_v40 = vcombine.low %v2509_v38, %v2509_v38 }
  0x57   : > { %2939 = vmatprep.subr.bf16.mxu1 %v3411_v2 }
  0x58   : > { %v1271_v43 = vshll.u32 %v2542_v40, 16 }
  0x59   : > { %2920 = vmatpush3.bf16.msra.mxu0 %v3261_v41  ;;  %v3310_v41 = vld [vmem:[%s4151_s1 + $0x268] sm:$0xff]  }
  0x5a   : > { %2940 = vmatpush3.bf16.msra.mxu1 %v3262_v44  ;;  %2945 = vmatprep.subr.bf16.mxu0 %v3411_v2  ;;  %v3312_v44 = vld [vmem:[%s4151_s1 + $0x270] sm:$0xff]  }
  0x5b   : > { %2965 = vmatprep.subr.bf16.mxu1 %v3411_v2 }
  0x5c   : > { %2922 = vmatmul.mubr.bf16.vlgmr.msra.gmra.mrb[4].mxu0 %v2354_v34  ;;  %v3305_v34 = vld [vmem:[%s4151_s1 + $0x210] sm:$0xff]  }
  0x5d   : > { %2942 = vmatmul.mubr.bf16.vlgmr.msra.gmra.mrb[4].mxu1 %v613_v45  ;;  %2946 = vmatpush3.bf16.msra.mxu0 %v3264_v46  ;;  %v3313_v45 = vld [vmem:[%s4151_s1 + $0x230] sm:$0xff]   ;;  %v1269_v46 = vshrl.u32 %v2542_v40, 16  ;;  %v3359_v40 = vld [vmem:[%s4151_s1 + $0x3d8] sm:$0xff]  }
  0x5e   : > { %2966 = vmatpush3.bf16.msra.mxu1 %v3265_v47  ;;  %2947 = vmatprep.subr.bf16.mxu0 %v3411_v2  ;;  %v1273_v47 = vrot.slane %v1271_v43, 1  ;;  %v3368_v43 = vld [vmem:[%s3532_s16 + $0x10] ss:$0 sps:$4 sm:$0xff]  }
  0x5f   : > { %2967 = vmatprep.subr.bf16.mxu1 %v3411_v2  ;;  %2961 = vmatprep.mubr.msk.bf16.mxu0 %vm3412_vm1, %v3411_v2 }
  0x60   : > { %2981 = vmatprep.mubr.msk.bf16.mxu1 %vm3412_vm1, %v3411_v2 }
  0x61   : > { %2948 = vmatpush3.bf16.msra.mxu0 %v3266_v48  ;;  %v3314_v48 = vld [vmem:[%s4151_s1 + $0x278] sm:$0xff]  }
  0x62   : > { %2968 = vmatpush3.bf16.msra.mxu1 %v3267_v49  ;;  %2949 = vmatprep.subr.bf16.mxu0 %v3411_v2  ;;  %v3315_v49 = vld [vmem:[%s4151_s1 + $0x238] sm:$0xff]  }
  0x63   : > { %2969 = vmatprep.subr.bf16.mxu1 %v3411_v2 }
  0x65   : > { %2950 = vmatpush3.bf16.msra.mxu0 %v3268_v50  ;;  %v1274_v50 = vor.u32 %v1273_v47, %v1269_v46 }
  0x66   : > { %2970 = vmatpush3.bf16.msra.mxu1 %v3269_v51  ;;  %2951 = vmatprep.subr.bf16.mxu0 %v3411_v2  ;;  %v3317_v51 = vld [vmem:[%s4151_s1 + $0x280] sm:$0xff]  }
  0x67   : > { %2971 = vmatprep.subr.bf16.mxu1 %v3411_v2 }
  0x69   : > { %2952 = vmatpush3.bf16.msra.mxu0 %v3270_v52  ;;  %v3318_v52 = vld [vmem:[%s4151_s1 + $0x2c0] sm:$0xff]  }
  0x6a   : > { %2972 = vmatpush3.bf16.msra.mxu1 %v3271_v53  ;;  %2953 = vmatprep.subr.bf16.mxu0 %v3411_v2  ;;  %v3319_v53 = vld [vmem:[%s4151_s1 + $0x288] sm:$0xff]  }
  0x6b   : > { %2973 = vmatprep.subr.bf16.mxu1 %v3411_v2 }
  0x6d   : > { %2954 = vmatpush3.bf16.msra.mxu0 %v3272_v54  ;;  %v3320_v54 = vld [vmem:[%s4151_s1 + $0x2c8] sm:$0xff]  }
  0x6e   : > { %2974 = vmatpush3.bf16.msra.mxu1 %v3273_v55  ;;  %2955 = vmatprep.subr.bf16.mxu0 %v3411_v2  ;;  %v3321_v55 = vld [vmem:[%s4151_s1 + $0x290] sm:$0xff]  }
  0x6f   : > { %2975 = vmatprep.subr.bf16.mxu1 %v3411_v2 }
  0x71   : > { %2956 = vmatpush3.bf16.msra.mxu0 %v3274_v56  ;;  %v3322_v56 = vld [vmem:[%s4151_s1 + $0x2d0] sm:$0xff]  }
  0x72   : > { %2976 = vmatpush3.bf16.msra.mxu1 %v3275_v58  ;;  %2957 = vmatprep.subr.bf16.mxu0 %v3411_v2  ;;  %v3324_v58 = vld [vmem:[%s4151_s1 + $0x2d8] sm:$0xff]  }
  0x73   : > { %2977 = vmatprep.subr.bf16.mxu1 %v3411_v2 }
  0x75   : > { %2958 = vmatpush3.bf16.msra.mxu0 %v3276_v59  ;;  %v3325_v59 = vld [vmem:[%s4151_s1 + $0x2a0] sm:$0xff]  }
  0x76   : > { %2978 = vmatpush3.bf16.msra.mxu1 %v3277_v61  ;;  %2959 = vmatprep.subr.bf16.mxu0 %v3411_v2  ;;  %v2560_v61 = vld [vmem:[%s3532_s16 + $0x10] sm:$0xf] }
  0x77   : > { %2979 = vmatprep.subr.bf16.mxu1 %v3411_v2  ;;  %v2601_v63 = vcombine.low %v2560_v61, %v2560_v61 }
  0x79   : > { %2960 = vmatpush3.bf16.msra.mxu0 %v3278_v62  ;;  %v3327_v62 = vld [vmem:[%s4151_s1 + $0x2a8] sm:$0xff]  }
  0x7a   : > { %2980 = vmatpush3.bf16.msra.mxu1 %v3279_v3  ;;  %2985 = vmatprep.subr.bf16.mxu0 %v3411_v2  ;;  %v1586_v3 = vshll.u32 %v2601_v63, 16 }
  0x7b   : > { %3005 = vmatprep.subr.bf16.mxu1 %v3411_v2 }
  0x7c   : > { %2962 = vmatmul.mubr.bf16.vlgmr.msra.gmra.mrb[8].mxu0 %v778_v4  ;;  %v3330_v4 = vld [vmem:[%s4151_s1 + $0x2f0] sm:$0xff]  }
  0x7d   : > { %2982 = vmatmul.mubr.bf16.vlgmr.msra.gmra.mrb[8].mxu1 %v877_v5  ;;  %2986 = vmatpush3.bf16.msra.mxu0 %v3282_v6  ;;  %v3331_v5 = vld [vmem:[%s4151_s1 + $0x2b8] sm:$0xff]   ;;  %v1584_v6 = vshrl.u32 %v2601_v63, 16 }
  0x7e   : > { %3006 = vmatpush3.bf16.msra.mxu1 %v3283_v7  ;;  %2987 = vmatprep.subr.bf16.mxu0 %v3411_v2  ;;  %v1588_v7 = vrot.slane %v1586_v3, 1 }
  0x7f   : > { %3007 = vmatprep.subr.bf16.mxu1 %v3411_v2  ;;  %3001 = vmatprep.mubr.msk.bf16.mxu0 %vm3412_vm1, %v3411_v2 }
  0x80   : > { %3021 = vmatprep.mubr.msk.bf16.mxu1 %vm3412_vm1, %v3411_v2 }
  0x81   : > { %2988 = vmatpush3.bf16.msra.mxu0 %v3284_v8  ;;  %v3332_v8 = vld [vmem:[%s4151_s1 + $0x2f8] sm:$0xff]  }
  0x82   : > { %3008 = vmatpush3.bf16.msra.mxu1 %v3285_v9  ;;  %2989 = vmatprep.subr.bf16.mxu0 %v3411_v2  ;;  %v1589_v9 = vor.u32 %v1588_v7, %v1584_v6  ;;  %v4057_v6 = vld [vmem:[%s4152_s2] ss:$0 sm:$0xff] }
  0x83   : > { %3009 = vmatprep.subr.bf16.mxu1 %v3411_v2 }
  0x85   : > { %2990 = vmatpush3.bf16.msra.mxu0 %v3286_v10  ;;  %v3334_v10 = vld [vmem:[%s4151_s1 + $0x340] sm:$0xff]  }
  0x86   : > { %3010 = vmatpush3.bf16.msra.mxu1 %v3287_v11  ;;  %2991 = vmatprep.subr.bf16.mxu0 %v3411_v2  ;;  %v3335_v11 = vld [vmem:[%s4151_s1 + $0x300] sm:$0xff]  }
  0x87   : > { %3011 = vmatprep.subr.bf16.mxu1 %v3411_v2 }
  0x89   : > { %2992 = vmatpush3.bf16.msra.mxu0 %v3288_v12  ;;  %v3336_v12 = vld [vmem:[%s4151_s1 + $0x348] sm:$0xff]  }
  0x8a   : > { %3012 = vmatpush3.bf16.msra.mxu1 %v3289_v13  ;;  %2993 = vmatprep.subr.bf16.mxu0 %v3411_v2  ;;  %v3337_v13 = vld [vmem:[%s4151_s1 + $0x308] sm:$0xff]  }
  0x8b   : > { %3013 = vmatprep.subr.bf16.mxu1 %v3411_v2 }
  0x8d   : > { %2994 = vmatpush3.bf16.msra.mxu0 %v3290_v14  ;;  %v3338_v14 = vld [vmem:[%s4151_s1 + $0x350] sm:$0xff]  }
  0x8e   : > { %3014 = vmatpush3.bf16.msra.mxu1 %v3291_v15  ;;  %2995 = vmatprep.subr.bf16.mxu0 %v3411_v2  ;;  %v3339_v15 = vld [vmem:[%s4151_s1 + $0x310] sm:$0xff]  }
  0x8f   : > { %3015 = vmatprep.subr.bf16.mxu1 %v3411_v2 }
  0x91   : > { %2996 = vmatpush3.bf16.msra.mxu0 %v3292_v17  ;;  %v3341_v17 = vld [vmem:[%s4151_s1 + $0x318] sm:$0xff]  }
  0x92   : > { %3016 = vmatpush3.bf16.msra.mxu1 %v3293_v18  ;;  %2997 = vmatprep.subr.bf16.mxu0 %v3411_v2  ;;  %v3342_v18 = vld [vmem:[%s4151_s1 + $0x360] sm:$0xff]  }
  0x93   : > { %3017 = vmatprep.subr.bf16.mxu1 %v3411_v2 }
  0x95   : > { %2998 = vmatpush3.bf16.msra.mxu0 %v3294_v20  ;;  %v3344_v20 = vld [vmem:[%s4151_s1 + $0x368] sm:$0xff]  }
  0x96   : > { %3018 = vmatpush3.bf16.msra.mxu1 %v3295_v21  ;;  %2999 = vmatprep.subr.bf16.mxu0 %v3411_v2  ;;  %v3351_v21 = vld [vmem:[%s3532_s16 + $0x8] ss:$0 sps:$4 sm:$0xff]  }
  0x97   : > { %3019 = vmatprep.subr.bf16.mxu1 %v3411_v2  ;;  %v1848_v24 = vshll.u32 %v3351_v21, 16 }
  0x99   : > { %3000 = vmatpush3.bf16.msra.mxu0 %v3296_v22  ;;  %v3345_v22 = vld [vmem:[%s4151_s1 + $0x328] sm:$0xff]  }
  0x9a   : > { %3020 = vmatpush3.bf16.msra.mxu1 %v3297_v26  ;;  %3025 = vmatprep.subr.bf16.mxu0 %v3411_v2  ;;  %v3350_v26 = vld [vmem:[%s3532_s16 + $0x8] sm:$0x1e]  }
  0x9b   : > { %3045 = vmatprep.subr.bf16.mxu1 %v3411_v2 }
  0x9c   : > { %3002 = vmatmul.mubr.bf16.vlgmr.msra.gmra.mrb[12].mxu0 %v994_v27  ;;  %v3348_v27 = vld [vmem:[%s4151_s1 + $0x378] sm:$0xff]  }
  0x9d   : > { %3022 = vmatmul.mubr.bf16.vlgmr.msra.gmra.mrb[12].mxu1 %v1109_v28  ;;  %3026 = vmatpush3.bf16.msra.mxu0 %v3300_v29  ;;  %v1846_v28 = vshrl.u32 %v3351_v21, 16  ;;  %v1850_v29 = vrot.slane %v1848_v24, 1 }
  0x9e   : > { %3046 = vmatpush3.bf16.msra.mxu1 %v3301_v30  ;;  %3027 = vmatprep.subr.bf16.mxu0 %v3411_v2  ;;  %v3349_v30 = vld [vmem:[%s4151_s1 + $0x338] sm:$0xff]  }
  0x9f   : > { %3047 = vmatprep.subr.bf16.mxu1 %v3411_v2  ;;  %3041 = vmatprep.mubr.msk.bf16.mxu0 %vm3412_vm1, %v3411_v2 }
  0xa0   : > { %3061 = vmatprep.mubr.msk.bf16.mxu1 %vm3412_vm1, %v3411_v2 }
  0xa1   : > { %3028 = vmatpush3.bf16.msra.mxu0 %v3302_v31  ;;  %v1752_v31 = vrot.slane %v3350_v26, 1 }
  0xa2   : > { %3048 = vmatpush3.bf16.msra.mxu1 %v3303_v32  ;;  %3029 = vmatprep.subr.bf16.mxu0 %v3411_v2  ;;  %v1851_v32 = vor.u32 %v1850_v29, %v1846_v28  ;;  %v725_v28 = vld [vmem:[%s4155_s5] sm:$0x1] }
  0xa3   : > { %3049 = vmatprep.subr.bf16.mxu1 %v3411_v2 }
  0xa5   : > { %3030 = vmatpush3.bf16.msra.mxu0 %v3304_v33  ;;  %v3352_v33 = vld [vmem:[%s4151_s1 + $0x380] sm:$0xff]  }
  0xa6   : > { %3050 = vmatpush3.bf16.msra.mxu1 %v3305_v34  ;;  %3031 = vmatprep.subr.bf16.mxu0 %v3411_v2  ;;  %v3353_v34 = vld [vmem:[%s4151_s1 + $0x3c0] sm:$0xff]  }
  0xa7   : > { %3051 = vmatprep.subr.bf16.mxu1 %v3411_v2 }
  0xa9   : > { %3032 = vmatpush3.bf16.msra.mxu0 %v3306_v35  ;;  %v3354_v35 = vld [vmem:[%s4151_s1 + $0x388] sm:$0xff]  }
  0xaa   : > { %3052 = vmatpush3.bf16.msra.mxu1 %v3307_v36  ;;  %3033 = vmatprep.subr.bf16.mxu0 %v3411_v2  ;;  %v3355_v36 = vld [vmem:[%s4151_s1 + $0x3c8] sm:$0xff]  }
  0xab   : > { %3053 = vmatprep.subr.bf16.mxu1 %v3411_v2 }
  0xad   : > { %3034 = vmatpush3.bf16.msra.mxu0 %v3308_v37  ;;  %v3356_v37 = vld [vmem:[%s4151_s1 + $0x390] sm:$0xff]  }
  0xae   : > { %3054 = vmatpush3.bf16.msra.mxu1 %v3309_v39  ;;  %3035 = vmatprep.subr.bf16.mxu0 %v3411_v2  ;;  %v3358_v39 = vld [vmem:[%s4151_s1 + $0x398] sm:$0xff]  }
  0xaf   : > { %3055 = vmatprep.subr.bf16.mxu1 %v3411_v2 }
  0xb1   : > { %3036 = vmatpush3.bf16.msra.mxu0 %v3310_v41  ;;  %v3360_v41 = vld [vmem:[%s4151_s1 + $0x3a0] sm:$0xff]  }
  0xb2   : > { %3056 = vmatpush3.bf16.msra.mxu1 %v3311_v42  ;;  %3037 = vmatprep.subr.bf16.mxu0 %v3411_v2  ;;  %v3361_v42 = vld [vmem:[%s4151_s1 + $0x3e0] sm:$0xff]  }
  0xb3   : > { %3057 = vmatprep.subr.bf16.mxu1 %v3411_v2 }
  0xb5   : > { %3038 = vmatpush3.bf16.msra.mxu0 %v3312_v44  ;;  %v3362_v44 = vld [vmem:[%s4151_s1 + $0x3a8] sm:$0xff]  }
  0xb6   : > { %3058 = vmatpush3.bf16.msra.mxu1 %v3313_v45  ;;  %3039 = vmatprep.subr.bf16.mxu0 %v3411_v2  ;;  %v3363_v45 = vld [vmem:[%s4151_s1 + $0x3e8] sm:$0xff]  }
  0xb7   : > { %3059 = vmatprep.subr.bf16.mxu1 %v3411_v2 }
  0xb9   : > { %3040 = vmatpush3.bf16.msra.mxu0 %v3314_v48 }
  0xba   : > { %3060 = vmatpush3.bf16.msra.mxu1 %v3315_v49  ;;  %3065 = vmatprep.subr.bf16.mxu0 %v3411_v2  ;;  %v1965_v49 = vshll.u32 %v3368_v43, 16 }
  0xbb   : > { %3085 = vmatprep.subr.bf16.mxu1 %v3411_v2 }
  0xbc   : > { %3042 = vmatmul.mubr.bf16.vlgmr.msra.gmra.mrb[16].mxu0 %v1274_v50 }
  0xbd   : > { %3062 = vmatmul.mubr.bf16.vlgmr.msra.gmra.mrb[16].mxu1 %v2509_v38  ;;  %3066 = vmatpush3.bf16.msra.mxu0 %v3317_v51  ;;  %v3357_v38 = vld [vmem:[%s4151_s1 + $0x3d0] sm:$0xff]  }
  0xbe   : > { %3086 = vmatpush3.bf16.msra.mxu1 %v3318_v52  ;;  %3067 = vmatprep.subr.bf16.mxu0 %v3411_v2 }
  0xbf   : > { %3087 = vmatprep.subr.bf16.mxu1 %v3411_v2  ;;  %3081 = vmatprep.mubr.msk.bf16.mxu0 %vm3412_vm1, %v3411_v2 }
  0xc0   : > { %3101 = vmatprep.mubr.msk.bf16.mxu1 %vm3412_vm1, %v3411_v2 }
  0xc1   : > { %3068 = vmatpush3.bf16.msra.mxu0 %v3319_v53  ;;  %v3364_v53 = vld [vmem:[%s4151_s1 + $0x3b0] sm:$0xff]  }
  0xc2   : > { %3088 = vmatpush3.bf16.msra.mxu1 %v3320_v54  ;;  %3069 = vmatprep.subr.bf16.mxu0 %v3411_v2 }
  0xc3   : > { %3089 = vmatprep.subr.bf16.mxu1 %v3411_v2 }
  0xc5   : > { %3070 = vmatpush3.bf16.msra.mxu0 %v3321_v55 }
  0xc6   : > { %3090 = vmatpush3.bf16.msra.mxu1 %v3322_v56  ;;  %3071 = vmatprep.subr.bf16.mxu0 %v3411_v2  ;;  %v3365_v56 = vld [vmem:[%s4151_s1 + $0x3f0] sm:$0xff]  }
  0xc7   : > { %3091 = vmatprep.subr.bf16.mxu1 %v3411_v2 }
  0xc9   : > { %3072 = vmatpush3.bf16.msra.mxu0 %v3323_v57 }
  0xca   : > { %3092 = vmatpush3.bf16.msra.mxu1 %v3324_v58  ;;  %3073 = vmatprep.subr.bf16.mxu0 %v3411_v2  ;;  %v1963_v58 = vshrl.u32 %v3368_v43, 16 }
  0xcb   : > { %3093 = vmatprep.subr.bf16.mxu1 %v3411_v2 }
  0xcd   : > { %3074 = vmatpush3.bf16.msra.mxu0 %v3325_v59  ;;  %v1967_v59 = vrot.slane %v1965_v49, 1 }
  0xce   : > { %3094 = vmatpush3.bf16.msra.mxu1 %v3326_v60  ;;  %3075 = vmatprep.subr.bf16.mxu0 %v3411_v2  ;;  %v3366_v60 = vld [vmem:[%s4151_s1 + $0x3b8] sm:$0xff]  }
  0xcf   : > { %3095 = vmatprep.subr.bf16.mxu1 %v3411_v2  ;;  %v1968_v63 = vor.u32 %v1967_v59, %v1963_v58 }
  0xd1   : > { %3076 = vmatpush3.bf16.msra.mxu0 %v3327_v62  ;;  %v3367_v62 = vld [vmem:[%s4151_s1 + $0x3f8] sm:$0xff]  }
  0xd2   : > { %3096 = vmatpush3.bf16.msra.mxu1 %v3328_v0  ;;  %3077 = vmatprep.subr.bf16.mxu0 %v3411_v2 }
  0xd3   : > { %3097 = vmatprep.subr.bf16.mxu1 %v3411_v2 }
  0xd5   : > { %3078 = vmatpush3.bf16.msra.mxu0 %v3329_v1 }
  0xd6   : > { %3098 = vmatpush3.bf16.msra.mxu1 %v3330_v4  ;;  %3079 = vmatprep.subr.bf16.mxu0 %v3411_v2 }
  0xd7   : > { %3099 = vmatprep.subr.bf16.mxu1 %v3411_v2 }
  0xd9   : > { %3080 = vmatpush3.bf16.msra.mxu0 %v3331_v5 }
  0xda   : > { %3100 = vmatpush3.bf16.msra.mxu1 %v3332_v8  ;;  %3105 = vmatprep.subr.bf16.mxu0 %v3411_v2 }
  0xdb   : > { %3125 = vmatprep.subr.bf16.mxu1 %v3411_v2 }
  0xdc   : > { %3082 = vmatmul.mubr.bf16.vlgmr.msra.gmra.mrb[20].mxu0 %v2560_v61  ;;  %v3369_v61 = vld [vmem:[%s3532_s16 + $0x10] sm:$0x1e]  }
  0xdd   : > { %3102 = vmatmul.mubr.bf16.vlgmr.msra.gmra.mrb[20].mxu1 %v1589_v9  ;;  %3106 = vmatpush3.bf16.msra.mxu0 %v3334_v10  ;;  %v2083_v0 = vrot.slane %v3369_v61, 1 }
  0xde   : > { %3126 = vmatpush3.bf16.msra.mxu1 %v3335_v11  ;;  %3107 = vmatprep.subr.bf16.mxu0 %v3411_v2 }
  0xdf   : > { %3127 = vmatprep.subr.bf16.mxu1 %v3411_v2  ;;  %3121 = vmatprep.mubr.msk.bf16.mxu0 %vm3412_vm1, %v3411_v2 }
  0xe0   : > { %3141 = vmatprep.mubr.msk.bf16.mxu1 %vm3412_vm1, %v3411_v2 }
  0xe1   : > { %3108 = vmatpush3.bf16.msra.mxu0 %v3336_v12 }
  0xe2   : > { %3128 = vmatpush3.bf16.msra.mxu1 %v3337_v13  ;;  %3109 = vmatprep.subr.bf16.mxu0 %v3411_v2 }
  0xe3   : > { %3129 = vmatprep.subr.bf16.mxu1 %v3411_v2 }
  0xe5   : > { %3110 = vmatpush3.bf16.msra.mxu0 %v3338_v14 }
  0xe6   : > { %3130 = vmatpush3.bf16.msra.mxu1 %v3339_v15  ;;  %3111 = vmatprep.subr.bf16.mxu0 %v3411_v2 }
  0xe7   : > { %3131 = vmatprep.subr.bf16.mxu1 %v3411_v2 }
  0xe9   : > { %3112 = vmatpush3.bf16.msra.mxu0 %v3340_v16 }
  0xea   : > { %3132 = vmatpush3.bf16.msra.mxu1 %v3341_v17  ;;  %3113 = vmatprep.subr.bf16.mxu0 %v3411_v2 }
  0xeb   : > { %3133 = vmatprep.subr.bf16.mxu1 %v3411_v2 }
  0xed   : > { %3114 = vmatpush3.bf16.msra.mxu0 %v3342_v18 }
  0xee   : > { %3134 = vmatpush3.bf16.msra.mxu1 %v3343_v19  ;;  %3115 = vmatprep.subr.bf16.mxu0 %v3411_v2 }
  0xef   : > { %3135 = vmatprep.subr.bf16.mxu1 %v3411_v2 }
  0xf1   : > { %3116 = vmatpush3.bf16.msra.mxu0 %v3344_v20 }
  0xf2   : > { %3136 = vmatpush3.bf16.msra.mxu1 %v3345_v22  ;;  %3117 = vmatprep.subr.bf16.mxu0 %v3411_v2 }
  0xf3   : > { %3137 = vmatprep.subr.bf16.mxu1 %v3411_v2 }
  0xf5   : > { %3118 = vmatpush3.bf16.msra.mxu0 %v3346_v23 }
  0xf6   : > { %3138 = vmatpush3.bf16.msra.mxu1 %v3347_v25  ;;  %3119 = vmatprep.subr.bf16.mxu0 %v3411_v2  ;;  %v714_v25 = vld [vmem:[%s4154_s4] sm:$0x1] }
  0xf7   : > { %3139 = vmatprep.subr.bf16.mxu1 %v3411_v2 }
  0xf9   : > { %3120 = vmatpush3.bf16.msra.mxu0 %v3348_v27 }
  0xfa   : > { %3140 = vmatpush3.bf16.msra.mxu1 %v3349_v30  ;;  %3145 = vmatprep.subr.bf16.mxu0 %v3411_v2 }
  0xfb   : > { %3165 = vmatprep.subr.bf16.mxu1 %v3411_v2 }
  0xfc   : > { %3122 = vmatmul.mubr.bf16.vlgmr.msra.gmra.mrb[24].mxu0 %v1752_v31 }
  0xfd   : > { %3142 = vmatmul.mubr.bf16.vlgmr.msra.gmra.mrb[24].mxu1 %v1851_v32  ;;  %3146 = vmatpush3.bf16.msra.mxu0 %v3352_v33 }
  0xfe   : > { %3166 = vmatpush3.bf16.msra.mxu1 %v3353_v34  ;;  %3147 = vmatprep.subr.bf16.mxu0 %v3411_v2 }
  0xff   : > { %3167 = vmatprep.subr.bf16.mxu1 %v3411_v2  ;;  %3161 = vmatprep.mubr.msk.bf16.mxu0 %vm3412_vm1, %v3411_v2 }
 0x100   : > { %3181 = vmatprep.mubr.msk.bf16.mxu1 %vm3412_vm1, %v3411_v2 }
 0x101   : > { %3148 = vmatpush3.bf16.msra.mxu0 %v3354_v35 }
 0x102   : > { %3168 = vmatpush3.bf16.msra.mxu1 %v3355_v36  ;;  %3149 = vmatprep.subr.bf16.mxu0 %v3411_v2 }
 0x103   : > { %3169 = vmatprep.subr.bf16.mxu1 %v3411_v2 }
 0x105   : > { %3150 = vmatpush3.bf16.msra.mxu0 %v3356_v37 }
 0x106   : > { %3170 = vmatpush3.bf16.msra.mxu1 %v3357_v38  ;;  %3151 = vmatprep.subr.bf16.mxu0 %v3411_v2 }
 0x107   : > { %3171 = vmatprep.subr.bf16.mxu1 %v3411_v2 }
 0x109   : > { %3152 = vmatpush3.bf16.msra.mxu0 %v3358_v39 }
 0x10a   : > { %3172 = vmatpush3.bf16.msra.mxu1 %v3359_v40  ;;  %3153 = vmatprep.subr.bf16.mxu0 %v3411_v2 }
 0x10b   : > { %3173 = vmatprep.subr.bf16.mxu1 %v3411_v2 }
 0x10d   : > { %3154 = vmatpush3.bf16.msra.mxu0 %v3360_v41 }
 0x10e   : > { %3174 = vmatpush3.bf16.msra.mxu1 %v3361_v42  ;;  %3155 = vmatprep.subr.bf16.mxu0 %v3411_v2 }
 0x10f   : > { %v382_v46 = vpop.f32.mrb[0].mxu0  ;;  %3175 = vmatprep.subr.bf16.mxu1 %v3411_v2 }
 0x110   : > { %v470_v47 = vpop.f32.mrb[0].mxu1  ;;  %v2883_v48 = vpop.f32.mrb[1].mxu0 }
 0x111   : > { %v471_v50 = vadd.f32 %v470_v47, %v382_v46  ;;  %v2903_v51 = vpop.f32.mrb[1].mxu1  ;;  %v385_v52 = vpop.f32.mrb[2].mxu0  ;;  %3156 = vmatpush3.bf16.msra.mxu0 %v3362_v44 }
 0x112   : > { %v473_v54 = vpop.f32.mrb[2].mxu1  ;;  %3176 = vmatpush3.bf16.msra.mxu1 %v3363_v45  ;;  %v2884_v55 = vpop.f32.mrb[3].mxu0  ;;  %3157 = vmatprep.subr.bf16.mxu0 %v3411_v2 }
 0x113   : > { %v2904_v57 = vpop.f32.mrb[3].mxu1  ;;  %3177 = vmatprep.subr.bf16.mxu1 %v3411_v2 }
 0x115   : > { %3158 = vmatpush3.bf16.msra.mxu0 %v3364_v53 }
 0x116   : > { %3178 = vmatpush3.bf16.msra.mxu1 %v3365_v56  ;;  %3159 = vmatprep.subr.bf16.mxu0 %v3411_v2 }
 0x117   : > { %3179 = vmatprep.subr.bf16.mxu1 %v3411_v2 }
 0x119   : > { %3160 = vmatpush3.bf16.msra.mxu0 %v3366_v60 }
 0x11a   : > { %3180 = vmatpush3.bf16.msra.mxu1 %v3367_v62 }
 0x11c   : > { %3162 = vmatmul.mubr.bf16.vlgmr.msra.gmra.mrb[28].mxu0 %v1968_v63 }
 0x11d   : > { %3182 = vmatmul.mubr.bf16.vlgmr.msra.gmra.mrb[28].mxu1 %v2083_v0 }
 0x12f   : > { %v580_v1 = vpop.f32.mrb[4].mxu0 }
 0x130   : > { %v586_v3 = vadd.f32 %v580_v1, %v471_v50  ;;  %v697_v4 = vpop.f32.mrb[4].mxu1  ;;  %v2923_v5 = vpop.f32.mrb[5].mxu0 }
 0x131   : > { %v2943_v7 = vpop.f32.mrb[5].mxu1  ;;  %v583_v8 = vpop.f32.mrb[6].mxu0 }
 0x132   : > { %v703_v9 = vadd.f32 %v697_v4, %v586_v3  ;;  %v700_v2 = vpop.f32.mrb[6].mxu1  ;;  %v2924_v10 = vpop.f32.mrb[7].mxu0 }
 0x133   : > { %v2944_v11 = vpop.f32.mrb[7].mxu1 }
 0x134   : > { %v711_v12 = vadd.f32 %v4057_v6, %v703_v9 }
 0x136   : > { %713 = vst.msk [vmem:[%s3486_s11] sm:$0x7f] %vm712_vm2, %v711_v12  ;;  %v715_v13 = vsel %vm712_vm2, %v711_v12, 0.0  ;;  %v726_v14 = vmul.f32 %v711_v12, %v711_v12 }
 0x137   : > { %v716_v15 = vrot.slane %v715_v13, 4 }
 0x138   : > { %v727_v16 = vsel %vm712_vm2, %v726_v14, 0.0 }
 0x139   : > { %v717_v17 = vadd.f32 %v716_v15, %v715_v13  ;;  %v728_v18 = vrot.slane %v727_v16, 4 }
 0x13b   : > { %v718_v19 = vrot.slane %v717_v17, 2  ;;  %v729_v20 = vadd.f32 %v728_v18, %v727_v16 }
 0x13d   : > { %v719_v21 = vadd.f32 %v718_v19, %v717_v17  ;;  %v730_v22 = vrot.slane %v729_v20, 2 }
 0x13f   : > { %v720_v23 = vrot.slane %v719_v21, 1  ;;  %v731_v24 = vadd.f32 %v730_v22, %v729_v20 }
 0x141   : > { %v721_v26 = vadd.f32 %v720_v23, %v719_v21  ;;  %v732_v27 = vrot.slane %v731_v24, 1 }
 0x143   : > { %v722_v29 = vadd.f32 %v721_v26, %v714_v25  ;;  %v733_v30 = vadd.f32 %v732_v27, %v731_v24 }
 0x145   : > { %724 = vst.msk [vmem:[%s4154_s4] sm:$0x1] %vm723_vm3, %v722_v29  ;;  %v734_v31 = vadd.f32 %v733_v30, %v725_v28 }
 0x147   : > { %735 = vst.msk [vmem:[%s4155_s5] sm:$0x1] %vm723_vm3, %v734_v31 }
 0x14c   : > { %v1209_v3 = vld [vmem:[%s4154_s4] sm:$0x1] }
 0x14e   : > { %v1219_v7 = vld [vmem:[%s4155_s5] sm:$0x1] }
 0x14f   : > { %v862_v32 = vpop.f32.mrb[8].mxu0 }
 0x150   : > { %v961_v33 = vpop.f32.mrb[8].mxu1  ;;  %v2963_v34 = vpop.f32.mrb[9].mxu0 }
 0x151   : > { %v962_v35 = vadd.f32 %v961_v33, %v862_v32  ;;  %v2983_v36 = vpop.f32.mrb[9].mxu1  ;;  %v865_v37 = vpop.f32.mrb[10].mxu0 }
 0x152   : > { %v964_v38 = vpop.f32.mrb[10].mxu1  ;;  %v2964_v39 = vpop.f32.mrb[11].mxu0 }
 0x153   : > { %v2984_v40 = vpop.f32.mrb[11].mxu1 }
 0x16f   : > { %v1078_v41 = vpop.f32.mrb[12].mxu0 }
 0x170   : > { %v1084_v42 = vadd.f32 %v1078_v41, %v962_v35  ;;  %v1193_v43 = vpop.f32.mrb[12].mxu1  ;;  %v3003_v44 = vpop.f32.mrb[13].mxu0 }
 0x171   : > { %v3023_v45 = vpop.f32.mrb[13].mxu1  ;;  %v1081_v46 = vpop.f32.mrb[14].mxu0 }
 0x172   : > { %v1199_v47 = vadd.f32 %v1193_v43, %v1084_v42  ;;  %v1196_v48 = vpop.f32.mrb[14].mxu1  ;;  %v3004_v49 = vpop.f32.mrb[15].mxu0 }
 0x173   : > { %v3024_v50 = vpop.f32.mrb[15].mxu1 }
 0x174   : > { %v1207_v51 = vadd.f32 %v4057_v6, %v1199_v47 }
 0x176   : > { %1208 = vst.msk [vmem:[%s3486_s11 + $0x7] sm:$0x7f] %vm712_vm2, %v1207_v51  ;;  %v1210_v52 = vsel %vm712_vm2, %v1207_v51, 0.0  ;;  %v1220_v53 = vmul.f32 %v1207_v51, %v1207_v51 }
 0x177   : > { %v1211_v54 = vrot.slane %v1210_v52, 4 }
 0x178   : > { %v1221_v55 = vsel %vm712_vm2, %v1220_v53, 0.0 }
 0x179   : > { %v1212_v56 = vadd.f32 %v1211_v54, %v1210_v52  ;;  %v1222_v57 = vrot.slane %v1221_v55, 4 }
 0x17b   : > { %v1213_v58 = vrot.slane %v1212_v56, 2  ;;  %v1223_v59 = vadd.f32 %v1222_v57, %v1221_v55 }
 0x17d   : > { %v1214_v60 = vadd.f32 %v1213_v58, %v1212_v56  ;;  %v1224_v61 = vrot.slane %v1223_v59, 2 }
 0x17f   : > { %v1215_v62 = vrot.slane %v1214_v60, 1  ;;  %v1225_v63 = vadd.f32 %v1224_v61, %v1223_v59 }
 0x181   : > { %v1216_v0 = vadd.f32 %v1215_v62, %v1214_v60  ;;  %v1226_v1 = vrot.slane %v1225_v63, 1 }
 0x183   : > { %v1217_v4 = vadd.f32 %v1216_v0, %v1209_v3  ;;  %v1227_v5 = vadd.f32 %v1226_v1, %v1225_v63 }
 0x185   : > { %1218 = vst.msk [vmem:[%s4154_s4] sm:$0x1] %vm723_vm3, %v1217_v4  ;;  %v1228_v8 = vadd.f32 %v1227_v5, %v1219_v7 }
 0x187   : > { %1229 = vst.msk [vmem:[%s4155_s5] sm:$0x1] %vm723_vm3, %v1228_v8 }
 0x18c   : > { %v1689_v42 = vld [vmem:[%s4154_s4] sm:$0x1] }
 0x18e   : > { %v1699_v45 = vld [vmem:[%s4155_s5] sm:$0x1] }
 0x18f   : > { %v1358_v9 = vpop.f32.mrb[16].mxu0 }
 0x190   : > { %v1446_v2 = vpop.f32.mrb[16].mxu1  ;;  %v3043_v10 = vpop.f32.mrb[17].mxu0 }
 0x191   : > { %v1447_v11 = vadd.f32 %v1446_v2, %v1358_v9  ;;  %v3063_v12 = vpop.f32.mrb[17].mxu1  ;;  %v1361_v13 = vpop.f32.mrb[18].mxu0 }
 0x192   : > { %v1449_v14 = vpop.f32.mrb[18].mxu1  ;;  %v3044_v15 = vpop.f32.mrb[19].mxu0 }
 0x193   : > { %v3064_v16 = vpop.f32.mrb[19].mxu1 }
 0x1af   : > { %v1556_v17 = vpop.f32.mrb[20].mxu0 }
 0x1b0   : > { %v1562_v18 = vadd.f32 %v1556_v17, %v1447_v11  ;;  %v1673_v19 = vpop.f32.mrb[20].mxu1  ;;  %v3083_v20 = vpop.f32.mrb[21].mxu0 }
 0x1b1   : > { %v3103_v21 = vpop.f32.mrb[21].mxu1  ;;  %v1559_v22 = vpop.f32.mrb[22].mxu0 }
 0x1b2   : > { %v1679_v23 = vadd.f32 %v1673_v19, %v1562_v18  ;;  %v1676_v24 = vpop.f32.mrb[22].mxu1  ;;  %v3084_v25 = vpop.f32.mrb[23].mxu0 }
 0x1b3   : > { %v3104_v26 = vpop.f32.mrb[23].mxu1 }
 0x1b4   : > { %v1687_v27 = vadd.f32 %v4057_v6, %v1679_v23 }
 0x1b6   : > { %1688 = vst.msk [vmem:[%s3486_s11 + $0xe] sm:$0x7f] %vm712_vm2, %v1687_v27  ;;  %v1690_v28 = vsel %vm712_vm2, %v1687_v27, 0.0  ;;  %v1700_v29 = vmul.f32 %v1687_v27, %v1687_v27 }
 0x1b7   : > { %v1691_v30 = vrot.slane %v1690_v28, 4 }
 0x1b8   : > { %v1701_v31 = vsel %vm712_vm2, %v1700_v29, 0.0 }
 0x1b9   : > { %v1692_v32 = vadd.f32 %v1691_v30, %v1690_v28  ;;  %v1702_v33 = vrot.slane %v1701_v31, 4 }
 0x1bb   : > { %v1693_v34 = vrot.slane %v1692_v32, 2  ;;  %v1703_v35 = vadd.f32 %v1702_v33, %v1701_v31 }
 0x1bd   : > { %v1694_v36 = vadd.f32 %v1693_v34, %v1692_v32  ;;  %v1704_v37 = vrot.slane %v1703_v35, 2 }
 0x1bf   : > { %v1695_v38 = vrot.slane %v1694_v36, 1  ;;  %v1705_v39 = vadd.f32 %v1704_v37, %v1703_v35 }
 0x1c1   : > { %v1696_v40 = vadd.f32 %v1695_v38, %v1694_v36  ;;  %v1706_v41 = vrot.slane %v1705_v39, 1 }
 0x1c3   : > { %v1697_v43 = vadd.f32 %v1696_v40, %v1689_v42  ;;  %v1707_v44 = vadd.f32 %v1706_v41, %v1705_v39 }
 0x1c5   : > { %1698 = vst.msk [vmem:[%s4154_s4] sm:$0x1] %vm723_vm3, %v1697_v43  ;;  %v1708_v46 = vadd.f32 %v1707_v44, %v1699_v45 }
 0x1c7   : > { %1709 = vst.msk [vmem:[%s4155_s5] sm:$0x1] %vm723_vm3, %v1708_v46 }
 0x1ce   : > { %v2193_v20 = vld [vmem:[%s4155_s5] sm:$0x1] }
 0x1cf   : > { %v1836_v47 = vpop.f32.mrb[24].mxu0 }
 0x1d0   : > { %v1935_v48 = vpop.f32.mrb[24].mxu1  ;;  %v3123_v49 = vpop.f32.mrb[25].mxu0 }
 0x1d1   : > { %v1936_v50 = vadd.f32 %v1935_v48, %v1836_v47  ;;  %v3143_v51 = vpop.f32.mrb[25].mxu1  ;;  %v1839_v52 = vpop.f32.mrb[26].mxu0 }
 0x1d2   : > { %v1938_v53 = vpop.f32.mrb[26].mxu1  ;;  %v3124_v54 = vpop.f32.mrb[27].mxu0 }
 0x1d3   : > { %v3144_v55 = vpop.f32.mrb[27].mxu1 }
 0x1ef   : > { %v2052_v56 = vpop.f32.mrb[28].mxu0 }
 0x1f0   : > { %v2058_v57 = vadd.f32 %v2052_v56, %v1936_v50  ;;  %v2167_v58 = vpop.f32.mrb[28].mxu1  ;;  %v3163_v59 = vpop.f32.mrb[29].mxu0 }
 0x1f1   : > { %v3183_v60 = vpop.f32.mrb[29].mxu1  ;;  %v2055_v61 = vpop.f32.mrb[30].mxu0 }
 0x1f2   : > { %v2173_v62 = vadd.f32 %v2167_v58, %v2058_v57  ;;  %v2170_v63 = vpop.f32.mrb[30].mxu1  ;;  %v3164_v0 = vpop.f32.mrb[31].mxu0 }
 0x1f3   : > { %v3184_v1 = vpop.f32.mrb[31].mxu1 }
 0x1f4   : > { %v2181_v3 = vadd.f32 %v4057_v6, %v2173_v62  ;;  %v2183_v6 = vld [vmem:[%s4154_s4] sm:$0x1] }
 0x1f6   : > { %2182 = vst.msk [vmem:[%s3486_s11 + $0x15] sm:$0x7f] %vm712_vm2, %v2181_v3  ;;  %v2184_v4 = vsel %vm712_vm2, %v2181_v3, 0.0  ;;  %v2194_v5 = vmul.f32 %v2181_v3, %v2181_v3 }
 0x1f7   : > { %v2185_v7 = vrot.slane %v2184_v4, 4 }
 0x1f8   : > { %v2195_v8 = vsel %vm712_vm2, %v2194_v5, 0.0 }
 0x1f9   : > { %v2186_v9 = vadd.f32 %v2185_v7, %v2184_v4  ;;  %v2196_v2 = vrot.slane %v2195_v8, 4 }
 0x1fb   : > { %v2187_v10 = vrot.slane %v2186_v9, 2  ;;  %v2197_v11 = vadd.f32 %v2196_v2, %v2195_v8 }
 0x1fd   : > { %v2188_v12 = vadd.f32 %v2187_v10, %v2186_v9  ;;  %v2198_v13 = vrot.slane %v2197_v11, 2 }
 0x1ff   : > { %v2189_v14 = vrot.slane %v2188_v12, 1  ;;  %v2199_v15 = vadd.f32 %v2198_v13, %v2197_v11 }
 0x201   : > { %v2190_v16 = vadd.f32 %v2189_v14, %v2188_v12  ;;  %v2200_v17 = vrot.slane %v2199_v15, 1 }
 0x203   : > { %v2191_v18 = vadd.f32 %v2190_v16, %v2183_v6  ;;  %v2201_v19 = vadd.f32 %v2200_v17, %v2199_v15 }
 0x205   : > { %2192 = vst.msk [vmem:[%s4154_s4] sm:$0x1] %vm723_vm3, %v2191_v18  ;;  %v2202_v21 = vadd.f32 %v2201_v19, %v2193_v20 }
 0x207   : > { %2203 = vst.msk [vmem:[%s4155_s5] sm:$0x1] %vm723_vm3, %v2202_v21 }
 0x208 PF: > { %s16_s22 = sadd.s32 1, %s3408_s22   ;;  %s4156_s18 = smov %s3400_s20 }
 0x209   : > { %p13_p10 = scmp.ge.s32.totalorder %s16_s22, 16   ;;  %s4157_s19 = smov %s3404_s21 }
 0x20a   : > { %s4158_s20 = smov %s4161_s23  ;;  %s4159_s21 = smov %s4165_s24 }
 0x20b   :  { %15 = sbr.rel (!%p13_p10) target bundleno = 3 (0x3), region = 100 }

// kernel: decoder_forward.7
= control target key start
LH: loop header
LB: loop body
LE: loop exit
PB: predicated region body
PF: predicated region fallthrough
CT: control target
= control target key end

     0   :  { %s2499_s12 = smov 0   ;;  %s2501_s13 = smov 0   ;;  %s2916_s0 = inlined_call_operand.vmem [shape: bf16[2,16,16,64], index: 0, kind: input, shape index: {}]   ;;  %s2917_s1 = inlined_call_operand.vmem [shape: bf16[4,4,64,128], index: 1, kind: input, shape index: {}]   ;;  %s2918_s2 = inlined_call_operand.vmem [shape: f32[1,128], index: 2, kind: input, shape index: {}]   ;;  %s2919_s3 = inlined_call_operand.vmem [shape: f32[2,14,56,128], index: 3, kind: output, shape index: {}]  }
   0x1   :  { %s2503_s14 = smov 0   ;;  %s2505_s15 = smov 0  }
   0x2   :  { %s2507_s16 = smov 0  }
   0x3 LB: > { %s22_s17 = sadd.s32 1, %s2467_s14  ;;  %s25_s18 = sadd.s32 1, %s2471_s15  ;;  %s2475_s16 = sphi %s2507_s16, %s13_s16   ;;  %s2471_s15 = sphi %s2505_s15, %s2923_s15   ;;  %s2467_s14 = sphi %s2503_s14, %s2922_s14   ;;  %s2463_s13 = sphi %s2501_s13, %s2921_s13   ;;  %s2459_s12 = sphi %s2499_s12, %s2920_s12  }
   0x4   : > { %p23_p0 = scmp.ge.s32.totalorder %s22_s17, 14  ;;  %p1775_p1 = scmp.ge.s32.totalorder %s2475_s16, 1 }
   0x5   : > { %p151_p2 = scmp.lt.s32.totalorder %s2475_s16, 29 }
   0x6   : > { %s2925_s17 = smov (%p23_p0, %s22_s17), 0  ;;  %s2927_s18 = smov (!%p23_p0, %s25_s18), %s2471_s15 }
   0x7   : > { %p152_p3 = pnand %p1775_p1, %p151_p2  ;;  %p27_p4 = scmp.ge.s32.totalorder %s2927_s18, 2 }
   0x8   : > { %v2341_v0 = vld [vmem:[%s2917_s1 + $0x20] sm:$0xff] (!%p152_p3)   ;;  %v2477_v1 = vmov (!%p152_p3), 0.0   ;;  %v2343_v3 = vld [vmem:[%s2917_s1 + $0x28] sm:$0xff] (!%p152_p3)   ;;  %vm2478_vm0 = vmmov (!%p152_p3), 0   ;;  %p179_p5 = scmp.lt.s32.totalorder (!%p152_p3), %s2463_s13, 1  ;;  %s2024_s27 = sshll.u32 (!%p152_p3), %s2459_s12, 3 }
   0x9   : > { %s2929_s18 = smov (%p27_p4, %s2927_s18), 0  ;;  %155 = sbr.rel (%p152_p3) target bundleno = 379 (0x17b), region = 32 }
   0xa   : > { %2105 = vmatprep.subr.bf16.mxu0 (!%p152_p3), %v2477_v1  ;;  %2117 = vmatprep.subr.bf16.mxu1 (!%p152_p3), %v2477_v1  ;;  %v2342_v2 = vld [vmem:[%s2917_s1] sm:$0xff] (!%p152_p3)   ;;  %v2344_v4 = vld [vmem:[%s2917_s1 + $0x8] sm:$0xff] (!%p152_p3)   ;;  %v2345_v5 = vld [vmem:[%s2917_s1 + $0x30] sm:$0xff] (!%p152_p3)   ;;  %vm253_vm1 = vcmask (!%p152_p3), 523264   ;;  %p186_p6 = scmp.lt.s32.totalorder (!%p152_p3), %s2459_s12, 13 }
   0xb   : > { %2106 = vmatpush3.bf16.msra.mxu0 (!%p152_p3), %v2341_v0  ;;  %2113 = vmatprep.mubr.msk.bf16.mxu0 (!%p152_p3), %vm2478_vm0, %v2477_v1  ;;  %v2346_v6 = vld [vmem:[%s2917_s1 + $0x10] sm:$0xff] (!%p152_p3)   ;;  %v2347_v7 = vld [vmem:[%s2917_s1 + $0x38] sm:$0xff] (!%p152_p3)   ;;  %v2351_v17 = vld [vmem:[%s2917_s1 + $0x40] sm:$0xff] (!%p152_p3)  }
   0xc   : > { %2118 = vmatpush3.bf16.msra.mxu1 (!%p152_p3), %v2342_v2  ;;  %2107 = vmatprep.subr.bf16.mxu0 (!%p152_p3), %v2477_v1  ;;  %v2348_v10 = vld [vmem:[%s2917_s1 + $0x18] sm:$0xff] (!%p152_p3)   ;;  %v2352_v18 = vld [vmem:[%s2917_s1 + $0x60] sm:$0xff] (!%p152_p3)   ;;  %v2353_v20 = vld [vmem:[%s2917_s1 + $0x48] sm:$0xff] (!%p152_p3)  }
   0xd   : > { %2119 = vmatprep.subr.bf16.mxu1 (!%p152_p3), %v2477_v1  ;;  %2125 = vmatprep.mubr.msk.bf16.mxu1 (!%p152_p3), %vm2478_vm0, %v2477_v1  ;;  %v2354_v23 = vld [vmem:[%s2917_s1 + $0x68] sm:$0xff] (!%p152_p3)   ;;  %v2355_v25 = vld [vmem:[%s2917_s1 + $0x50] sm:$0xff] (!%p152_p3)   ;;  %v2357_v28 = vld [vmem:[%s2917_s1 + $0x58] sm:$0xff] (!%p152_p3)  }
   0xe   : > { %v2356_v27 = vld [vmem:[%s2917_s1 + $0x70] sm:$0xff] (!%p152_p3)   ;;  %v2358_v29 = vld [vmem:[%s2917_s1 + $0x78] sm:$0xff] (!%p152_p3)   ;;  %v2361_v33 = vld [vmem:[%s2917_s1 + $0xa0] sm:$0xff] (!%p152_p3)  }
   0xf   : > { %2108 = vmatpush3.bf16.msra.mxu0 (!%p152_p3), %v2343_v3  ;;  %v2362_v34 = vld [vmem:[%s2917_s1 + $0x80] sm:$0xff] (!%p152_p3)   ;;  %v2363_v40 = vld [vmem:[%s2917_s1 + $0xa8] sm:$0xff] (!%p152_p3)   ;;  %v2365_v43 = vld [vmem:[%s2917_s1 + $0xb0] sm:$0xff] (!%p152_p3)  }
  0x10   : > { %s2931_s13 = smov (!%p179_p5, %s2463_s13), 1  ;;  %2120 = vmatpush3.bf16.msra.mxu1 %v2344_v4  ;;  %2109 = vmatprep.subr.bf16.mxu0 %v2477_v1  ;;  %v2364_v41 = vld [vmem:[%s2917_s1 + $0x88] sm:$0xff]   ;;  %v2366_v45 = vld [vmem:[%s2917_s1 + $0x90] sm:$0xff]   ;;  %v2367_v47 = vld [vmem:[%s2917_s1 + $0xb8] sm:$0xff]   ;;  %s2933_s12 = smov (!%p186_p6, %s2459_s12), 13 }
  0x11   : > { %s2023_s30 = sshll.u32 %s2931_s13, 7  ;;  %2121 = vmatprep.subr.bf16.mxu1 %v2477_v1  ;;  %v2368_v50 = vld [vmem:[%s2917_s1 + $0x98] sm:$0xff]   ;;  %v2371_v55 = vld [vmem:[%s2917_s1 + $0xc0] sm:$0xff]   ;;  %v2373_v58 = vld [vmem:[%s2917_s1 + $0xc8] sm:$0xff]   ;;  %s2298_s20 = smul.u32 98, %s2931_s13 }
  0x12   : > { %s183_s8 = scalar_lea.vmem %s2916_s0, %s2023_s30  ;;  %v2372_v56 = vld [vmem:[%s2917_s1 + $0xe0] sm:$0xff]   ;;  %v2374_v59 = vld [vmem:[%s2917_s1 + $0xe8] sm:$0xff]   ;;  %v2375_v60 = vld [vmem:[%s2917_s1 + $0xd0] sm:$0xff]   ;;  %s2297_s21 = smul.u32 7, %s2933_s12 }
  0x13   : > { %s2570_s9 = scalar_lea.vmem %s183_s8, %s2024_s27  ;;  %2110 = vmatpush3.bf16.msra.mxu0 %v2345_v5  ;;  %v2376_v62 = vld [vmem:[%s2917_s1 + $0xf0] sm:$0xff]   ;;  %v2377_v0 = vld [vmem:[%s2917_s1 + $0xd8] sm:$0xff]  }
  0x14   : > { %v197_v8 = vld [vmem:[%s2570_s9] sm:$0xf]  ;;  %v207_v9 = vld [vmem:[%s2570_s9 + $0x4] sm:$0xf]  ;;  %2122 = vmatpush3.bf16.msra.mxu1 %v2346_v6  ;;  %2111 = vmatprep.subr.bf16.mxu0 %v2477_v1  ;;  %v1802_v21 = vld [vmem:[%s2570_s9 + $0x8] sm:$0xf]  ;;  %s190_s22 = sadd.s32 %s2298_s20, %s2297_s21 }
  0x15   : > { %v1789_v11 = vcombine.low %v197_v8, %v207_v9  ;;  %v198_v12 = vld [vmem:[%s2570_s9 + $0x4] sm:$0x7]  ;;  %2123 = vmatprep.subr.bf16.mxu1 %v2477_v1  ;;  %v1818_v22 = vld [vmem:[%s2570_s9 + $0xc] sm:$0xf]  ;;  %v568_v37 = vld [vmem:[%s2570_s9] sm:$0xf] }
  0x16   : > { %v1795_v16 = vcombine.low %v197_v8, %v198_v12  ;;  %v1827_v24 = vcombine.low %v1802_v21, %v1818_v22  ;;  %v1803_v32 = vld [vmem:[%s2570_s9 + $0xc] sm:$0x7]  ;;  %v569_v38 = vld [vmem:[%s2570_s9 + $0x4] sm:$0xf]  ;;  %v579_v42 = vld [vmem:[%s2570_s9] sm:$0xe] }
  0x17   : > { %v223_v13 = vshrl.u32 %v1789_v11, 16  ;;  %v225_v14 = vshll.u32 %v1789_v11, 16  ;;  %2112 = vmatpush3.bf16.msra.mxu0 %v2347_v7  ;;  %v1812_v35 = vcombine.low %v1802_v21, %v1803_v32  ;;  %v1856_v39 = vcombine.low %v568_v37, %v569_v38  ;;  %v1862_v52 = vld [vmem:[%s2570_s9 + $0x8] sm:$0xf]  ;;  %v1863_v54 = vld [vmem:[%s2570_s9 + $0xc] sm:$0xf] }
  0x18   : > { %2124 = vmatpush3.bf16.msra.mxu1 %v2348_v10  ;;  %2129 = vmatprep.subr.bf16.mxu0 %v2477_v1  ;;  %v475_v26 = vshll.u32 %v1827_v24, 16  ;;  %v473_v30 = vshrl.u32 %v1827_v24, 16  ;;  %v1850_v46 = vcombine.low %v579_v42, %v569_v38  ;;  %v1872_v57 = vcombine.low %v1862_v52, %v1863_v54  ;;  %v1878_v63 = vld [vmem:[%s2570_s9 + $0x8] sm:$0xe]  ;;  %v2378_v5 = vld [vmem:[%s2917_s1 + $0xf8] sm:$0xff]   ;;  %v2381_v8 = vld [vmem:[%s2917_s1 + $0x120] sm:$0xff]  }
  0x19   : > { %v227_v15 = vrot.slane %v225_v14, 1  ;;  %2141 = vmatprep.subr.bf16.mxu1 %v2477_v1  ;;  %v669_v44 = vshll.u32 %v1856_v39, 16  ;;  %v667_v48 = vshrl.u32 %v1856_v39, 16  ;;  %v1887_v4 = vcombine.low %v1878_v63, %v1863_v54  ;;  %v2382_v9 = vld [vmem:[%s2917_s1 + $0x100] sm:$0xff]   ;;  %v1894_v10 = vld [vmem:[%s2570_s9 + $0x8] sm:$0xf] }
  0x1a   : > { %v477_v31 = vrot.slane %v475_v26, 1  ;;  %v594_v51 = vrot.slane %v1850_v46, 1  ;;  %v760_v61 = vshll.u32 %v1872_v57, 16  ;;  %v758_v2 = vshrl.u32 %v1872_v57, 16  ;;  %v1904_v11 = vld [vmem:[%s2570_s9 + $0xc] sm:$0xf] }
  0x1b   : > { %v228_v19 = vor.u32 %v227_v15, %v223_v13  ;;  %2126 = vmatmul.mubr.msk.bf16.vlgmr.msra.gmra.mrb[0].mxu1 %vm253_vm1, %v1795_v16  ;;  %v671_v49 = vrot.slane %v669_v44, 1  ;;  %v847_v7 = vrot.slane %v1887_v4, 1  ;;  %v2383_v12 = vld [vmem:[%s2917_s1 + $0x128] sm:$0xff]   ;;  %v1913_v13 = vcombine.low %v1894_v10, %v1904_v11  ;;  %v2385_v16 = vld [vmem:[%s2917_s1 + $0x130] sm:$0xff]   ;;  %v2388_v21 = vld [vmem:[%s2917_s1 + $0x118] sm:$0xff]   ;;  %s1778_s23 = sshll.u32 %s190_s22, 3 }
  0x1c   : > { %2142 = vmatpush3.bf16.msra.mxu1 %v2352_v18  ;;  %2149 = vmatprep.mubr.msk.bf16.mxu1 %vm2478_vm0, %v2477_v1  ;;  %v478_v36 = vor.u32 %v477_v31, %v473_v30  ;;  %v762_v3 = vrot.slane %v760_v61, 1  ;;  %v2384_v14 = vld [vmem:[%s2917_s1 + $0x108] sm:$0xff]   ;;  %v2392_v26 = vld [vmem:[%s2917_s1 + $0x160] sm:$0xff]   ;;  %v2397_v37 = vld [vmem:[%s2917_s1 + $0x158] sm:$0xff]   ;;  %s2885_s12 = scalar_lea.vmem %s2919_s3, %s1778_s23 }
  0x1d   : > { %2114 = vmatmul.mubr.msk.bf16.vlgmr.msra.gmra.mrb[0].mxu0 %vm253_vm1, %v228_v19  ;;  %2143 = vmatprep.subr.bf16.mxu1 %v2477_v1  ;;  %v672_v53 = vor.u32 %v671_v49, %v667_v48  ;;  %v966_v15 = vshll.u32 %v1913_v13, 16  ;;  %v964_v18 = vshrl.u32 %v1913_v13, 16  ;;  %v1895_v22 = vld [vmem:[%s2570_s9 + $0xc] sm:$0x7]  ;;  %v2398_v38 = vld [vmem:[%s2917_s1 + $0x178] sm:$0xff]   ;;  %v2401_v42 = vld [vmem:[%s2917_s1 + $0x1a0] sm:$0xff]  }
  0x1e   : > { %2130 = vmatpush3.bf16.msra.mxu0 %v2351_v17  ;;  %2137 = vmatprep.mubr.msk.bf16.mxu0 %vm2478_vm0, %v2477_v1  ;;  %v763_v6 = vor.u32 %v762_v3, %v758_v2  ;;  %v2386_v17 = vld [vmem:[%s2917_s1 + $0x110] sm:$0xff]   ;;  %v1919_v24 = vcombine.low %v1894_v10, %v1895_v22  ;;  %v2393_v30 = vld [vmem:[%s2917_s1 + $0x148] sm:$0xff]   ;;  %v2408_v57 = vld [vmem:[%s2917_s1 + $0x198] sm:$0xff]  }
  0x1f   : > { %2131 = vmatprep.subr.bf16.mxu0 %v2477_v1  ;;  %v968_v19 = vrot.slane %v966_v15, 1  ;;  %v2394_v31 = vld [vmem:[%s2917_s1 + $0x168] sm:$0xff]   ;;  %v1927_v39 = vld [vmem:[%s2570_s9 + $0x14] sm:$0x7]  ;;  %v2412_v61 = vld [vmem:[%s2917_s1 + $0x1e0] sm:$0xff]  }
  0x20   : > { %2144 = vmatpush3.bf16.msra.mxu1 %v2354_v23  ;;  %v1958_v44 = vld [vmem:[%s2570_s9 + $0x8] sm:$0xf]  ;;  %v1990_v63 = vld [vmem:[%s2570_s9 + $0x14] sm:$0xf]  ;;  %v2417_v11 = vld [vmem:[%s2917_s1 + $0x1d8] sm:$0xff]  }
  0x21   : > { %2145 = vmatprep.subr.bf16.mxu1 %v2477_v1  ;;  %v969_v23 = vor.u32 %v968_v19, %v964_v18  ;;  %v2404_v48 = vld [vmem:[%s2917_s1 + $0x188] sm:$0xff]  }
  0x22   : > { %2132 = vmatpush3.bf16.msra.mxu0 %v2353_v20  ;;  %v2387_v20 = vld [vmem:[%s2917_s1 + $0x138] sm:$0xff]   ;;  %v1968_v52 = vld [vmem:[%s2570_s9 + $0x8] sm:$0xe] }
  0x23   : > { %2133 = vmatprep.subr.bf16.mxu0 %v2477_v1  ;;  %v2413_v2 = vld [vmem:[%s2917_s1 + $0x1c8] sm:$0xff]  }
  0x24   : > { %2146 = vmatpush3.bf16.msra.mxu1 %v2356_v27  ;;  %v1926_v27 = vld [vmem:[%s2570_s9 + $0x10] sm:$0xf]  ;;  %v2414_v3 = vld [vmem:[%s2917_s1 + $0x1e8] sm:$0xff]  }
  0x25   : > { %2147 = vmatprep.subr.bf16.mxu1 %v2477_v1 }
  0x26   : > { %2134 = vmatpush3.bf16.msra.mxu0 %v2355_v25  ;;  %v2391_v25 = vld [vmem:[%s2917_s1 + $0x140] sm:$0xff]  }
  0x27   : > { %2135 = vmatprep.subr.bf16.mxu0 %v2477_v1 }
  0x28   : > { %2148 = vmatpush3.bf16.msra.mxu1 %v2358_v29 }
  0x29   : > { %2165 = vmatprep.subr.bf16.mxu1 %v2477_v1 }
  0x2a   : > { %2136 = vmatpush3.bf16.msra.mxu0 %v2357_v28  ;;  %v1942_v28 = vld [vmem:[%s2570_s9 + $0x14] sm:$0xf] }
  0x2b   : > { %2153 = vmatprep.subr.bf16.mxu0 %v2477_v1  ;;  %2150 = vmatmul.mubr.msk.bf16.vlgmr.msra.gmra.mrb[4].mxu1 %vm253_vm1, %v478_v36  ;;  %v1951_v29 = vcombine.low %v1926_v27, %v1942_v28 }
  0x2c   : > { %2166 = vmatpush3.bf16.msra.mxu1 %v2362_v34  ;;  %2173 = vmatprep.mubr.msk.bf16.mxu1 %vm2478_vm0, %v2477_v1  ;;  %v2396_v34 = vld [vmem:[%s2917_s1 + $0x170] sm:$0xff]  }
  0x2d   : > { %2138 = vmatmul.mubr.msk.bf16.vlgmr.msra.gmra.mrb[4].mxu0 %vm253_vm1, %v1812_v35  ;;  %2167 = vmatprep.subr.bf16.mxu1 %v2477_v1  ;;  %v1215_v32 = vshll.u32 %v1951_v29, 16  ;;  %v1213_v35 = vshrl.u32 %v1951_v29, 16  ;;  %v2875_v29 = vld [vmem:[%s2918_s2] ss:$0 sm:$0xff] }
  0x2e   : > { %2154 = vmatpush3.bf16.msra.mxu0 %v2361_v33  ;;  %2161 = vmatprep.mubr.msk.bf16.mxu0 %vm2478_vm0, %v2477_v1  ;;  %v2395_v33 = vld [vmem:[%s2917_s1 + $0x150] sm:$0xff]  }
  0x2f   : > { %2155 = vmatprep.subr.bf16.mxu0 %v2477_v1  ;;  %v1217_v36 = vrot.slane %v1215_v32, 1 }
  0x30   : > { %2168 = vmatpush3.bf16.msra.mxu1 %v2364_v41 }
  0x31   : > { %2169 = vmatprep.subr.bf16.mxu1 %v2477_v1  ;;  %v1218_v41 = vor.u32 %v1217_v36, %v1213_v35 }
  0x32   : > { %2156 = vmatpush3.bf16.msra.mxu0 %v2363_v40  ;;  %v1936_v40 = vcombine.low %v1926_v27, %v1927_v39 }
  0x33   : > { %2157 = vmatprep.subr.bf16.mxu0 %v2477_v1 }
  0x34   : > { %2170 = vmatpush3.bf16.msra.mxu1 %v2366_v45  ;;  %v1959_v45 = vld [vmem:[%s2570_s9 + $0xc] sm:$0xf] }
  0x35   : > { %2171 = vmatprep.subr.bf16.mxu1 %v2477_v1  ;;  %v1983_v46 = vcombine.low %v1958_v44, %v1959_v45 }
  0x36   : > { %2158 = vmatpush3.bf16.msra.mxu0 %v2365_v43  ;;  %v2402_v43 = vld [vmem:[%s2917_s1 + $0x180] sm:$0xff]  }
  0x37   : > { %2159 = vmatprep.subr.bf16.mxu0 %v2477_v1  ;;  %v1409_v49 = vshll.u32 %v1983_v46, 16  ;;  %v1407_v54 = vshrl.u32 %v1983_v46, 16 }
  0x38   : > { %2172 = vmatpush3.bf16.msra.mxu1 %v2368_v50  ;;  %v2405_v50 = vld [vmem:[%s2917_s1 + $0x1b0] sm:$0xff]  }
  0x39   : > { %2189 = vmatprep.subr.bf16.mxu1 %v2477_v1 }
  0x3a   : > { %2160 = vmatpush3.bf16.msra.mxu0 %v2367_v47  ;;  %v2403_v47 = vld [vmem:[%s2917_s1 + $0x1a8] sm:$0xff]  }
  0x3b   : > { %2177 = vmatprep.subr.bf16.mxu0 %v2477_v1  ;;  %2174 = vmatmul.mubr.msk.bf16.vlgmr.msra.gmra.mrb[8].mxu1 %vm253_vm1, %v672_v53  ;;  %v1977_v53 = vcombine.low %v1968_v52, %v1959_v45 }
  0x3c   : > { %2190 = vmatpush3.bf16.msra.mxu1 %v2372_v56  ;;  %2197 = vmatprep.mubr.msk.bf16.mxu1 %vm2478_vm0, %v2477_v1  ;;  %v2407_v56 = vld [vmem:[%s2917_s1 + $0x1b8] sm:$0xff]  }
  0x3d   : > { %2162 = vmatmul.mubr.msk.bf16.vlgmr.msra.gmra.mrb[8].mxu0 %vm253_vm1, %v594_v51  ;;  %2191 = vmatprep.subr.bf16.mxu1 %v2477_v1  ;;  %v2406_v51 = vld [vmem:[%s2917_s1 + $0x190] sm:$0xff]  }
  0x3e   : > { %2178 = vmatpush3.bf16.msra.mxu0 %v2371_v55  ;;  %2185 = vmatprep.mubr.msk.bf16.mxu0 %vm2478_vm0, %v2477_v1  ;;  %v1411_v55 = vrot.slane %v1409_v49, 1 }
  0x3f   : > { %2179 = vmatprep.subr.bf16.mxu0 %v2477_v1 }
  0x40   : > { %2192 = vmatpush3.bf16.msra.mxu1 %v2374_v59  ;;  %v1412_v59 = vor.u32 %v1411_v55, %v1407_v54 }
  0x41   : > { %2193 = vmatprep.subr.bf16.mxu1 %v2477_v1 }
  0x42   : > { %2180 = vmatpush3.bf16.msra.mxu0 %v2373_v58  ;;  %v1334_v58 = vrot.slane %v1977_v53, 1 }
  0x43   : > { %2181 = vmatprep.subr.bf16.mxu0 %v2477_v1 }
  0x44   : > { %2194 = vmatpush3.bf16.msra.mxu1 %v2376_v62  ;;  %v1989_v62 = vld [vmem:[%s2570_s9 + $0x10] sm:$0xf] }
  0x45   : > { %2195 = vmatprep.subr.bf16.mxu1 %v2477_v1 }
  0x46   : > { %2182 = vmatpush3.bf16.msra.mxu0 %v2375_v60  ;;  %v2411_v60 = vld [vmem:[%s2917_s1 + $0x1c0] sm:$0xff]  }
  0x47   : > { %2183 = vmatprep.subr.bf16.mxu0 %v2477_v1 }
  0x48   : > { %2196 = vmatpush3.bf16.msra.mxu1 %v2378_v5  ;;  %v2415_v5 = vld [vmem:[%s2917_s1 + $0x1d0] sm:$0xff]  }
  0x49   : > { %2213 = vmatprep.subr.bf16.mxu1 %v2477_v1 }
  0x4a   : > { %2184 = vmatpush3.bf16.msra.mxu0 %v2377_v0  ;;  %v1999_v0 = vcombine.low %v1989_v62, %v1990_v63 }
  0x4b   : > { %2201 = vmatprep.subr.bf16.mxu0 %v2477_v1  ;;  %2198 = vmatmul.mubr.msk.bf16.vlgmr.msra.gmra.mrb[12].mxu1 %vm253_vm1, %v847_v7  ;;  %v2005_v7 = vld [vmem:[%s2570_s9 + $0x10] sm:$0xe] }
  0x4c   : > { %2214 = vmatpush3.bf16.msra.mxu1 %v2382_v9  ;;  %2221 = vmatprep.mubr.msk.bf16.mxu1 %vm2478_vm0, %v2477_v1  ;;  %v1500_v4 = vshll.u32 %v1999_v0, 16  ;;  %v2014_v10 = vcombine.low %v2005_v7, %v1990_v63 }
  0x4d   : > { %2186 = vmatmul.mubr.msk.bf16.vlgmr.msra.gmra.mrb[12].mxu0 %vm253_vm1, %v763_v6  ;;  %2215 = vmatprep.subr.bf16.mxu1 %v2477_v1  ;;  %v2416_v6 = vld [vmem:[%s2917_s1 + $0x1f0] sm:$0xff]  }
  0x4e   : > { %2202 = vmatpush3.bf16.msra.mxu0 %v2381_v8  ;;  %2209 = vmatprep.mubr.msk.bf16.mxu0 %vm2478_vm0, %v2477_v1  ;;  %v1498_v8 = vshrl.u32 %v1999_v0, 16  ;;  %v1502_v9 = vrot.slane %v1500_v4, 1 }
  0x4f   : > { %2203 = vmatprep.subr.bf16.mxu0 %v2477_v1 }
  0x50   : > { %2216 = vmatpush3.bf16.msra.mxu1 %v2384_v14  ;;  %v1503_v13 = vor.u32 %v1502_v9, %v1498_v8  ;;  %v1587_v14 = vrot.slane %v2014_v10, 1 }
  0x51   : > { %2217 = vmatprep.subr.bf16.mxu1 %v2477_v1 }
  0x52   : > { %2204 = vmatpush3.bf16.msra.mxu0 %v2383_v12  ;;  %v2418_v12 = vld [vmem:[%s2917_s1 + $0x1f8] sm:$0xff]  }
  0x53   : > { %2205 = vmatprep.subr.bf16.mxu0 %v2477_v1 }
  0x54   : > { %2218 = vmatpush3.bf16.msra.mxu1 %v2386_v17 }
  0x55   : > { %2219 = vmatprep.subr.bf16.mxu1 %v2477_v1 }
  0x56   : > { %2206 = vmatpush3.bf16.msra.mxu0 %v2385_v16 }
  0x57   : > { %2207 = vmatprep.subr.bf16.mxu0 %v2477_v1 }
  0x58   : > { %2220 = vmatpush3.bf16.msra.mxu1 %v2388_v21 }
  0x59   : > { %2237 = vmatprep.subr.bf16.mxu1 %v2477_v1 }
  0x5a   : > { %2208 = vmatpush3.bf16.msra.mxu0 %v2387_v20 }
  0x5b   : > { %2225 = vmatprep.subr.bf16.mxu0 %v2477_v1  ;;  %2222 = vmatmul.mubr.msk.bf16.vlgmr.msra.gmra.mrb[16].mxu1 %vm253_vm1, %v1919_v24 }
  0x5c   : > { %2238 = vmatpush3.bf16.msra.mxu1 %v2392_v26  ;;  %2245 = vmatprep.mubr.msk.bf16.mxu1 %vm2478_vm0, %v2477_v1 }
  0x5d   : > { %2210 = vmatmul.mubr.msk.bf16.vlgmr.msra.gmra.mrb[16].mxu0 %vm253_vm1, %v969_v23  ;;  %2239 = vmatprep.subr.bf16.mxu1 %v2477_v1 }
  0x5e   : > { %2226 = vmatpush3.bf16.msra.mxu0 %v2391_v25  ;;  %2233 = vmatprep.mubr.msk.bf16.mxu0 %vm2478_vm0, %v2477_v1 }
  0x5f   : > { %2227 = vmatprep.subr.bf16.mxu0 %v2477_v1 }
  0x60   : > { %2240 = vmatpush3.bf16.msra.mxu1 %v2394_v31 }
  0x61   : > { %2241 = vmatprep.subr.bf16.mxu1 %v2477_v1 }
  0x62   : > { %2228 = vmatpush3.bf16.msra.mxu0 %v2393_v30 }
  0x63   : > { %2229 = vmatprep.subr.bf16.mxu0 %v2477_v1 }
  0x64   : > { %2242 = vmatpush3.bf16.msra.mxu1 %v2396_v34 }
  0x65   : > { %2243 = vmatprep.subr.bf16.mxu1 %v2477_v1 }
  0x66   : > { %2230 = vmatpush3.bf16.msra.mxu0 %v2395_v33 }
  0x67   : > { %2231 = vmatprep.subr.bf16.mxu0 %v2477_v1 }
  0x68   : > { %2244 = vmatpush3.bf16.msra.mxu1 %v2398_v38 }
  0x69   : > { %2261 = vmatprep.subr.bf16.mxu1 %v2477_v1 }
  0x6a   : > { %2232 = vmatpush3.bf16.msra.mxu0 %v2397_v37 }
  0x6b   : > { %2249 = vmatprep.subr.bf16.mxu0 %v2477_v1  ;;  %2246 = vmatmul.mubr.msk.bf16.vlgmr.msra.gmra.mrb[20].mxu1 %vm253_vm1, %v1218_v41 }
  0x6c   : > { %2262 = vmatpush3.bf16.msra.mxu1 %v2402_v43  ;;  %2269 = vmatprep.mubr.msk.bf16.mxu1 %vm2478_vm0, %v2477_v1 }
  0x6d   : > { %2234 = vmatmul.mubr.msk.bf16.vlgmr.msra.gmra.mrb[20].mxu0 %vm253_vm1, %v1936_v40  ;;  %2263 = vmatprep.subr.bf16.mxu1 %v2477_v1 }
  0x6e   : > { %2250 = vmatpush3.bf16.msra.mxu0 %v2401_v42  ;;  %2257 = vmatprep.mubr.msk.bf16.mxu0 %vm2478_vm0, %v2477_v1 }
  0x6f   : > { %2251 = vmatprep.subr.bf16.mxu0 %v2477_v1 }
  0x70   : > { %2264 = vmatpush3.bf16.msra.mxu1 %v2404_v48 }
  0x71   : > { %2265 = vmatprep.subr.bf16.mxu1 %v2477_v1 }
  0x72   : > { %2252 = vmatpush3.bf16.msra.mxu0 %v2403_v47 }
  0x73   : > { %2253 = vmatprep.subr.bf16.mxu0 %v2477_v1 }
  0x74   : > { %2266 = vmatpush3.bf16.msra.mxu1 %v2406_v51 }
  0x75   : > { %2267 = vmatprep.subr.bf16.mxu1 %v2477_v1 }
  0x76   : > { %2254 = vmatpush3.bf16.msra.mxu0 %v2405_v50 }
  0x77   : > { %2255 = vmatprep.subr.bf16.mxu0 %v2477_v1 }
  0x78   : > { %2268 = vmatpush3.bf16.msra.mxu1 %v2408_v57 }
  0x79   : > { %2285 = vmatprep.subr.bf16.mxu1 %v2477_v1 }
  0x7a   : > { %2256 = vmatpush3.bf16.msra.mxu0 %v2407_v56 }
  0x7b   : > { %2273 = vmatprep.subr.bf16.mxu0 %v2477_v1  ;;  %2270 = vmatmul.mubr.msk.bf16.vlgmr.msra.gmra.mrb[24].mxu1 %vm253_vm1, %v1412_v59 }
  0x7c   : > { %2286 = vmatpush3.bf16.msra.mxu1 %v2412_v61  ;;  %2293 = vmatprep.mubr.msk.bf16.mxu1 %vm2478_vm0, %v2477_v1 }
  0x7d   : > { %2258 = vmatmul.mubr.msk.bf16.vlgmr.msra.gmra.mrb[24].mxu0 %vm253_vm1, %v1334_v58  ;;  %2287 = vmatprep.subr.bf16.mxu1 %v2477_v1 }
  0x7e   : > { %2274 = vmatpush3.bf16.msra.mxu0 %v2411_v60  ;;  %2281 = vmatprep.mubr.msk.bf16.mxu0 %vm2478_vm0, %v2477_v1 }
  0x7f   : > { %2275 = vmatprep.subr.bf16.mxu0 %v2477_v1 }
  0x80   : > { %2288 = vmatpush3.bf16.msra.mxu1 %v2414_v3 }
  0x81   : > { %2289 = vmatprep.subr.bf16.mxu1 %v2477_v1 }
  0x82   : > { %2276 = vmatpush3.bf16.msra.mxu0 %v2413_v2 }
  0x83   : > { %2277 = vmatprep.subr.bf16.mxu0 %v2477_v1 }
  0x84   : > { %2290 = vmatpush3.bf16.msra.mxu1 %v2416_v6 }
  0x85   : > { %2291 = vmatprep.subr.bf16.mxu1 %v2477_v1 }
  0x86   : > { %2278 = vmatpush3.bf16.msra.mxu0 %v2415_v5 }
  0x87   : > { %2279 = vmatprep.subr.bf16.mxu0 %v2477_v1 }
  0x88   : > { %2292 = vmatpush3.bf16.msra.mxu1 %v2418_v12 }
  0x8a   : > { %2280 = vmatpush3.bf16.msra.mxu0 %v2417_v11 }
  0x8b   : > { %2294 = vmatmul.mubr.msk.bf16.vlgmr.msra.gmra.mrb[28].mxu1 %vm253_vm1, %v1587_v14 }
  0x8d   : > { %2282 = vmatmul.mubr.msk.bf16.vlgmr.msra.gmra.mrb[28].mxu0 %vm253_vm1, %v1503_v13 }
  0xee   : > { %v362_v16 = vpop.f32.mrb[0].mxu1 }
  0xef   : > { %v2127_v19 = vpop.f32.mrb[1].mxu1 }
  0xf0   : > { %v291_v15 = vpop.f32.mrb[0].mxu0  ;;  %v365_v21 = vpop.f32.mrb[2].mxu1 }
  0xf1   : > { %v363_v17 = vadd.f32 %v362_v16, %v291_v15  ;;  %v2115_v18 = vpop.f32.mrb[1].mxu0  ;;  %v2128_v24 = vpop.f32.mrb[3].mxu1 }
  0xf2   : > { %v294_v20 = vpop.f32.mrb[2].mxu0 }
  0xf3   : > { %v366_v22 = vadd.f32 %v365_v21, %v294_v20  ;;  %v2116_v23 = vpop.f32.mrb[3].mxu0 }
  0xfe   : > { %v540_v25 = vpop.f32.mrb[4].mxu1 }
  0xff   : > { %v2151_v28 = vpop.f32.mrb[5].mxu1 }
 0x100   : > { %v450_v1 = vpop.f32.mrb[4].mxu0  ;;  %v543_v31 = vpop.f32.mrb[6].mxu1 }
 0x101   : > { %v457_v26 = vadd.f32 %v450_v1, %v363_v17  ;;  %v2139_v27 = vpop.f32.mrb[5].mxu0  ;;  %v2152_v35 = vpop.f32.mrb[7].mxu1 }
 0x102   : > { %v453_v30 = vpop.f32.mrb[6].mxu0 }
 0x103   : > { %v547_v32 = vadd.f32 %v540_v25, %v457_v26  ;;  %v458_v33 = vadd.f32 %v453_v30, %v366_v22  ;;  %v2140_v34 = vpop.f32.mrb[7].mxu0 }
 0x105   : > { %v556_v36 = vadd.f32 %v2875_v29, %v547_v32  ;;  %v548_v37 = vadd.f32 %v543_v31, %v458_v33 }
 0x107   : > { %v558_v38 = vmul.f32 0.5, %v556_v36  ;;  %v557_v39 = vadd.f32 %v2875_v29, %v548_v37 }
 0x109   : > { %2421 = vtanh.f32 %v558_v38  ;;  %v559_v40 = vmul.f32 0.5, %v557_v39 }
 0x10b   : > { %2423 = vtanh.f32 %v559_v40 }
 0x10e   : > { %v734_v42 = vpop.f32.mrb[8].mxu1 }
 0x10f   : > { %v2175_v45 = vpop.f32.mrb[9].mxu1 }
 0x110   : > { %v656_v41 = vpop.f32.mrb[8].mxu0  ;;  %v737_v47 = vpop.f32.mrb[10].mxu1 }
 0x111   : > { %v735_v43 = vadd.f32 %v734_v42, %v656_v41  ;;  %v2163_v44 = vpop.f32.mrb[9].mxu0  ;;  %v2176_v51 = vpop.f32.mrb[11].mxu1 }
 0x112   : > { %v659_v46 = vpop.f32.mrb[10].mxu0 }
 0x113   : > { %v2422_v48 = vpop.eup %2421  ;;  %v738_v49 = vadd.f32 %v737_v47, %v659_v46  ;;  %v2164_v50 = vpop.f32.mrb[11].mxu0 }
 0x114   : > { %v562_v52 = vadd.f32 1.0, %v2422_v48 }
 0x115   : > { %v2424_v53 = vpop.eup %2423 }
 0x116   : > { %v564_v54 = vmul.f32 0.5, %v562_v52  ;;  %v563_v55 = vadd.f32 1.0, %v2424_v53 }
 0x118   : > { %566 = vst [vmem:[%s2885_s12] sm:$0xff] %v564_v54  ;;  %v565_v56 = vmul.f32 0.5, %v563_v55 }
 0x11a   : > { %567 = vst [vmem:[%s2885_s12 + $0x8] sm:$0x3f] %v565_v56 }
 0x11e   : > { %v909_v58 = vpop.f32.mrb[12].mxu1 }
 0x11f   : > { %v2199_v61 = vpop.f32.mrb[13].mxu1 }
 0x120   : > { %v825_v57 = vpop.f32.mrb[12].mxu0  ;;  %v912_v63 = vpop.f32.mrb[14].mxu1 }
 0x121   : > { %v832_v59 = vadd.f32 %v825_v57, %v735_v43  ;;  %v2187_v60 = vpop.f32.mrb[13].mxu0  ;;  %v2200_v4 = vpop.f32.mrb[15].mxu1 }
 0x122   : > { %v828_v62 = vpop.f32.mrb[14].mxu0 }
 0x123   : > { %v916_v0 = vadd.f32 %v909_v58, %v832_v59  ;;  %v833_v2 = vadd.f32 %v828_v62, %v738_v49  ;;  %v2188_v3 = vpop.f32.mrb[15].mxu0 }
 0x125   : > { %v925_v5 = vadd.f32 %v2875_v29, %v916_v0  ;;  %v917_v6 = vadd.f32 %v912_v63, %v833_v2 }
 0x127   : > { %v927_v7 = vmul.f32 0.5, %v925_v5  ;;  %v926_v8 = vadd.f32 %v2875_v29, %v917_v6 }
 0x129   : > { %2425 = vtanh.f32 %v927_v7  ;;  %v928_v9 = vmul.f32 0.5, %v926_v8 }
 0x12b   : > { %2427 = vtanh.f32 %v928_v9 }
 0x12e   : > { %v1102_v11 = vpop.f32.mrb[16].mxu1 }
 0x12f   : > { %v2223_v14 = vpop.f32.mrb[17].mxu1 }
 0x130   : > { %v1031_v10 = vpop.f32.mrb[16].mxu0  ;;  %v1105_v16 = vpop.f32.mrb[18].mxu1 }
 0x131   : > { %v1103_v12 = vadd.f32 %v1102_v11, %v1031_v10  ;;  %v2211_v13 = vpop.f32.mrb[17].mxu0  ;;  %v2224_v20 = vpop.f32.mrb[19].mxu1 }
 0x132   : > { %v1034_v15 = vpop.f32.mrb[18].mxu0 }
 0x133   : > { %v2426_v17 = vpop.eup %2425  ;;  %v1106_v18 = vadd.f32 %v1105_v16, %v1034_v15  ;;  %v2212_v19 = vpop.f32.mrb[19].mxu0 }
 0x134   : > { %v931_v21 = vadd.f32 1.0, %v2426_v17 }
 0x135   : > { %v2428_v22 = vpop.eup %2427 }
 0x136   : > { %v933_v23 = vmul.f32 0.5, %v931_v21  ;;  %v932_v24 = vadd.f32 1.0, %v2428_v22 }
 0x138   : > { %935 = vst [vmem:[%s2885_s12 + $0xe] sm:$0xff] %v933_v23  ;;  %v934_v1 = vmul.f32 0.5, %v932_v24 }
 0x13a   : > { %936 = vst [vmem:[%s2885_s12 + $0x16] sm:$0x3f] %v934_v1 }
 0x13e   : > { %v1280_v26 = vpop.f32.mrb[20].mxu1 }
 0x13f   : > { %v2247_v30 = vpop.f32.mrb[21].mxu1 }
 0x140   : > { %v1190_v25 = vpop.f32.mrb[20].mxu0  ;;  %v1283_v32 = vpop.f32.mrb[22].mxu1 }
 0x141   : > { %v1197_v27 = vadd.f32 %v1190_v25, %v1103_v12  ;;  %v2235_v28 = vpop.f32.mrb[21].mxu0  ;;  %v2248_v36 = vpop.f32.mrb[23].mxu1 }
 0x142   : > { %v1193_v31 = vpop.f32.mrb[22].mxu0 }
 0x143   : > { %v1287_v33 = vadd.f32 %v1280_v26, %v1197_v27  ;;  %v1198_v34 = vadd.f32 %v1193_v31, %v1106_v18  ;;  %v2236_v35 = vpop.f32.mrb[23].mxu0 }
 0x145   : > { %v1296_v37 = vadd.f32 %v2875_v29, %v1287_v33  ;;  %v1288_v38 = vadd.f32 %v1283_v32, %v1198_v34 }
 0x147   : > { %v1298_v39 = vmul.f32 0.5, %v1296_v37  ;;  %v1297_v40 = vadd.f32 %v2875_v29, %v1288_v38 }
 0x149   : > { %2429 = vtanh.f32 %v1298_v39  ;;  %v1299_v41 = vmul.f32 0.5, %v1297_v40 }
 0x14b   : > { %2431 = vtanh.f32 %v1299_v41 }
 0x14e   : > { %v1474_v43 = vpop.f32.mrb[24].mxu1 }
 0x14f   : > { %v2271_v46 = vpop.f32.mrb[25].mxu1 }
 0x150   : > { %v1396_v42 = vpop.f32.mrb[24].mxu0  ;;  %v1477_v48 = vpop.f32.mrb[26].mxu1 }
 0x151   : > { %v1475_v44 = vadd.f32 %v1474_v43, %v1396_v42  ;;  %v2259_v45 = vpop.f32.mrb[25].mxu0  ;;  %v2272_v52 = vpop.f32.mrb[27].mxu1 }
 0x152   : > { %v1399_v47 = vpop.f32.mrb[26].mxu0 }
 0x153   : > { %v2430_v49 = vpop.eup %2429  ;;  %v1478_v50 = vadd.f32 %v1477_v48, %v1399_v47  ;;  %v2260_v51 = vpop.f32.mrb[27].mxu0 }
 0x154   : > { %v1302_v53 = vadd.f32 1.0, %v2430_v49 }
 0x155   : > { %v2432_v54 = vpop.eup %2431 }
 0x156   : > { %v1304_v55 = vmul.f32 0.5, %v1302_v53  ;;  %v1303_v56 = vadd.f32 1.0, %v2432_v54 }
 0x158   : > { %1306 = vst [vmem:[%s2885_s12 + $0x1c] sm:$0xff] %v1304_v55  ;;  %v1305_v57 = vmul.f32 0.5, %v1303_v56 }
 0x15a   : > { %1307 = vst [vmem:[%s2885_s12 + $0x24] sm:$0x3f] %v1305_v57 }
 0x15e   : > { %v1649_v59 = vpop.f32.mrb[28].mxu1 }
 0x15f   : > { %v2295_v62 = vpop.f32.mrb[29].mxu1 }
 0x160   : > { %v1565_v58 = vpop.f32.mrb[28].mxu0  ;;  %v1652_v0 = vpop.f32.mrb[30].mxu1 }
 0x161   : > { %v1572_v60 = vadd.f32 %v1565_v58, %v1475_v44  ;;  %v2283_v61 = vpop.f32.mrb[29].mxu0  ;;  %v2296_v5 = vpop.f32.mrb[31].mxu1 }
 0x162   : > { %v1568_v63 = vpop.f32.mrb[30].mxu0 }
 0x163   : > { %v1656_v2 = vadd.f32 %v1649_v59, %v1572_v60  ;;  %v1573_v3 = vadd.f32 %v1568_v63, %v1478_v50  ;;  %v2284_v4 = vpop.f32.mrb[31].mxu0 }
 0x165   : > { %v1665_v6 = vadd.f32 %v2875_v29, %v1656_v2  ;;  %v1657_v7 = vadd.f32 %v1652_v0, %v1573_v3 }
 0x167   : > { %v1667_v8 = vmul.f32 0.5, %v1665_v6  ;;  %v1666_v9 = vadd.f32 %v2875_v29, %v1657_v7 }
 0x169   : > { %2433 = vtanh.f32 %v1667_v8  ;;  %v1668_v10 = vmul.f32 0.5, %v1666_v9 }
 0x16b   : > { %2435 = vtanh.f32 %v1668_v10 }
 0x173   : > { %v2434_v11 = vpop.eup %2433 }
 0x174   : > { %v1671_v12 = vadd.f32 1.0, %v2434_v11 }
 0x175   : > { %v2436_v13 = vpop.eup %2435 }
 0x176   : > { %v1673_v14 = vmul.f32 0.5, %v1671_v12  ;;  %v1672_v15 = vadd.f32 1.0, %v2436_v13 }
 0x178   : > { %1675 = vst [vmem:[%s2885_s12 + $0x2a] sm:$0xff] %v1673_v14  ;;  %v1674_v16 = vmul.f32 0.5, %v1672_v15 }
 0x17a   : > { %1676 = vst [vmem:[%s2885_s12 + $0x32] sm:$0x3f] %v1674_v16 }
 0x17b PF: > { %s13_s16 = sadd.s32 1, %s2475_s16   ;;  %s2920_s12 = smov %s2467_s14 }
 0x17c   : > { %p10_p7 = scmp.ge.s32.totalorder %s13_s16, 30   ;;  %s2921_s13 = smov %s2471_s15 }
 0x17d   : > { %s2922_s14 = smov %s2925_s17  ;;  %s2923_s15 = smov %s2929_s18 }
 0x17e   :  { %12 = sbr.rel (!%p10_p7) target bundleno = 3 (0x3), region = 80 }

</bundles_post_ra>
